<compile_context>
chip_gen: v6e
topology: v6e:2x2x1
jax: 0.10.0
libtpu: 0.0.40
codegen_flags: <defaults>
</compile_context>

<pallas_src>
import jax
import jax.numpy as jnp
from jax.experimental import pallas as pl
from jax.experimental.pallas import tpu as pltpu

BN_EPS = 1e-5
MXU_DTYPE = jnp.bfloat16   # matmul operand dtype (accumulation stays f32)


def _round_up(x, m):
  return ((x + m - 1) // m) * m


# ----------------------------------------------------------------------------
# Pallas kernels
# ----------------------------------------------------------------------------
def _conv_bn_relu_pool_kernel(x_ref, w_ref, shift_ref, o_ref):
  """Fused conv(+bias+BN) + ReLU + 2x2 max-pool for one row tile.

  x_ref:     (4, TM, K)  bf16  im2col patches; leading dim = pool-window tap.
  w_ref:     (K, Cout)   bf16  conv weights with BN scale folded in.
  shift_ref: (1, Cout)   f32   folded conv-bias / BN shift.
  o_ref:     (TM, Cout)  f32   pooled activations (rows = (n, oh, ow)).

  The 2x2 max-pool commutes with the per-channel shift add and with ReLU, so
  we take the element-wise max of the four per-tap matmuls (BN scale already
  folded into w per tap) and apply shift + ReLU once.
  """
  w = w_ref[...]
  acc = jnp.dot(x_ref[0], w, preferred_element_type=jnp.float32)
  for t in range(1, 4):
    acc = jnp.maximum(
        acc, jnp.dot(x_ref[t], w, preferred_element_type=jnp.float32))
  o_ref[...] = jnp.maximum(acc + shift_ref[...], 0.0).astype(o_ref.dtype)


def _linear_kernel(x_ref, w_ref, b_ref, o_ref):
  """o = x @ w + b (classifier head; output columns pre-padded to 128 lanes)."""
  o_ref[...] = (jnp.dot(x_ref[...], w_ref[...],
                        preferred_element_type=jnp.float32)
                + b_ref[...]).astype(o_ref.dtype)


# ----------------------------------------------------------------------------
# Wrappers
# ----------------------------------------------------------------------------
def _im2col_pool_taps(x_nhwc, k, pad, dtype):
  """NHWC -> (4, N*oh*ow, k*k*C) tap-major im2col (plain-JAX glue).

  Tap t = 2*dh + dw selects the conv-output pixel (2*oh+dh, 2*ow+dw), so the
  four members of each 2x2 max-pool window share the same row index across
  the leading tap axis.  Column order is (kh, kw, ci), matching the
  (2,3,1,0)-transposed weight matrix.  Total rows equal N*H*W (no duplication
  relative to a plain im2col).
  """
  n, h, w, c = x_nhwc.shape
  xp = jnp.pad(x_nhwc, ((0, 0), (pad, pad), (pad, pad), (0, 0)))
  cols = [xp[:, kh:kh + h, kw:kw + w, :] for kh in range(k) for kw in range(k)]
  p = jnp.stack(cols, axis=3).reshape(n, h, w, k * k * c)
  oh, ow = h // 2, w // 2
  taps = [p[:, dh::2, dw::2, :].reshape(n * oh * ow, k * k * c)
          for dh in (0, 1) for dw in (0, 1)]
  return jnp.stack(taps, axis=0).astype(dtype)


def conv_bn_relu_pool(x_nhwc, conv_w, conv_b, gamma, beta, mean, var, *,
                      tm_target=512):
  """One fused conv block.  conv_w is PyTorch-layout (Cout, Cin, kH, kW)."""
  n, h, w, cin = x_nhwc.shape
  cout, _, kh, _ = conv_w.shape
  kdim = kh * kh * cin
  oh, ow = h // 2, w // 2

  patches = _im2col_pool_taps(x_nhwc, kh, kh // 2, MXU_DTYPE)  # (4, M, K)
  m = patches.shape[1]

  # Row tile: multiple of 8 sublanes, capped at tm_target; pad M so the grid
  # divides exactly (padded rows are garbage and sliced off below).
  tm = min(tm_target, _round_up(m, 8))
  m_pad = _round_up(m, tm)
  if m_pad != m:
    patches = jnp.pad(patches, ((0, 0), (0, m_pad - m), (0, 0)))

  # Fold BatchNorm (eval mode) + conv bias into weights / shift at trace time.
  scale = gamma / jnp.sqrt(var + BN_EPS)                          # (Cout,)
  w_mat = (jnp.transpose(conv_w, (2, 3, 1, 0)).reshape(kdim, cout)
           * scale[None, :]).astype(MXU_DTYPE)                    # (K, Cout)
  shift = ((conv_b - mean) * scale + beta).reshape(1, cout).astype(jnp.float32)

  pooled = pl.pallas_call(
      _conv_bn_relu_pool_kernel,
      out_shape=jax.ShapeDtypeStruct((m_pad, cout), jnp.float32),
      grid=(m_pad // tm,),
      in_specs=[
          pl.BlockSpec((4, tm, kdim), lambda i: (0, i, 0)),
          pl.BlockSpec((kdim, cout), lambda i: (0, 0)),
          pl.BlockSpec((1, cout), lambda i: (0, 0)),
      ],
      out_specs=pl.BlockSpec((tm, cout), lambda i: (i, 0)),
      compiler_params=pltpu.CompilerParams(
          dimension_semantics=("parallel",)),
  )(patches, w_mat, shift)
  return pooled[:m].reshape(n, oh, ow, cout)


def linear(x, w_t, b, *, lane_pad=128):
  """x @ w_t + b with output columns zero-padded to `lane_pad` lanes so the
  kernel stores are unmasked; the padding is sliced off outside.  Single
  block: the classifier operands are tiny (< a few MiB even at large batch)."""
  m, _ = x.shape
  n_out = w_t.shape[1]
  n_pad = _round_up(max(n_out, lane_pad), lane_pad)
  w_pad = jnp.pad(w_t, ((0, 0), (0, n_pad - n_out))).astype(jnp.float32)
  b_pad = jnp.pad(b.reshape(1, n_out),
                  ((0, 0), (0, n_pad - n_out))).astype(jnp.float32)
  out = pl.pallas_call(
      _linear_kernel,
      out_shape=jax.ShapeDtypeStruct((m, n_pad), jnp.float32),
  )(x.astype(jnp.float32), w_pad, b_pad)
  return out[:, :n_out]


def network_forward(x_nchw, params):
  x = jnp.transpose(x_nchw, (0, 2, 3, 1)).astype(jnp.float32)     # NHWC
  y = conv_bn_relu_pool(x, params["w1"], params["b1"], params["g1"],
                        params["be1"], params["m1"], params["v1"])
  y = conv_bn_relu_pool(y, params["w2"], params["b2"], params["g2"],
                        params["be2"], params["m2"], params["v2"])
  n, oh, ow, c = y.shape
  flat = y.reshape(n, oh * ow * c)            # NHWC flatten, no transpose
  # Permute the PyTorch Linear weight columns from (c, h, w) flatten order to
  # NHWC (h, w, c) order once at trace time (tiny array).
  lw = params["lw"]                           # (10, C*H*W) in (c, h, w) order
  lw_nhwc = (lw.reshape(-1, c, oh, ow)
             .transpose(0, 2, 3, 1)
             .reshape(-1, c * oh * ow))       # columns now (h, w, c)
  return linear(flat, lw_nhwc.T, params["lb"])


# ----------------------------------------------------------------------------
# Pure-JAX reference (for self-check)
# ----------------------------------------------------------------------------
def reference_forward(x_nchw, p):
  def blk(x, w, b, g, be, m, v):
    y = jax.lax.conv_general_dilated(
        x, w, (1, 1), ((2, 2), (2, 2)),
        dimension_numbers=("NCHW", "OIHW", "NCHW"))
    y = y + b[None, :, None, None]
    y = (y - m[None, :, None, None]) / jnp.sqrt(v[None, :, None, None] + BN_EPS)
    y = y * g[None, :, None, None] + be[None, :, None, None]
    y = jnp.maximum(y, 0.0)
    return jax.lax.reduce_window(y, -jnp.inf, jax.lax.max,
                                 (1, 1, 2, 2), (1, 1, 2, 2), "VALID")
  y = blk(x_nchw, p["w1"], p["b1"], p["g1"], p["be1"], p["m1"], p["v1"])
  y = blk(y, p["w2"], p["b2"], p["g2"], p["be2"], p["m2"], p["v2"])
  flat = y.reshape(y.shape[0], -1)
  return flat @ p["lw"].T + p["lb"]


# ----------------------------------------------------------------------------
# Deterministic parameter init + driver
# ----------------------------------------------------------------------------
def init_params(key):
  ks = jax.random.split(key, 10)
  f32 = jnp.float32
  return {
      "w1": 0.1 * jax.random.normal(ks[0], (16, 1, 5, 5), f32),
      "b1": 0.1 * jax.random.normal(ks[1], (16,), f32),
      "g1": 1.0 + 0.1 * jax.random.normal(ks[2], (16,), f32),
      "be1": 0.1 * jax.random.normal(ks[3], (16,), f32),
      "m1": 0.05 * jax.random.normal(ks[4], (16,), f32),
      "v1": jax.random.uniform(ks[5], (16,), f32, 0.5, 1.5),
      "w2": 0.05 * jax.random.normal(ks[6], (32, 16, 5, 5), f32),
      "b2": 0.1 * jax.random.normal(ks[7], (32,), f32),
      "g2": 1.0 + 0.1 * jax.random.normal(ks[8], (32,), f32),
      "be2": 0.1 * jax.random.normal(ks[9], (32,), f32),
      "m2": 0.05 * jax.random.normal(ks[0], (32,), f32),
      "v2": jax.random.uniform(ks[1], (32,), f32, 0.5, 1.5),
      "lw": 0.02 * jax.random.normal(ks[2], (10, 32 * 7 * 7), f32),
      "lb": 0.1 * jax.random.normal(ks[3], (10,), f32),
  }


if __name__ == "__main__":
  key = jax.random.PRNGKey(0)
  k_x, k_p = jax.random.split(key)
  # Smallest shapes consistent with the module: 28x28 is forced by the
  # Linear(32*7*7) layer; batch kept small.
  x = jax.random.normal(k_x, (2, 1, 28, 28), jnp.float32)
  params = init_params(k_p)

  out = jax.block_until_ready(jax.jit(network_forward)(x, params))
  assert out.shape == (2, 10), out.shape

  ref = jax.block_until_ready(jax.jit(reference_forward)(x, params))
  # bf16 MXU operands (im2col patches + conv weights, f32 accumulation)
  # introduce a few e-3 of absolute error at the logits; tolerance is sized
  # for that (reference is full f32).
  err = jnp.max(jnp.abs(out - ref))
  assert jnp.allclose(out, ref, atol=3e-2, rtol=3e-2), (
      f"mismatch: max abs err {err}")

  print("KERNEL_OK")
</pallas_src>

<mosaic_0001>
module attributes {stable_mosaic.version = 11 : i64} {
  func.func @_conv_bn_relu_pool_kernel(%arg0: i32, %arg1: memref<4x392x25xbf16, #tpu.memory_space<vmem>>, %arg2: memref<25x16xbf16, #tpu.memory_space<vmem>>, %arg3: memref<1x16xf32, #tpu.memory_space<vmem>>, %arg4: memref<392x16xf32, #tpu.memory_space<vmem>>) attributes {dimension_semantics = [#tpu.dimension_semantics<parallel>], iteration_bounds = array<i64: 1>, scalar_prefetch = 0 : i64, scratch_operands = 0 : i64, tpu.core_type = #tpu.core_type<tc>, window_params = [{transform_indices = @transform_0, window_bounds = array<i64: 4, 392, 25>}, {pipeline_mode = #tpu.pipeline_mode<synchronous>, transform_indices = @transform_1, window_bounds = array<i64: 25, 16>}, {pipeline_mode = #tpu.pipeline_mode<synchronous>, transform_indices = @transform_2, window_bounds = array<i64: 1, 16>}, {transform_indices = @transform_3, window_bounds = array<i64: 392, 16>}]} {
    %c0 = arith.constant 0 : index
    %c0_0 = arith.constant 0 : index
    %0 = vector.load %arg2[%c0, %c0_0] : memref<25x16xbf16, #tpu.memory_space<vmem>>, vector<25x16xbf16>
    %c0_1 = arith.constant 0 : index
    %c0_2 = arith.constant 0 : index
    %c0_3 = arith.constant 0 : index
    %1 = vector.load %arg1[%c0_1, %c0_2, %c0_3] : memref<4x392x25xbf16, #tpu.memory_space<vmem>>, vector<1x392x25xbf16>
    %2 = vector.shape_cast %1 : vector<1x392x25xbf16> to vector<392x25xbf16>
    %cst = arith.constant dense<0.000000e+00> : vector<392x16xf32>
    %3 = tpu.matmul %2, %0, %cst {dimension_numbers = #tpu.dot_dimension_numbers<[1], [0], [0], [1], [0, 0, 1, 1], [], []>} : vector<392x25xbf16>, vector<25x16xbf16>, vector<392x16xf32> -> vector<392x16xf32>
    %c1 = arith.constant 1 : index
    %c0_4 = arith.constant 0 : index
    %c0_5 = arith.constant 0 : index
    %4 = vector.load %arg1[%c1, %c0_4, %c0_5] : memref<4x392x25xbf16, #tpu.memory_space<vmem>>, vector<1x392x25xbf16>
    %5 = vector.shape_cast %4 : vector<1x392x25xbf16> to vector<392x25xbf16>
    %cst_6 = arith.constant dense<0.000000e+00> : vector<392x16xf32>
    %6 = tpu.matmul %5, %0, %cst_6 {dimension_numbers = #tpu.dot_dimension_numbers<[1], [0], [0], [1], [0, 0, 1, 1], [], []>} : vector<392x25xbf16>, vector<25x16xbf16>, vector<392x16xf32> -> vector<392x16xf32>
    %7 = arith.maximumf %3, %6 : vector<392x16xf32>
    %c2 = arith.constant 2 : index
    %c0_7 = arith.constant 0 : index
    %c0_8 = arith.constant 0 : index
    %8 = vector.load %arg1[%c2, %c0_7, %c0_8] : memref<4x392x25xbf16, #tpu.memory_space<vmem>>, vector<1x392x25xbf16>
    %9 = vector.shape_cast %8 : vector<1x392x25xbf16> to vector<392x25xbf16>
    %cst_9 = arith.constant dense<0.000000e+00> : vector<392x16xf32>
    %10 = tpu.matmul %9, %0, %cst_9 {dimension_numbers = #tpu.dot_dimension_numbers<[1], [0], [0], [1], [0, 0, 1, 1], [], []>} : vector<392x25xbf16>, vector<25x16xbf16>, vector<392x16xf32> -> vector<392x16xf32>
    %11 = arith.maximumf %7, %10 : vector<392x16xf32>
    %c3 = arith.constant 3 : index
    %c0_10 = arith.constant 0 : index
    %c0_11 = arith.constant 0 : index
    %12 = vector.load %arg1[%c3, %c0_10, %c0_11] : memref<4x392x25xbf16, #tpu.memory_space<vmem>>, vector<1x392x25xbf16>
    %13 = vector.shape_cast %12 : vector<1x392x25xbf16> to vector<392x25xbf16>
    %cst_12 = arith.constant dense<0.000000e+00> : vector<392x16xf32>
    %14 = tpu.matmul %13, %0, %cst_12 {dimension_numbers = #tpu.dot_dimension_numbers<[1], [0], [0], [1], [0, 0, 1, 1], [], []>} : vector<392x25xbf16>, vector<25x16xbf16>, vector<392x16xf32> -> vector<392x16xf32>
    %15 = arith.maximumf %11, %14 : vector<392x16xf32>
    %c0_13 = arith.constant 0 : index
    %c0_14 = arith.constant 0 : index
    %16 = vector.load %arg3[%c0_13, %c0_14] : memref<1x16xf32, #tpu.memory_space<vmem>>, vector<1x16xf32>
    %17 = vector.broadcast %16 : vector<1x16xf32> to vector<392x16xf32>
    %18 = arith.addf %15, %17 : vector<392x16xf32>
    %cst_15 = arith.constant 0.000000e+00 : f32
    %19 = vector.broadcast %cst_15 : f32 to vector<392x16xf32>
    %20 = arith.maximumf %18, %19 : vector<392x16xf32>
    %c0_16 = arith.constant 0 : index
    %c0_17 = arith.constant 0 : index
    %21 = vector.load %arg4[%c0_16, %c0_17] : memref<392x16xf32, #tpu.memory_space<vmem>>, vector<392x16xf32>
    tpu.vector_store %arg4[%c0_16, %c0_17], %20 {strides = array<i32>} : memref<392x16xf32, #tpu.memory_space<vmem>>, vector<392x16xf32>,
    return
  }
  func.func @transform_0(%arg0: i32) -> (i32, i32, i32) {
    %c0_i32 = arith.constant 0 : i32
    %c0_i32_0 = arith.constant 0 : i32
    %c0_i32_1 = arith.constant 0 : i32
    return %c0_i32, %arg0, %c0_i32_0 : i32, i32, i32
  }
  func.func @transform_1(%arg0: i32) -> (i32, i32) {
    %c0_i32 = arith.constant 0 : i32
    %c0_i32_0 = arith.constant 0 : i32
    %c0_i32_1 = arith.constant 0 : i32
    return %c0_i32, %c0_i32_0 : i32, i32
  }
  func.func @transform_2(%arg0: i32) -> (i32, i32) {
    %c0_i32 = arith.constant 0 : i32
    %c0_i32_0 = arith.constant 0 : i32
    %c0_i32_1 = arith.constant 0 : i32
    return %c0_i32, %c0_i32_0 : i32, i32
  }
  func.func @transform_3(%arg0: i32) -> (i32, i32) {
    %c0_i32 = arith.constant 0 : i32
    %c0_i32_0 = arith.constant 0 : i32
    return %arg0, %c0_i32 : i32, i32
  }
}

module attributes {stable_mosaic.version = 11 : i64} {
  func.func @_conv_bn_relu_pool_kernel(%arg0: i32, %arg1: memref<4x104x400xbf16, #tpu.memory_space<vmem>>, %arg2: memref<400x32xbf16, #tpu.memory_space<vmem>>, %arg3: memref<1x32xf32, #tpu.memory_space<vmem>>, %arg4: memref<104x32xf32, #tpu.memory_space<vmem>>) attributes {dimension_semantics = [#tpu.dimension_semantics<parallel>], iteration_bounds = array<i64: 1>, scalar_prefetch = 0 : i64, scratch_operands = 0 : i64, tpu.core_type = #tpu.core_type<tc>, window_params = [{transform_indices = @transform_0, window_bounds = array<i64: 4, 104, 400>}, {pipeline_mode = #tpu.pipeline_mode<synchronous>, transform_indices = @transform_1, window_bounds = array<i64: 400, 32>}, {pipeline_mode = #tpu.pipeline_mode<synchronous>, transform_indices = @transform_2, window_bounds = array<i64: 1, 32>}, {transform_indices = @transform_3, window_bounds = array<i64: 104, 32>}]} {
    %c0 = arith.constant 0 : index
    %c0_0 = arith.constant 0 : index
    %0 = vector.load %arg2[%c0, %c0_0] : memref<400x32xbf16, #tpu.memory_space<vmem>>, vector<400x32xbf16>
    %c0_1 = arith.constant 0 : index
    %c0_2 = arith.constant 0 : index
    %c0_3 = arith.constant 0 : index
    %1 = vector.load %arg1[%c0_1, %c0_2, %c0_3] : memref<4x104x400xbf16, #tpu.memory_space<vmem>>, vector<1x104x400xbf16>
    %2 = vector.shape_cast %1 : vector<1x104x400xbf16> to vector<104x400xbf16>
    %cst = arith.constant dense<0.000000e+00> : vector<104x32xf32>
    %3 = tpu.matmul %2, %0, %cst {dimension_numbers = #tpu.dot_dimension_numbers<[1], [0], [0], [1], [0, 0, 1, 1], [], []>} : vector<104x400xbf16>, vector<400x32xbf16>, vector<104x32xf32> -> vector<104x32xf32>
    %c1 = arith.constant 1 : index
    %c0_4 = arith.constant 0 : index
    %c0_5 = arith.constant 0 : index
    %4 = vector.load %arg1[%c1, %c0_4, %c0_5] : memref<4x104x400xbf16, #tpu.memory_space<vmem>>, vector<1x104x400xbf16>
    %5 = vector.shape_cast %4 : vector<1x104x400xbf16> to vector<104x400xbf16>
    %cst_6 = arith.constant dense<0.000000e+00> : vector<104x32xf32>
    %6 = tpu.matmul %5, %0, %cst_6 {dimension_numbers = #tpu.dot_dimension_numbers<[1], [0], [0], [1], [0, 0, 1, 1], [], []>} : vector<104x400xbf16>, vector<400x32xbf16>, vector<104x32xf32> -> vector<104x32xf32>
    %7 = arith.maximumf %3, %6 : vector<104x32xf32>
    %c2 = arith.constant 2 : index
    %c0_7 = arith.constant 0 : index
    %c0_8 = arith.constant 0 : index
    %8 = vector.load %arg1[%c2, %c0_7, %c0_8] : memref<4x104x400xbf16, #tpu.memory_space<vmem>>, vector<1x104x400xbf16>
    %9 = vector.shape_cast %8 : vector<1x104x400xbf16> to vector<104x400xbf16>
    %cst_9 = arith.constant dense<0.000000e+00> : vector<104x32xf32>
    %10 = tpu.matmul %9, %0, %cst_9 {dimension_numbers = #tpu.dot_dimension_numbers<[1], [0], [0], [1], [0, 0, 1, 1], [], []>} : vector<104x400xbf16>, vector<400x32xbf16>, vector<104x32xf32> -> vector<104x32xf32>
    %11 = arith.maximumf %7, %10 : vector<104x32xf32>
    %c3 = arith.constant 3 : index
    %c0_10 = arith.constant 0 : index
    %c0_11 = arith.constant 0 : index
    %12 = vector.load %arg1[%c3, %c0_10, %c0_11] : memref<4x104x400xbf16, #tpu.memory_space<vmem>>, vector<1x104x400xbf16>
    %13 = vector.shape_cast %12 : vector<1x104x400xbf16> to vector<104x400xbf16>
    %cst_12 = arith.constant dense<0.000000e+00> : vector<104x32xf32>
    %14 = tpu.matmul %13, %0, %cst_12 {dimension_numbers = #tpu.dot_dimension_numbers<[1], [0], [0], [1], [0, 0, 1, 1], [], []>} : vector<104x400xbf16>, vector<400x32xbf16>, vector<104x32xf32> -> vector<104x32xf32>
    %15 = arith.maximumf %11, %14 : vector<104x32xf32>
    %c0_13 = arith.constant 0 : index
    %c0_14 = arith.constant 0 : index
    %16 = vector.load %arg3[%c0_13, %c0_14] : memref<1x32xf32, #tpu.memory_space<vmem>>, vector<1x32xf32>
    %17 = vector.broadcast %16 : vector<1x32xf32> to vector<104x32xf32>
    %18 = arith.addf %15, %17 : vector<104x32xf32>
    %cst_15 = arith.constant 0.000000e+00 : f32
    %19 = vector.broadcast %cst_15 : f32 to vector<104x32xf32>
    %20 = arith.maximumf %18, %19 : vector<104x32xf32>
    %c0_16 = arith.constant 0 : index
    %c0_17 = arith.constant 0 : index
    %21 = vector.load %arg4[%c0_16, %c0_17] : memref<104x32xf32, #tpu.memory_space<vmem>>, vector<104x32xf32>
    tpu.vector_store %arg4[%c0_16, %c0_17], %20 {strides = array<i32>} : memref<104x32xf32, #tpu.memory_space<vmem>>, vector<104x32xf32>,
    return
  }
  func.func @transform_0(%arg0: i32) -> (i32, i32, i32) {
    %c0_i32 = arith.constant 0 : i32
    %c0_i32_0 = arith.constant 0 : i32
    %c0_i32_1 = arith.constant 0 : i32
    return %c0_i32, %arg0, %c0_i32_0 : i32, i32, i32
  }
  func.func @transform_1(%arg0: i32) -> (i32, i32) {
    %c0_i32 = arith.constant 0 : i32
    %c0_i32_0 = arith.constant 0 : i32
    %c0_i32_1 = arith.constant 0 : i32
    return %c0_i32, %c0_i32_0 : i32, i32
  }
  func.func @transform_2(%arg0: i32) -> (i32, i32) {
    %c0_i32 = arith.constant 0 : i32
    %c0_i32_0 = arith.constant 0 : i32
    %c0_i32_1 = arith.constant 0 : i32
    return %c0_i32, %c0_i32_0 : i32, i32
  }
  func.func @transform_3(%arg0: i32) -> (i32, i32) {
    %c0_i32 = arith.constant 0 : i32
    %c0_i32_0 = arith.constant 0 : i32
    return %arg0, %c0_i32 : i32, i32
  }
}

module attributes {stable_mosaic.version = 11 : i64} {
  func.func @_linear_kernel(%arg0: memref<2x1568xf32, #tpu.memory_space<vmem>>, %arg1: memref<1568x128xf32, #tpu.memory_space<vmem>>, %arg2: memref<1x128xf32, #tpu.memory_space<vmem>>, %arg3: memref<2x128xf32, #tpu.memory_space<vmem>>) attributes {dimension_semantics = [], scalar_prefetch = 0 : i64, scratch_operands = 0 : i64, tpu.core_type = #tpu.core_type<tc>} {
    %c0 = arith.constant 0 : index
    %c0_0 = arith.constant 0 : index
    %0 = vector.load %arg0[%c0, %c0_0] : memref<2x1568xf32, #tpu.memory_space<vmem>>, vector<2x1568xf32>
    %c0_1 = arith.constant 0 : index
    %c0_2 = arith.constant 0 : index
    %1 = vector.load %arg1[%c0_1, %c0_2] : memref<1568x128xf32, #tpu.memory_space<vmem>>, vector<1568x128xf32>
    %cst = arith.constant dense<0.000000e+00> : vector<2x128xf32>
    %2 = tpu.matmul %0, %1, %cst {dimension_numbers = #tpu.dot_dimension_numbers<[1], [0], [0], [1], [0, 0, 1, 1], [], []>} : vector<2x1568xf32>, vector<1568x128xf32>, vector<2x128xf32> -> vector<2x128xf32>
    %c0_3 = arith.constant 0 : index
    %c0_4 = arith.constant 0 : index
    %3 = vector.load %arg2[%c0_3, %c0_4] : memref<1x128xf32, #tpu.memory_space<vmem>>, vector<1x128xf32>
    %4 = vector.broadcast %3 : vector<1x128xf32> to vector<2x128xf32>
    %5 = arith.addf %2, %4 : vector<2x128xf32>
    %c0_5 = arith.constant 0 : index
    %c0_6 = arith.constant 0 : index
    %6 = vector.load %arg3[%c0_5, %c0_6] : memref<2x128xf32, #tpu.memory_space<vmem>>, vector<2x128xf32>
    tpu.vector_store %arg3[%c0_5, %c0_6], %5 {strides = array<i32>} : memref<2x128xf32, #tpu.memory_space<vmem>>, vector<2x128xf32>,
    return
  }
}

</mosaic_0001>

<bundles_post_ra>
// kernel: network_forward.3
= control target key start
LH: loop header
LB: loop body
LE: loop exit
PB: predicated region body
PF: predicated region fallthrough
CT: control target
= control target key end

     0   :  { %vm278_vm0 = vcmask 1043456   ;;  %vm279_vm1 = vcmask 1044480   ;;  %v4574_v0 = vmov 0.0   ;;  %v3243_v2 = vmov 65535   ;;  %s4570_s1 = inlined_call_operand.vmem [shape: bf16[25,16], index: 1, kind: input, shape index: {}]   ;;  %s4571_s0 = inlined_call_operand.vmem [shape: bf16[4,392,25], index: 0, kind: input, shape index: {}]   ;;  %s4572_s2 = inlined_call_operand.vmem [shape: f32[1,16], index: 2, kind: input, shape index: {}]   ;;  %s4573_s3 = inlined_call_operand.vmem [shape: f32[392,16], index: 3, kind: output, shape index: {}]  }
   0x1   :  { %2721 = vmatprep.subr.bf16.mxu0 %v4574_v0  ;;  %2825 = vmatprep.subr.bf16.mxu1 %v4574_v0  ;;  %v3140_v1 = vld [vmem:[%s4570_s1 + $0x8] sm:$0x1f]   ;;  %v280_v3 = vsel %vm278_vm0, 4294967295, %v3243_v2  ;;  %vm3244_vm2 = vmmov 0   ;;  %v3141_v6 = vld [vmem:[%s4570_s1] sm:$0xff]   ;;  %vm202_vm3 = vcmask 203776  }
   0x2   :  { %v281_v4 = vsel %vm279_vm1, %v280_v3, 0  ;;  %2725 = vmatprep.mubr.msk.bf16.mxu0 %vm3244_vm2, %v4574_v0  ;;  %2829 = vmatprep.mubr.msk.bf16.mxu1 %vm3244_vm2, %v4574_v0  ;;  %v3142_v7 = vld [vmem:[%s4571_s0] sm:$0xff]   ;;  %v3144_v9 = vld [vmem:[%s4571_s0 + $0x8] sm:$0xff]   ;;  %v3146_v11 = vld [vmem:[%s4571_s0 + $0x10] sm:$0xff]   ;;  %vm2209_vm4 = vcmask 130048  }
   0x3   :  { %v283_v5 = vand.u32 %v3140_v1, %v281_v4  ;;  %v3143_v8 = vld [vmem:[%s4571_s0 + $0xc4] sm:$0xff]   ;;  %v3145_v10 = vld [vmem:[%s4571_s0 + $0xcc] sm:$0xff]   ;;  %v3147_v12 = vld [vmem:[%s4571_s0 + $0xd4] sm:$0xff]  }
   0x4   :  { %v3148_v13 = vld [vmem:[%s4571_s0 + $0x18] sm:$0xff]   ;;  %v3150_v15 = vld [vmem:[%s4571_s0 + $0x20] sm:$0xff]   ;;  %v3152_v17 = vld [vmem:[%s4571_s0 + $0x28] sm:$0xff]  }
   0x5   :  { %2722 = vmatpush3.bf16.msra.mxu0 %v283_v5  ;;  %2826 = vmatpush3.bf16.msra.mxu1 %v283_v5  ;;  %v3149_v14 = vld [vmem:[%s4571_s0 + $0xdc] sm:$0xff]   ;;  %v3151_v16 = vld [vmem:[%s4571_s0 + $0xe4] sm:$0xff]   ;;  %v3153_v18 = vld [vmem:[%s4571_s0 + $0xec] sm:$0xff]  }
   0x6   :  { %2723 = vmatprep.subr.bf16.mxu0 %v4574_v0  ;;  %2827 = vmatprep.subr.bf16.mxu1 %v4574_v0  ;;  %v3154_v19 = vld [vmem:[%s4571_s0 + $0x30] sm:$0xff]   ;;  %v3156_v21 = vld [vmem:[%s4571_s0 + $0x38] sm:$0xff]   ;;  %v3158_v23 = vld [vmem:[%s4571_s0 + $0x40] sm:$0xff]  }
   0x7   :  { %v3155_v20 = vld [vmem:[%s4571_s0 + $0xf4] sm:$0xff]   ;;  %v3157_v22 = vld [vmem:[%s4571_s0 + $0xfc] sm:$0xff]   ;;  %v3159_v24 = vld [vmem:[%s4571_s0 + $0x104] sm:$0xff]  }
   0x8   :  { %v3160_v25 = vld [vmem:[%s4571_s0 + $0x48] sm:$0xff]   ;;  %v3162_v27 = vld [vmem:[%s4571_s0 + $0x50] sm:$0xff]   ;;  %v3164_v29 = vld [vmem:[%s4571_s0 + $0x58] sm:$0xff]  }
   0x9   :  { %2724 = vmatpush3.bf16.msra.mxu0 %v3141_v6  ;;  %2828 = vmatpush3.bf16.msra.mxu1 %v3141_v6  ;;  %v3161_v26 = vld [vmem:[%s4571_s0 + $0x10c] sm:$0xff]   ;;  %v3163_v28 = vld [vmem:[%s4571_s0 + $0x114] sm:$0xff]   ;;  %v3165_v30 = vld [vmem:[%s4571_s0 + $0x11c] sm:$0xff]  }
   0xa   :  { %2929 = vmatprep.subr.bf16.mxu0 %v4574_v0  ;;  %3033 = vmatprep.subr.bf16.mxu1 %v4574_v0  ;;  %v3166_v31 = vld [vmem:[%s4571_s0 + $0x60] sm:$0xff]   ;;  %v3168_v33 = vld [vmem:[%s4571_s0 + $0x68] sm:$0xff]   ;;  %v3170_v35 = vld [vmem:[%s4571_s0 + $0x70] sm:$0xff]  }
   0xb   :  { %v3167_v32 = vld [vmem:[%s4571_s0 + $0x124] sm:$0xff]   ;;  %v3169_v34 = vld [vmem:[%s4571_s0 + $0x12c] sm:$0xff]   ;;  %v3171_v36 = vld [vmem:[%s4571_s0 + $0x134] sm:$0xff]  }
   0xc   :  { %2726 = vmatmul.mubr.msk.bf16.vlgmr.msra.gmra.mxu0 %vm202_vm3, %v3142_v7  ;;  %2830 = vmatmul.mubr.msk.bf16.vlgmr.msra.gmra.mxu1 %vm202_vm3, %v3143_v8  ;;  %v3172_v37 = vld [vmem:[%s4571_s0 + $0x78] sm:$0xff]   ;;  %v3174_v39 = vld [vmem:[%s4571_s0 + $0x80] sm:$0xff]   ;;  %v3176_v41 = vld [vmem:[%s4571_s0 + $0x88] sm:$0xff]  }
   0xd   :  { %2930 = vmatpush3.bf16.msra.mxu0 %v283_v5  ;;  %3034 = vmatpush3.bf16.msra.mxu1 %v283_v5  ;;  %v3173_v38 = vld [vmem:[%s4571_s0 + $0x13c] sm:$0xff]   ;;  %v3175_v40 = vld [vmem:[%s4571_s0 + $0x144] sm:$0xff]   ;;  %v3177_v42 = vld [vmem:[%s4571_s0 + $0x14c] sm:$0xff]  }
   0xe   :  { %2729 = vmatprep.mubr.msk.bf16.mxu0 %vm3244_vm2, %v4574_v0  ;;  %2833 = vmatprep.mubr.msk.bf16.mxu1 %vm3244_vm2, %v4574_v0  ;;  %v3178_v43 = vld [vmem:[%s4571_s0 + $0x90] sm:$0xff]   ;;  %v3180_v45 = vld [vmem:[%s4571_s0 + $0x98] sm:$0xff]   ;;  %v3182_v47 = vld [vmem:[%s4571_s0 + $0xa0] sm:$0xff]  }
   0xf   :  { %2931 = vmatprep.subr.bf16.mxu0 %v4574_v0  ;;  %3035 = vmatprep.subr.bf16.mxu1 %v4574_v0  ;;  %v3179_v44 = vld [vmem:[%s4571_s0 + $0x154] sm:$0xff]   ;;  %v3181_v46 = vld [vmem:[%s4571_s0 + $0x15c] sm:$0xff]   ;;  %v3183_v48 = vld [vmem:[%s4571_s0 + $0x164] sm:$0xff]  }
  0x10   :  { %v3184_v49 = vld [vmem:[%s4571_s0 + $0xa8] sm:$0xff]   ;;  %v3186_v51 = vld [vmem:[%s4571_s0 + $0xb0] sm:$0xff]   ;;  %v3188_v53 = vld [vmem:[%s4571_s0 + $0xb8] sm:$0xff]  }
  0x11   :  { %2932 = vmatpush3.bf16.msra.mxu0 %v3141_v6  ;;  %3036 = vmatpush3.bf16.msra.mxu1 %v3141_v6  ;;  %v3185_v50 = vld [vmem:[%s4571_s0 + $0x16c] sm:$0xff]   ;;  %v3187_v52 = vld [vmem:[%s4571_s0 + $0x174] sm:$0xff]   ;;  %v3189_v54 = vld [vmem:[%s4571_s0 + $0x17c] sm:$0xff]  }
  0x12   :  { %v3190_v55 = vld [vmem:[%s4571_s0 + $0xc0] ss:$0 sps:$4 sm:$0xff]   ;;  %v3191_v56 = vld [vmem:[%s4571_s0 + $0x184] ss:$0 sps:$4 sm:$0xff]   ;;  %v3192_v1 = vld [vmem:[%s4571_s0 + $0x188] sm:$0xff]  }
  0x13   :  { %v3193_v2 = vld [vmem:[%s4571_s0 + $0x24c] sm:$0xff]  }
  0x14   :  { %2730 = vmatmul.mubr.msk.bf16.gmra.mxu0 %vm202_vm3, %v3144_v9  ;;  %2834 = vmatmul.mubr.msk.bf16.gmra.mxu1 %vm202_vm3, %v3145_v10 }
  0x15   :  { %2733 = vmatprep.mubr.msk.bf16.mxu0 %vm3244_vm2, %v4574_v0  ;;  %2837 = vmatprep.mubr.msk.bf16.mxu1 %vm3244_vm2, %v4574_v0 }
  0x1c   :  { %2734 = vmatmul.mubr.msk.bf16.gmra.mxu0 %vm202_vm3, %v3146_v11  ;;  %2838 = vmatmul.mubr.msk.bf16.gmra.mxu1 %vm202_vm3, %v3147_v12 }
  0x1d   :  { %2737 = vmatprep.mubr.msk.bf16.mxu0 %vm3244_vm2, %v4574_v0  ;;  %2841 = vmatprep.mubr.msk.bf16.mxu1 %vm3244_vm2, %v4574_v0 }
  0x24   :  { %2738 = vmatmul.mubr.msk.bf16.gmra.mxu0 %vm202_vm3, %v3148_v13  ;;  %2842 = vmatmul.mubr.msk.bf16.gmra.mxu1 %vm202_vm3, %v3149_v14  ;;  %v3194_v13 = vld [vmem:[%s4571_s0 + $0x190] sm:$0xff]  }
  0x25   :  { %2741 = vmatprep.mubr.msk.bf16.mxu0 %vm3244_vm2, %v4574_v0  ;;  %2845 = vmatprep.mubr.msk.bf16.mxu1 %vm3244_vm2, %v4574_v0  ;;  %v3195_v14 = vld [vmem:[%s4571_s0 + $0x254] sm:$0xff]  }
  0x2c   :  { %2742 = vmatmul.mubr.msk.bf16.gmra.mxu0 %vm202_vm3, %v3150_v15  ;;  %2846 = vmatmul.mubr.msk.bf16.gmra.mxu1 %vm202_vm3, %v3151_v16 }
  0x2d   :  { %2745 = vmatprep.mubr.msk.bf16.mxu0 %vm3244_vm2, %v4574_v0  ;;  %2849 = vmatprep.mubr.msk.bf16.mxu1 %vm3244_vm2, %v4574_v0 }
  0x34   :  { %2746 = vmatmul.mubr.msk.bf16.gmra.mxu0 %vm202_vm3, %v3152_v17  ;;  %2850 = vmatmul.mubr.msk.bf16.gmra.mxu1 %vm202_vm3, %v3153_v18 }
  0x35   :  { %2749 = vmatprep.mubr.msk.bf16.mxu0 %vm3244_vm2, %v4574_v0  ;;  %2853 = vmatprep.mubr.msk.bf16.mxu1 %vm3244_vm2, %v4574_v0 }
  0x3c   :  { %2750 = vmatmul.mubr.msk.bf16.gmra.mxu0 %vm202_vm3, %v3154_v19  ;;  %2854 = vmatmul.mubr.msk.bf16.gmra.mxu1 %vm202_vm3, %v3155_v20 }
  0x3d   :  { %2753 = vmatprep.mubr.msk.bf16.mxu0 %vm3244_vm2, %v4574_v0  ;;  %2857 = vmatprep.mubr.msk.bf16.mxu1 %vm3244_vm2, %v4574_v0 }
  0x44   :  { %2754 = vmatmul.mubr.msk.bf16.gmra.mxu0 %vm202_vm3, %v3156_v21  ;;  %2858 = vmatmul.mubr.msk.bf16.gmra.mxu1 %vm202_vm3, %v3157_v22 }
  0x45   :  { %2757 = vmatprep.mubr.msk.bf16.mxu0 %vm3244_vm2, %v4574_v0  ;;  %2861 = vmatprep.mubr.msk.bf16.mxu1 %vm3244_vm2, %v4574_v0 }
  0x4c   :  { %2758 = vmatmul.mubr.msk.bf16.gmra.mxu0 %vm202_vm3, %v3158_v23  ;;  %2862 = vmatmul.mubr.msk.bf16.gmra.mxu1 %vm202_vm3, %v3159_v24 }
  0x4d   :  { %2761 = vmatprep.mubr.msk.bf16.mxu0 %vm3244_vm2, %v4574_v0  ;;  %2865 = vmatprep.mubr.msk.bf16.mxu1 %vm3244_vm2, %v4574_v0 }
  0x54   :  { %2762 = vmatmul.mubr.msk.bf16.gmra.mxu0 %vm202_vm3, %v3160_v25  ;;  %2866 = vmatmul.mubr.msk.bf16.gmra.mxu1 %vm202_vm3, %v3161_v26  ;;  %v3196_v25 = vld [vmem:[%s4571_s0 + $0x198] sm:$0xff]  }
  0x55   :  { %2765 = vmatprep.mubr.msk.bf16.mxu0 %vm3244_vm2, %v4574_v0  ;;  %2869 = vmatprep.mubr.msk.bf16.mxu1 %vm3244_vm2, %v4574_v0  ;;  %v3197_v26 = vld [vmem:[%s4571_s0 + $0x25c] sm:$0xff]  }
  0x5c   :  { %2766 = vmatmul.mubr.msk.bf16.gmra.mxu0 %vm202_vm3, %v3162_v27  ;;  %2870 = vmatmul.mubr.msk.bf16.gmra.mxu1 %vm202_vm3, %v3163_v28 }
  0x5d   :  { %2769 = vmatprep.mubr.msk.bf16.mxu0 %vm3244_vm2, %v4574_v0  ;;  %2873 = vmatprep.mubr.msk.bf16.mxu1 %vm3244_vm2, %v4574_v0 }
  0x64   :  { %2770 = vmatmul.mubr.msk.bf16.gmra.mxu0 %vm202_vm3, %v3164_v29  ;;  %2874 = vmatmul.mubr.msk.bf16.gmra.mxu1 %vm202_vm3, %v3165_v30 }
  0x65   :  { %2773 = vmatprep.mubr.msk.bf16.mxu0 %vm3244_vm2, %v4574_v0  ;;  %2877 = vmatprep.mubr.msk.bf16.mxu1 %vm3244_vm2, %v4574_v0 }
  0x6c   :  { %2774 = vmatmul.mubr.msk.bf16.gmra.mxu0 %vm202_vm3, %v3166_v31  ;;  %2878 = vmatmul.mubr.msk.bf16.gmra.mxu1 %vm202_vm3, %v3167_v32 }
  0x6d   :  { %2777 = vmatprep.mubr.msk.bf16.mxu0 %vm3244_vm2, %v4574_v0  ;;  %2881 = vmatprep.mubr.msk.bf16.mxu1 %vm3244_vm2, %v4574_v0 }
  0x74   :  { %2778 = vmatmul.mubr.msk.bf16.gmra.mxu0 %vm202_vm3, %v3168_v33  ;;  %2882 = vmatmul.mubr.msk.bf16.gmra.mxu1 %vm202_vm3, %v3169_v34 }
  0x75   :  { %2781 = vmatprep.mubr.msk.bf16.mxu0 %vm3244_vm2, %v4574_v0  ;;  %2885 = vmatprep.mubr.msk.bf16.mxu1 %vm3244_vm2, %v4574_v0 }
  0x7c   :  { %2782 = vmatmul.mubr.msk.bf16.gmra.mxu0 %vm202_vm3, %v3170_v35  ;;  %2886 = vmatmul.mubr.msk.bf16.gmra.mxu1 %vm202_vm3, %v3171_v36 }
  0x7d   :  { %2785 = vmatprep.mubr.msk.bf16.mxu0 %vm3244_vm2, %v4574_v0  ;;  %2889 = vmatprep.mubr.msk.bf16.mxu1 %vm3244_vm2, %v4574_v0 }
  0x84   :  { %2786 = vmatmul.mubr.msk.bf16.gmra.mxu0 %vm202_vm3, %v3172_v37  ;;  %2890 = vmatmul.mubr.msk.bf16.gmra.mxu1 %vm202_vm3, %v3173_v38  ;;  %v3198_v37 = vld [vmem:[%s4571_s0 + $0x1a0] sm:$0xff]  }
  0x85   :  { %2789 = vmatprep.mubr.msk.bf16.mxu0 %vm3244_vm2, %v4574_v0  ;;  %2893 = vmatprep.mubr.msk.bf16.mxu1 %vm3244_vm2, %v4574_v0  ;;  %v3199_v38 = vld [vmem:[%s4571_s0 + $0x264] sm:$0xff]  }
  0x8c   :  { %2790 = vmatmul.mubr.msk.bf16.gmra.mxu0 %vm202_vm3, %v3174_v39  ;;  %2894 = vmatmul.mubr.msk.bf16.gmra.mxu1 %vm202_vm3, %v3175_v40 }
  0x8d   :  { %2793 = vmatprep.mubr.msk.bf16.mxu0 %vm3244_vm2, %v4574_v0  ;;  %2897 = vmatprep.mubr.msk.bf16.mxu1 %vm3244_vm2, %v4574_v0 }
  0x94   :  { %2794 = vmatmul.mubr.msk.bf16.gmra.mxu0 %vm202_vm3, %v3176_v41  ;;  %2898 = vmatmul.mubr.msk.bf16.gmra.mxu1 %vm202_vm3, %v3177_v42 }
  0x95   :  { %2797 = vmatprep.mubr.msk.bf16.mxu0 %vm3244_vm2, %v4574_v0  ;;  %2901 = vmatprep.mubr.msk.bf16.mxu1 %vm3244_vm2, %v4574_v0 }
  0x9c   :  { %2798 = vmatmul.mubr.msk.bf16.gmra.mxu0 %vm202_vm3, %v3178_v43  ;;  %2902 = vmatmul.mubr.msk.bf16.gmra.mxu1 %vm202_vm3, %v3179_v44 }
  0x9d   :  { %2801 = vmatprep.mubr.msk.bf16.mxu0 %vm3244_vm2, %v4574_v0  ;;  %2905 = vmatprep.mubr.msk.bf16.mxu1 %vm3244_vm2, %v4574_v0 }
  0xa4   :  { %2802 = vmatmul.mubr.msk.bf16.gmra.mxu0 %vm202_vm3, %v3180_v45  ;;  %2906 = vmatmul.mubr.msk.bf16.gmra.mxu1 %vm202_vm3, %v3181_v46 }
  0xa5   :  { %2805 = vmatprep.mubr.msk.bf16.mxu0 %vm3244_vm2, %v4574_v0  ;;  %2909 = vmatprep.mubr.msk.bf16.mxu1 %vm3244_vm2, %v4574_v0 }
  0xac   :  { %2806 = vmatmul.mubr.msk.bf16.gmra.mxu0 %vm202_vm3, %v3182_v47  ;;  %2910 = vmatmul.mubr.msk.bf16.gmra.mxu1 %vm202_vm3, %v3183_v48 }
  0xad   :  { %2809 = vmatprep.mubr.msk.bf16.mxu0 %vm3244_vm2, %v4574_v0  ;;  %2913 = vmatprep.mubr.msk.bf16.mxu1 %vm3244_vm2, %v4574_v0 }
  0xb4   :  { %2810 = vmatmul.mubr.msk.bf16.gmra.mxu0 %vm202_vm3, %v3184_v49  ;;  %2914 = vmatmul.mubr.msk.bf16.gmra.mxu1 %vm202_vm3, %v3185_v50  ;;  %v3200_v49 = vld [vmem:[%s4571_s0 + $0x1a8] sm:$0xff]  }
  0xb5   :  { %2813 = vmatprep.mubr.msk.bf16.mxu0 %vm3244_vm2, %v4574_v0  ;;  %2917 = vmatprep.mubr.msk.bf16.mxu1 %vm3244_vm2, %v4574_v0  ;;  %v3201_v50 = vld [vmem:[%s4571_s0 + $0x26c] sm:$0xff]  }
  0xbc   :  { %2814 = vmatmul.mubr.msk.bf16.gmra.mxu0 %vm202_vm3, %v3186_v51  ;;  %2918 = vmatmul.mubr.msk.bf16.gmra.mxu1 %vm202_vm3, %v3187_v52 }
  0xbd   :  { %2817 = vmatprep.mubr.msk.bf16.mxu0 %vm3244_vm2, %v4574_v0  ;;  %2921 = vmatprep.mubr.msk.bf16.mxu1 %vm3244_vm2, %v4574_v0 }
  0xc4   :  { %2818 = vmatmul.mubr.msk.bf16.gmra.mxu0 %vm202_vm3, %v3188_v53  ;;  %2922 = vmatmul.mubr.msk.bf16.gmra.mxu1 %vm202_vm3, %v3189_v54 }
  0xc5   :  { %2821 = vmatprep.mubr.msk.bf16.mxu0 %vm3244_vm2, %v4574_v0  ;;  %2925 = vmatprep.mubr.msk.bf16.mxu1 %vm3244_vm2, %v4574_v0 }
  0xcc   :  { %v3577_v57 = vpop.f32.mrf.mxu0  ;;  %2822 = vmatmul.mubr.msk.bf16.gmra.mxu0 %vm202_vm3, %v3190_v55  ;;  %v3580_v58 = vpop.f32.mrf.mxu1  ;;  %2926 = vmatmul.mubr.msk.bf16.gmra.mxu1 %vm202_vm3, %v3191_v56 }
  0xcd   :  { %2933 = vmatprep.mubr.msk.bf16.mxu0 %vm3244_vm2, %v4574_v0  ;;  %3037 = vmatprep.mubr.msk.bf16.mxu1 %vm3244_vm2, %v4574_v0 }
  0xce   :  { %v2727_v60 = vpop.f32.mrf.mxu0  ;;  %v2831_v61 = vpop.f32.mrf.mxu1 }
  0xd0   :  { %v3589_v62 = vpop.f32.mrf.mxu0  ;;  %v3591_v63 = vpop.f32.mrf.mxu1 }
  0xd2   :  { %v2728_v4 = vpop.f32.mrf.mxu0  ;;  %v2832_v5 = vpop.f32.mrf.mxu1 }
  0xd3   :  { %v3202_v4 = vld [vmem:[%s4571_s0 + $0x1b0] sm:$0xff]  }
  0xd4   :  { %v3601_v6 = vpop.f32.mrf.mxu0  ;;  %v3603_v7 = vpop.f32.mrf.mxu1  ;;  %2934 = vmatmul.mubr.msk.bf16.vlgmr.msra.gmra.mxu0 %vm202_vm3, %v3192_v1  ;;  %3038 = vmatmul.mubr.msk.bf16.vlgmr.msra.gmra.mxu1 %vm202_vm3, %v3193_v2  ;;  %v3203_v5 = vld [vmem:[%s4571_s0 + $0x274] sm:$0xff]  }
  0xd5   :  { %2937 = vmatprep.mubr.msk.bf16.mxu0 %vm3244_vm2, %v4574_v0  ;;  %3041 = vmatprep.mubr.msk.bf16.mxu1 %vm3244_vm2, %v4574_v0 }
  0xd6   :  { %v2731_v9 = vpop.f32.mrf.mxu0  ;;  %v2835_v10 = vpop.f32.mrf.mxu1 }
  0xd8   :  { %v3613_v11 = vpop.f32.mrf.mxu0  ;;  %v3615_v12 = vpop.f32.mrf.mxu1 }
  0xda   :  { %v2732_v16 = vpop.f32.mrf.mxu0  ;;  %v2836_v17 = vpop.f32.mrf.mxu1 }
  0xdc   :  { %v3625_v18 = vpop.f32.mrf.mxu0  ;;  %v3627_v19 = vpop.f32.mrf.mxu1  ;;  %2938 = vmatmul.mubr.msk.bf16.gmra.mxu0 %vm202_vm3, %v3194_v13  ;;  %3042 = vmatmul.mubr.msk.bf16.gmra.mxu1 %vm202_vm3, %v3195_v14 }
  0xdd   :  { %2941 = vmatprep.mubr.msk.bf16.mxu0 %vm3244_vm2, %v4574_v0  ;;  %3045 = vmatprep.mubr.msk.bf16.mxu1 %vm3244_vm2, %v4574_v0 }
  0xde   :  { %v2735_v21 = vpop.f32.mrf.mxu0  ;;  %v2839_v22 = vpop.f32.mrf.mxu1 }
  0xe0   :  { %v3637_v23 = vpop.f32.mrf.mxu0  ;;  %v3639_v24 = vpop.f32.mrf.mxu1 }
  0xe2   :  { %v2736_v28 = vpop.f32.mrf.mxu0  ;;  %v2840_v29 = vpop.f32.mrf.mxu1 }
  0xe3   :  { %v3204_v28 = vld [vmem:[%s4571_s0 + $0x1b8] sm:$0xff]  }
  0xe4   :  { %v3649_v30 = vpop.f32.mrf.mxu0  ;;  %v3651_v31 = vpop.f32.mrf.mxu1  ;;  %2942 = vmatmul.mubr.msk.bf16.gmra.mxu0 %vm202_vm3, %v3196_v25  ;;  %3046 = vmatmul.mubr.msk.bf16.gmra.mxu1 %vm202_vm3, %v3197_v26  ;;  %v3205_v29 = vld [vmem:[%s4571_s0 + $0x27c] sm:$0xff]  }
  0xe5   :  { %2945 = vmatprep.mubr.msk.bf16.mxu0 %vm3244_vm2, %v4574_v0  ;;  %3049 = vmatprep.mubr.msk.bf16.mxu1 %vm3244_vm2, %v4574_v0 }
  0xe6   :  { %v2739_v33 = vpop.f32.mrf.mxu0  ;;  %v2843_v34 = vpop.f32.mrf.mxu1 }
  0xe8   :  { %v3661_v35 = vpop.f32.mrf.mxu0  ;;  %v3663_v36 = vpop.f32.mrf.mxu1 }
  0xea   :  { %v2740_v40 = vpop.f32.mrf.mxu0  ;;  %v2844_v41 = vpop.f32.mrf.mxu1 }
  0xec   :  { %v3673_v42 = vpop.f32.mrf.mxu0  ;;  %v3675_v43 = vpop.f32.mrf.mxu1  ;;  %2946 = vmatmul.mubr.msk.bf16.gmra.mxu0 %vm202_vm3, %v3198_v37  ;;  %3050 = vmatmul.mubr.msk.bf16.gmra.mxu1 %vm202_vm3, %v3199_v38 }
  0xed   :  { %2949 = vmatprep.mubr.msk.bf16.mxu0 %vm3244_vm2, %v4574_v0  ;;  %3053 = vmatprep.mubr.msk.bf16.mxu1 %vm3244_vm2, %v4574_v0 }
  0xee   :  { %v2743_v45 = vpop.f32.mrf.mxu0  ;;  %v2847_v46 = vpop.f32.mrf.mxu1 }
  0xf0   :  { %v3685_v47 = vpop.f32.mrf.mxu0  ;;  %v3687_v48 = vpop.f32.mrf.mxu1 }
  0xf2   :  { %v2744_v52 = vpop.f32.mrf.mxu0  ;;  %v2848_v53 = vpop.f32.mrf.mxu1 }
  0xf3   :  { %v3206_v52 = vld [vmem:[%s4571_s0 + $0x1c0] sm:$0xff]  }
  0xf4   :  { %v3697_v54 = vpop.f32.mrf.mxu0  ;;  %v3699_v55 = vpop.f32.mrf.mxu1  ;;  %2950 = vmatmul.mubr.msk.bf16.gmra.mxu0 %vm202_vm3, %v3200_v49  ;;  %3054 = vmatmul.mubr.msk.bf16.gmra.mxu1 %vm202_vm3, %v3201_v50  ;;  %v3207_v53 = vld [vmem:[%s4571_s0 + $0x284] sm:$0xff]  }
  0xf5   :  { %2953 = vmatprep.mubr.msk.bf16.mxu0 %vm3244_vm2, %v4574_v0  ;;  %3057 = vmatprep.mubr.msk.bf16.mxu1 %vm3244_vm2, %v4574_v0 }
  0xf6   :  { %v2747_v60 = vpop.f32.mrf.mxu0  ;;  %v2851_v61 = vpop.f32.mrf.mxu1 }
  0xf8   :  { %v3709_v1 = vpop.f32.mrf.mxu0  ;;  %v3711_v2 = vpop.f32.mrf.mxu1 }
  0xfa   :  { %v2748_v10 = vpop.f32.mrf.mxu0  ;;  %v2852_v13 = vpop.f32.mrf.mxu1 }
  0xfc   :  { %v3721_v14 = vpop.f32.mrf.mxu0  ;;  %v3723_v16 = vpop.f32.mrf.mxu1  ;;  %2954 = vmatmul.mubr.msk.bf16.gmra.mxu0 %vm202_vm3, %v3202_v4  ;;  %3058 = vmatmul.mubr.msk.bf16.gmra.mxu1 %vm202_vm3, %v3203_v5 }
  0xfd   :  { %2957 = vmatprep.mubr.msk.bf16.mxu0 %vm3244_vm2, %v4574_v0  ;;  %3061 = vmatprep.mubr.msk.bf16.mxu1 %vm3244_vm2, %v4574_v0 }
  0xfe   :  { %v2751_v21 = vpop.f32.mrf.mxu0  ;;  %v2855_v22 = vpop.f32.mrf.mxu1 }
 0x100   :  { %v3733_v25 = vpop.f32.mrf.mxu0  ;;  %v3735_v26 = vpop.f32.mrf.mxu1 }
 0x102   :  { %v2752_v34 = vpop.f32.mrf.mxu0  ;;  %v2856_v37 = vpop.f32.mrf.mxu1 }
 0x103   :  { %v3208_v34 = vld [vmem:[%s4571_s0 + $0x1c8] sm:$0xff]  }
 0x104   :  { %v3745_v38 = vpop.f32.mrf.mxu0  ;;  %v3747_v40 = vpop.f32.mrf.mxu1  ;;  %2958 = vmatmul.mubr.msk.bf16.gmra.mxu0 %vm202_vm3, %v3204_v28  ;;  %3062 = vmatmul.mubr.msk.bf16.gmra.mxu1 %vm202_vm3, %v3205_v29  ;;  %v3209_v37 = vld [vmem:[%s4571_s0 + $0x28c] sm:$0xff]  }
 0x105   :  { %2961 = vmatprep.mubr.msk.bf16.mxu0 %vm3244_vm2, %v4574_v0  ;;  %3065 = vmatprep.mubr.msk.bf16.mxu1 %vm3244_vm2, %v4574_v0 }
 0x106   :  { %v2755_v45 = vpop.f32.mrf.mxu0  ;;  %v2859_v46 = vpop.f32.mrf.mxu1 }
 0x108   :  { %v3757_v49 = vpop.f32.mrf.mxu0  ;;  %v3759_v50 = vpop.f32.mrf.mxu1 }
 0x10a   :  { %v2756_v61 = vpop.f32.mrf.mxu0  ;;  %v2860_v4 = vpop.f32.mrf.mxu1 }
 0x10c   :  { %v3769_v5 = vpop.f32.mrf.mxu0  ;;  %v3771_v10 = vpop.f32.mrf.mxu1  ;;  %2962 = vmatmul.mubr.msk.bf16.gmra.mxu0 %vm202_vm3, %v3206_v52  ;;  %3066 = vmatmul.mubr.msk.bf16.gmra.mxu1 %vm202_vm3, %v3207_v53 }
 0x10d   :  { %2965 = vmatprep.mubr.msk.bf16.mxu0 %vm3244_vm2, %v4574_v0  ;;  %3069 = vmatprep.mubr.msk.bf16.mxu1 %vm3244_vm2, %v4574_v0 }
 0x10e   :  { %v2759_v21 = vpop.f32.mrf.mxu0  ;;  %v2863_v22 = vpop.f32.mrf.mxu1 }
 0x110   :  { %v3781_v28 = vpop.f32.mrf.mxu0  ;;  %v3783_v29 = vpop.f32.mrf.mxu1 }
 0x112   :  { %v2760_v46 = vpop.f32.mrf.mxu0  ;;  %v2864_v52 = vpop.f32.mrf.mxu1 }
 0x114   :  { %v3793_v53 = vpop.f32.mrf.mxu0  ;;  %v3795_v61 = vpop.f32.mrf.mxu1  ;;  %2966 = vmatmul.mubr.msk.bf16.gmra.mxu0 %vm202_vm3, %v3208_v34  ;;  %3070 = vmatmul.mubr.msk.bf16.gmra.mxu1 %vm202_vm3, %v3209_v37  ;;  %v3210_v34 = vld [vmem:[%s4571_s0 + $0x1d0] sm:$0xff]  }
 0x115   :  { %2969 = vmatprep.mubr.msk.bf16.mxu0 %vm3244_vm2, %v4574_v0  ;;  %3073 = vmatprep.mubr.msk.bf16.mxu1 %vm3244_vm2, %v4574_v0  ;;  %v3211_v37 = vld [vmem:[%s4571_s0 + $0x294] sm:$0xff]  }
 0x116   :  { %v2763_v21 = vpop.f32.mrf.mxu0  ;;  %v2867_v22 = vpop.f32.mrf.mxu1 }
 0x118   :  { %v3805_v46 = vpop.f32.mrf.mxu0  ;;  %v3807_v52 = vpop.f32.mrf.mxu1 }
 0x11a   :  { %v2764_v45 = vpop.f32.mrf.mxu0  ;;  %v2868_v13 = vpop.f32.mrf.mxu1 }
 0x11c   :  { %v3817_v60 = vpop.f32.mrf.mxu0  ;;  %v3819_v21 = vpop.f32.mrf.mxu1  ;;  %2970 = vmatmul.mubr.msk.bf16.gmra.mxu0 %vm202_vm3, %v3210_v34  ;;  %3074 = vmatmul.mubr.msk.bf16.gmra.mxu1 %vm202_vm3, %v3211_v37  ;;  %v3212_v34 = vld [vmem:[%s4571_s0 + $0x1d8] sm:$0xff]  }
 0x11d   :  { %2973 = vmatprep.mubr.msk.bf16.mxu0 %vm3244_vm2, %v4574_v0  ;;  %3077 = vmatprep.mubr.msk.bf16.mxu1 %vm3244_vm2, %v4574_v0  ;;  %v3213_v37 = vld [vmem:[%s4571_s0 + $0x29c] sm:$0xff]  }
 0x11e   :  { %v2767_v4 = vpop.f32.mrf.mxu0  ;;  %v2871_v45 = vpop.f32.mrf.mxu1 }
 0x120   :  { %v3829_v13 = vpop.f32.mrf.mxu0  ;;  %v3831_v41 = vpop.f32.mrf.mxu1 }
 0x122   :  { %v2768_v33 = vpop.f32.mrf.mxu0  ;;  %v2872_v17 = vpop.f32.mrf.mxu1 }
 0x124   :  { %v3841_v9 = vpop.f32.mrf.mxu0  ;;  %v3843_v4 = vpop.f32.mrf.mxu1  ;;  %2974 = vmatmul.mubr.msk.bf16.gmra.mxu0 %vm202_vm3, %v3212_v34  ;;  %3078 = vmatmul.mubr.msk.bf16.gmra.mxu1 %vm202_vm3, %v3213_v37  ;;  %v3214_v34 = vld [vmem:[%s4571_s0 + $0x1e0] sm:$0xff]  }
 0x125   :  { %2977 = vmatprep.mubr.msk.bf16.mxu0 %vm3244_vm2, %v4574_v0  ;;  %3081 = vmatprep.mubr.msk.bf16.mxu1 %vm3244_vm2, %v4574_v0  ;;  %v3215_v37 = vld [vmem:[%s4571_s0 + $0x2a4] sm:$0xff]  }
 0x126   :  { %v2771_v22 = vpop.f32.mrf.mxu0  ;;  %v2875_v33 = vpop.f32.mrf.mxu1 }
 0x128   :  { %v3853_v17 = vpop.f32.mrf.mxu0  ;;  %v3855_v56 = vpop.f32.mrf.mxu1 }
 0x12a   :  { %v2772_v51 = vpop.f32.mrf.mxu0  ;;  %v2876_v44 = vpop.f32.mrf.mxu1 }
 0x12c   :  { %v3865_v39 = vpop.f32.mrf.mxu0  ;;  %v3867_v22 = vpop.f32.mrf.mxu1  ;;  %2978 = vmatmul.mubr.msk.bf16.gmra.mxu0 %vm202_vm3, %v3214_v34  ;;  %3082 = vmatmul.mubr.msk.bf16.gmra.mxu1 %vm202_vm3, %v3215_v37  ;;  %v3216_v34 = vld [vmem:[%s4571_s0 + $0x1e8] sm:$0xff]  }
 0x12d   :  { %4625 = vst [vmem:[#allocation2_spill] sm:$0xff] %v3867_v22  ;;  %2981 = vmatprep.mubr.msk.bf16.mxu0 %vm3244_vm2, %v4574_v0  ;;  %3085 = vmatprep.mubr.msk.bf16.mxu1 %vm3244_vm2, %v4574_v0  ;;  %v3217_v37 = vld [vmem:[%s4571_s0 + $0x2ac] sm:$0xff]  }
 0x12e   :  { %v2775_v45 = vpop.f32.mrf.mxu0  ;;  %v2879_v51 = vpop.f32.mrf.mxu1 }
 0x130   :  { %v3877_v44 = vpop.f32.mrf.mxu0  ;;  %v3879_v32 = vpop.f32.mrf.mxu1 }
 0x131   :  { %4626 = vst [vmem:[#allocation3_spill] sm:$0xff] %v3877_v44  ;;  %4627 = vst [vmem:[#allocation4_spill] sm:$0xff] %v3879_v32 }
 0x132   :  { %v2776_v27 = vpop.f32.mrf.mxu0  ;;  %v2880_v20 = vpop.f32.mrf.mxu1 }
 0x134   :  { %v3889_v15 = vpop.f32.mrf.mxu0  ;;  %v3891_v45 = vpop.f32.mrf.mxu1  ;;  %2982 = vmatmul.mubr.msk.bf16.gmra.mxu0 %vm202_vm3, %v3216_v34  ;;  %3086 = vmatmul.mubr.msk.bf16.gmra.mxu1 %vm202_vm3, %v3217_v37  ;;  %v3218_v34 = vld [vmem:[%s4571_s0 + $0x1f0] sm:$0xff]  }
 0x135   :  { %4628 = vst [vmem:[#allocation5_spill] sm:$0xff] %v3889_v15  ;;  %4629 = vst [vmem:[#allocation6_spill] sm:$0xff] %v3891_v45  ;;  %2985 = vmatprep.mubr.msk.bf16.mxu0 %vm3244_vm2, %v4574_v0  ;;  %3089 = vmatprep.mubr.msk.bf16.mxu1 %vm3244_vm2, %v4574_v0  ;;  %v3219_v37 = vld [vmem:[%s4571_s0 + $0x2b4] sm:$0xff]   ;;  %v4634_v45 = vmov 0.0  }
 0x136   :  { %v2779_v33 = vpop.f32.mrf.mxu0  ;;  %v2883_v27 = vpop.f32.mrf.mxu1 }
 0x138   :  { %v3901_v20 = vpop.f32.mrf.mxu0  ;;  %v3903_v8 = vpop.f32.mrf.mxu1 }
 0x139   :  { %4630 = vst [vmem:[#allocation7_spill] sm:$0xff] %v3901_v20  ;;  %4631 = vst [vmem:[#allocation8_spill] sm:$0xff] %v3903_v8 }
 0x13a   :  { %v2780_v3 = vpop.f32.mrf.mxu0  ;;  %v2884_v59 = vpop.f32.mrf.mxu1 }
 0x13c   :  { %v3913_v0 = vpop.f32.mrf.mxu0  ;;  %v3915_v33 = vpop.f32.mrf.mxu1  ;;  %2986 = vmatmul.mubr.msk.bf16.gmra.mxu0 %vm202_vm3, %v3218_v34  ;;  %3090 = vmatmul.mubr.msk.bf16.gmra.mxu1 %vm202_vm3, %v3219_v37  ;;  %v3220_v34 = vld [vmem:[%s4571_s0 + $0x1f8] sm:$0xff]  }
 0x13d   :  { %4632 = vst [vmem:[#allocation9_spill] sm:$0xff] %v3913_v0  ;;  %4633 = vst [vmem:[#allocation10_spill] sm:$0xff] %v3915_v33  ;;  %2989 = vmatprep.mubr.msk.bf16.mxu0 %vm3244_vm2, %v4634_v45  ;;  %3093 = vmatprep.mubr.msk.bf16.mxu1 %vm3244_vm2, %v4634_v45  ;;  %v3221_v37 = vld [vmem:[%s4571_s0 + $0x2bc] sm:$0xff]  }
 0x13e   :  { %v2783_v51 = vpop.f32.mrf.mxu0  ;;  %v2887_v3 = vpop.f32.mrf.mxu1 }
 0x140   :  { %v3925_v59 = vpop.f32.mrf.mxu0  ;;  %v3927_v8 = vpop.f32.mrf.mxu1 }
 0x141   :  { %4635 = vst [vmem:[#allocation11_spill] sm:$0xff] %v3925_v59  ;;  %4636 = vst [vmem:[#allocation12_spill] sm:$0xff] %v3927_v8 }
 0x142   :  { %v2784_v33 = vpop.f32.mrf.mxu0  ;;  %v2888_v0 = vpop.f32.mrf.mxu1 }
 0x144   :  { %v3937_v20 = vpop.f32.mrf.mxu0  ;;  %v3939_v51 = vpop.f32.mrf.mxu1  ;;  %2990 = vmatmul.mubr.msk.bf16.gmra.mxu0 %vm202_vm3, %v3220_v34  ;;  %3094 = vmatmul.mubr.msk.bf16.gmra.mxu1 %vm202_vm3, %v3221_v37  ;;  %v3222_v34 = vld [vmem:[%s4571_s0 + $0x200] sm:$0xff]  }
 0x145   :  { %4637 = vst [vmem:[#allocation13_spill] sm:$0xff] %v3937_v20  ;;  %4638 = vst [vmem:[#allocation14_spill] sm:$0xff] %v3939_v51  ;;  %2993 = vmatprep.mubr.msk.bf16.mxu0 %vm3244_vm2, %v4634_v45  ;;  %3097 = vmatprep.mubr.msk.bf16.mxu1 %vm3244_vm2, %v4634_v45  ;;  %v3223_v37 = vld [vmem:[%s4571_s0 + $0x2c4] sm:$0xff]  }
 0x146   :  { %v2787_v27 = vpop.f32.mrf.mxu0  ;;  %v2891_v33 = vpop.f32.mrf.mxu1 }
 0x148   :  { %v3949_v0 = vpop.f32.mrf.mxu0  ;;  %v3951_v8 = vpop.f32.mrf.mxu1 }
 0x149   :  { %4639 = vst [vmem:[#allocation15_spill] sm:$0xff] %v3949_v0  ;;  %4640 = vst [vmem:[#allocation16_spill] sm:$0xff] %v3951_v8 }
 0x14a   :  { %v2788_v51 = vpop.f32.mrf.mxu0  ;;  %v2892_v20 = vpop.f32.mrf.mxu1 }
 0x14c   :  { %v3961_v59 = vpop.f32.mrf.mxu0  ;;  %v3963_v27 = vpop.f32.mrf.mxu1  ;;  %2994 = vmatmul.mubr.msk.bf16.gmra.mxu0 %vm202_vm3, %v3222_v34  ;;  %3098 = vmatmul.mubr.msk.bf16.gmra.mxu1 %vm202_vm3, %v3223_v37  ;;  %v3224_v34 = vld [vmem:[%s4571_s0 + $0x208] sm:$0xff]  }
 0x14d   :  { %4641 = vst [vmem:[#allocation17_spill] sm:$0xff] %v3961_v59  ;;  %4642 = vst [vmem:[#allocation18_spill] sm:$0xff] %v3963_v27  ;;  %2997 = vmatprep.mubr.msk.bf16.mxu0 %vm3244_vm2, %v4634_v45  ;;  %3101 = vmatprep.mubr.msk.bf16.mxu1 %vm3244_vm2, %v4634_v45  ;;  %v3225_v37 = vld [vmem:[%s4571_s0 + $0x2cc] sm:$0xff]  }
 0x14e   :  { %v2791_v3 = vpop.f32.mrf.mxu0  ;;  %v2895_v51 = vpop.f32.mrf.mxu1 }
 0x150   :  { %v3973_v20 = vpop.f32.mrf.mxu0  ;;  %v3975_v8 = vpop.f32.mrf.mxu1 }
 0x151   :  { %4643 = vst [vmem:[#allocation19_spill] sm:$0xff] %v3973_v20  ;;  %4644 = vst [vmem:[#allocation20_spill] sm:$0xff] %v3975_v8 }
 0x152   :  { %v2792_v27 = vpop.f32.mrf.mxu0  ;;  %v2896_v59 = vpop.f32.mrf.mxu1 }
 0x154   :  { %v3985_v0 = vpop.f32.mrf.mxu0  ;;  %v3987_v3 = vpop.f32.mrf.mxu1  ;;  %2998 = vmatmul.mubr.msk.bf16.gmra.mxu0 %vm202_vm3, %v3224_v34  ;;  %3102 = vmatmul.mubr.msk.bf16.gmra.mxu1 %vm202_vm3, %v3225_v37  ;;  %v3226_v34 = vld [vmem:[%s4571_s0 + $0x210] sm:$0xff]  }
 0x155   :  { %4645 = vst [vmem:[#allocation21_spill] sm:$0xff] %v3985_v0  ;;  %4646 = vst [vmem:[#allocation22_spill] sm:$0xff] %v3987_v3  ;;  %3001 = vmatprep.mubr.msk.bf16.mxu0 %vm3244_vm2, %v4634_v45  ;;  %3105 = vmatprep.mubr.msk.bf16.mxu1 %vm3244_vm2, %v4634_v45  ;;  %v3227_v37 = vld [vmem:[%s4571_s0 + $0x2d4] sm:$0xff]  }
 0x156   :  { %v2795_v33 = vpop.f32.mrf.mxu0  ;;  %v2899_v27 = vpop.f32.mrf.mxu1 }
 0x158   :  { %v3997_v59 = vpop.f32.mrf.mxu0  ;;  %v3999_v8 = vpop.f32.mrf.mxu1 }
 0x159   :  { %4647 = vst [vmem:[#allocation23_spill] sm:$0xff] %v3997_v59  ;;  %4648 = vst [vmem:[#allocation24_spill] sm:$0xff] %v3999_v8 }
 0x15a   :  { %v2796_v3 = vpop.f32.mrf.mxu0  ;;  %v2900_v0 = vpop.f32.mrf.mxu1 }
 0x15c   :  { %v4009_v20 = vpop.f32.mrf.mxu0  ;;  %v4011_v33 = vpop.f32.mrf.mxu1  ;;  %3002 = vmatmul.mubr.msk.bf16.gmra.mxu0 %vm202_vm3, %v3226_v34  ;;  %3106 = vmatmul.mubr.msk.bf16.gmra.mxu1 %vm202_vm3, %v3227_v37  ;;  %v3228_v34 = vld [vmem:[%s4571_s0 + $0x218] sm:$0xff]  }
 0x15d   :  { %4649 = vst [vmem:[#allocation25_spill] sm:$0xff] %v4009_v20  ;;  %4650 = vst [vmem:[#allocation26_spill] sm:$0xff] %v4011_v33  ;;  %3005 = vmatprep.mubr.msk.bf16.mxu0 %vm3244_vm2, %v4634_v45  ;;  %3109 = vmatprep.mubr.msk.bf16.mxu1 %vm3244_vm2, %v4634_v45  ;;  %v3229_v37 = vld [vmem:[%s4571_s0 + $0x2dc] sm:$0xff]  }
 0x15e   :  { %v2799_v51 = vpop.f32.mrf.mxu0  ;;  %v2903_v3 = vpop.f32.mrf.mxu1 }
 0x160   :  { %v4021_v0 = vpop.f32.mrf.mxu0  ;;  %v4023_v8 = vpop.f32.mrf.mxu1 }
 0x161   :  { %4651 = vst [vmem:[#allocation27_spill] sm:$0xff] %v4021_v0  ;;  %4652 = vst [vmem:[#allocation28_spill] sm:$0xff] %v4023_v8 }
 0x162   :  { %v2800_v33 = vpop.f32.mrf.mxu0  ;;  %v2904_v20 = vpop.f32.mrf.mxu1 }
 0x164   :  { %v4033_v59 = vpop.f32.mrf.mxu0  ;;  %v4035_v51 = vpop.f32.mrf.mxu1  ;;  %3006 = vmatmul.mubr.msk.bf16.gmra.mxu0 %vm202_vm3, %v3228_v34  ;;  %3110 = vmatmul.mubr.msk.bf16.gmra.mxu1 %vm202_vm3, %v3229_v37  ;;  %v3230_v34 = vld [vmem:[%s4571_s0 + $0x220] sm:$0xff]  }
 0x165   :  { %4653 = vst [vmem:[#allocation29_spill] sm:$0xff] %v4033_v59  ;;  %4654 = vst [vmem:[#allocation30_spill] sm:$0xff] %v4035_v51  ;;  %3009 = vmatprep.mubr.msk.bf16.mxu0 %vm3244_vm2, %v4634_v45  ;;  %3113 = vmatprep.mubr.msk.bf16.mxu1 %vm3244_vm2, %v4634_v45  ;;  %v3231_v37 = vld [vmem:[%s4571_s0 + $0x2e4] sm:$0xff]  }
 0x166   :  { %v2803_v27 = vpop.f32.mrf.mxu0  ;;  %v2907_v33 = vpop.f32.mrf.mxu1 }
 0x168   :  { %v4045_v20 = vpop.f32.mrf.mxu0  ;;  %v4047_v8 = vpop.f32.mrf.mxu1 }
 0x169   :  { %4655 = vst [vmem:[#allocation31_spill] sm:$0xff] %v4045_v20  ;;  %4656 = vst [vmem:[#allocation32_spill] sm:$0xff] %v4047_v8 }
 0x16a   :  { %v2804_v51 = vpop.f32.mrf.mxu0  ;;  %v2908_v59 = vpop.f32.mrf.mxu1 }
 0x16c   :  { %v4057_v0 = vpop.f32.mrf.mxu0  ;;  %v4059_v27 = vpop.f32.mrf.mxu1  ;;  %3010 = vmatmul.mubr.msk.bf16.gmra.mxu0 %vm202_vm3, %v3230_v34  ;;  %3114 = vmatmul.mubr.msk.bf16.gmra.mxu1 %vm202_vm3, %v3231_v37  ;;  %v3232_v34 = vld [vmem:[%s4571_s0 + $0x228] sm:$0xff]  }
 0x16d   :  { %4657 = vst [vmem:[#allocation33_spill] sm:$0xff] %v4057_v0  ;;  %4658 = vst [vmem:[#allocation34_spill] sm:$0xff] %v4059_v27  ;;  %3013 = vmatprep.mubr.msk.bf16.mxu0 %vm3244_vm2, %v4634_v45  ;;  %3117 = vmatprep.mubr.msk.bf16.mxu1 %vm3244_vm2, %v4634_v45  ;;  %v3233_v37 = vld [vmem:[%s4571_s0 + $0x2ec] sm:$0xff]  }
 0x16e   :  { %v2807_v3 = vpop.f32.mrf.mxu0  ;;  %v2911_v51 = vpop.f32.mrf.mxu1 }
 0x170   :  { %v4069_v59 = vpop.f32.mrf.mxu0  ;;  %v4071_v8 = vpop.f32.mrf.mxu1 }
 0x171   :  { %4659 = vst [vmem:[#allocation35_spill] sm:$0xff] %v4069_v59  ;;  %4660 = vst [vmem:[#allocation36_spill] sm:$0xff] %v4071_v8 }
 0x172   :  { %v2808_v27 = vpop.f32.mrf.mxu0  ;;  %v2912_v0 = vpop.f32.mrf.mxu1 }
 0x174   :  { %v4081_v20 = vpop.f32.mrf.mxu0  ;;  %v4083_v3 = vpop.f32.mrf.mxu1  ;;  %3014 = vmatmul.mubr.msk.bf16.gmra.mxu0 %vm202_vm3, %v3232_v34  ;;  %3118 = vmatmul.mubr.msk.bf16.gmra.mxu1 %vm202_vm3, %v3233_v37  ;;  %v3234_v34 = vld [vmem:[%s4571_s0 + $0x230] sm:$0xff]  }
 0x175   :  { %4661 = vst [vmem:[#allocation37_spill] sm:$0xff] %v4081_v20  ;;  %4662 = vst [vmem:[#allocation38_spill] sm:$0xff] %v4083_v3  ;;  %3017 = vmatprep.mubr.msk.bf16.mxu0 %vm3244_vm2, %v4634_v45  ;;  %3121 = vmatprep.mubr.msk.bf16.mxu1 %vm3244_vm2, %v4634_v45  ;;  %v3235_v37 = vld [vmem:[%s4571_s0 + $0x2f4] sm:$0xff]  }
 0x176   :  { %v2811_v33 = vpop.f32.mrf.mxu0  ;;  %v2915_v27 = vpop.f32.mrf.mxu1 }
 0x178   :  { %v4093_v0 = vpop.f32.mrf.mxu0  ;;  %v4095_v8 = vpop.f32.mrf.mxu1 }
 0x179   :  { %4663 = vst [vmem:[#allocation39_spill] sm:$0xff] %v4093_v0  ;;  %4664 = vst [vmem:[#allocation40_spill] sm:$0xff] %v4095_v8 }
 0x17a   :  { %v2812_v3 = vpop.f32.mrf.mxu0  ;;  %v2916_v20 = vpop.f32.mrf.mxu1 }
 0x17c   :  { %v4105_v59 = vpop.f32.mrf.mxu0  ;;  %v4107_v33 = vpop.f32.mrf.mxu1  ;;  %3018 = vmatmul.mubr.msk.bf16.gmra.mxu0 %vm202_vm3, %v3234_v34  ;;  %3122 = vmatmul.mubr.msk.bf16.gmra.mxu1 %vm202_vm3, %v3235_v37  ;;  %v3236_v34 = vld [vmem:[%s4571_s0 + $0x238] sm:$0xff]  }
 0x17d   :  { %4665 = vst [vmem:[#allocation41_spill] sm:$0xff] %v4105_v59  ;;  %4666 = vst [vmem:[#allocation42_spill] sm:$0xff] %v4107_v33  ;;  %3021 = vmatprep.mubr.msk.bf16.mxu0 %vm3244_vm2, %v4634_v45  ;;  %3125 = vmatprep.mubr.msk.bf16.mxu1 %vm3244_vm2, %v4634_v45  ;;  %v3237_v37 = vld [vmem:[%s4571_s0 + $0x2fc] sm:$0xff]  }
 0x17e   :  { %v2815_v51 = vpop.f32.mrf.mxu0  ;;  %v2919_v3 = vpop.f32.mrf.mxu1 }
 0x180   :  { %v4117_v20 = vpop.f32.mrf.mxu0  ;;  %v4119_v8 = vpop.f32.mrf.mxu1 }
 0x181   :  { %4667 = vst [vmem:[#allocation43_spill] sm:$0xff] %v4117_v20  ;;  %4668 = vst [vmem:[#allocation44_spill] sm:$0xff] %v4119_v8 }
 0x182   :  { %v2816_v33 = vpop.f32.mrf.mxu0  ;;  %v2920_v59 = vpop.f32.mrf.mxu1 }
 0x184   :  { %v4129_v0 = vpop.f32.mrf.mxu0  ;;  %v4131_v51 = vpop.f32.mrf.mxu1  ;;  %3022 = vmatmul.mubr.msk.bf16.gmra.mxu0 %vm202_vm3, %v3236_v34  ;;  %3126 = vmatmul.mubr.msk.bf16.gmra.mxu1 %vm202_vm3, %v3237_v37  ;;  %v3238_v34 = vld [vmem:[%s4571_s0 + $0x240] sm:$0xff]  }
 0x185   :  { %4669 = vst [vmem:[#allocation45_spill] sm:$0xff] %v4129_v0  ;;  %4670 = vst [vmem:[#allocation46_spill] sm:$0xff] %v4131_v51  ;;  %3025 = vmatprep.mubr.msk.bf16.mxu0 %vm3244_vm2, %v4634_v45  ;;  %3129 = vmatprep.mubr.msk.bf16.mxu1 %vm3244_vm2, %v4634_v45  ;;  %v3239_v37 = vld [vmem:[%s4571_s0 + $0x304] sm:$0xff]  }
 0x186   :  { %v2819_v27 = vpop.f32.mrf.mxu0  ;;  %v2923_v33 = vpop.f32.mrf.mxu1 }
 0x188   :  { %v4141_v59 = vpop.f32.mrf.mxu0  ;;  %v4143_v8 = vpop.f32.mrf.mxu1 }
 0x189   :  { %4671 = vst [vmem:[#allocation47_spill] sm:$0xff] %v4141_v59  ;;  %4672 = vst [vmem:[#allocation48_spill] sm:$0xff] %v4143_v8  ;;  %v3240_v59 = vld [vmem:[%s4571_s0 + $0x248] ss:$0 sps:$4 sm:$0xff]  }
 0x18a   :  { %v2820_v51 = vpop.f32.mrf.mxu0  ;;  %v2924_v0 = vpop.f32.mrf.mxu1 }
 0x18c   :  { %v4153_v20 = vpop.f32.mrf.mxu0  ;;  %v4155_v27 = vpop.f32.mrf.mxu1  ;;  %3026 = vmatmul.mubr.msk.bf16.gmra.mxu0 %vm202_vm3, %v3238_v34  ;;  %3130 = vmatmul.mubr.msk.bf16.gmra.mxu1 %vm202_vm3, %v3239_v37  ;;  %v3241_v34 = vld [vmem:[%s4571_s0 + $0x30c] ss:$0 sps:$4 sm:$0xff]  }
 0x18d   :  { %4673 = vst [vmem:[#allocation49_spill] sm:$0xff] %v4153_v20  ;;  %4674 = vst [vmem:[#allocation50_spill] sm:$0xff] %v4155_v27  ;;  %3029 = vmatprep.mubr.msk.bf16.mxu0 %vm3244_vm2, %v4634_v45  ;;  %3133 = vmatprep.mubr.msk.bf16.mxu1 %vm3244_vm2, %v4634_v45  ;;  %v4675_v45 = vmax.f32 %v3577_v57, %v3580_v58 }
 0x18e   :  { %v2823_v3 = vpop.f32.mrf.mxu0  ;;  %v2927_v51 = vpop.f32.mrf.mxu1 }
 0x18f   :  { %v4179_v3 = vld [vmem:[%s4572_s2] ss:$0 sm:$0xff] }
 0x190   :  { %v514_v0 = vpop.f32.mrf.mxu0  ;;  %v994_v8 = vpop.f32.mrf.mxu1 }
 0x192   :  { %v2824_v37 = vpop.f32.mrf.mxu0  ;;  %v2928_v33 = vpop.f32.mrf.mxu1 }
 0x194   :  { %v1328_v27 = vpop.f32.mrf.mxu0  ;;  %3030 = vmatmul.mubr.msk.bf16.gmra.mxu0 %vm202_vm3, %v3240_v59  ;;  %v1857_v20 = vpop.f32.mrf.mxu1  ;;  %3134 = vmatmul.mubr.msk.bf16.gmra.mxu1 %vm202_vm3, %v3241_v34  ;;  %v4676_v59 = vmax.f32 %v3589_v62, %v3591_v63 }
 0x195   :  { %v1526_v8 = vmax.f32 %v4675_v45, %v1328_v27 }
 0x196   :  { %v2935_v51 = vpop.f32.mrf.mxu0  ;;  %v3039_v0 = vpop.f32.mrf.mxu1 }
 0x197   :  { %v2055_v15 = vmax.f32 %v1526_v8, %v1857_v20 }
 0x198   :  { %v1331_v37 = vpop.f32.mrf.mxu0  ;;  %v1860_v33 = vpop.f32.mrf.mxu1 }
 0x199   :  { %v2111_v32 = vadd.f32 %v4179_v3, %v2055_v15  ;;  %v1527_v34 = vmax.f32 %v4676_v59, %v1331_v37  ;;  %v4677_v15 = vmax.f32 %v3601_v6, %v3603_v7 }
 0x19a   :  { %v2936_v44 = vpop.f32.mrf.mxu0  ;;  %v3040_v57 = vpop.f32.mrf.mxu1 }
 0x19b   :  { %v2160_v58 = vmax.f32 %v2111_v32, 0.0  ;;  %v2056_v27 = vmax.f32 %v1527_v34, %v1860_v33  ;;  %v4678_v33 = vmax.f32 %v3613_v11, %v3615_v12 }
 0x19c   :  { %v1336_v45 = vpop.f32.mrf.mxu0  ;;  %v1865_v22 = vpop.f32.mrf.mxu1 }
 0x19d   :  { %2210 = vst.msk [vmem:[%s4573_s3] sm:$0xff] %vm2209_vm4, %v2160_v58  ;;  %v2112_v20 = vadd.f32 %v4179_v3, %v2056_v27  ;;  %v1528_v8 = vmax.f32 %v4677_v15, %v1336_v45  ;;  %v4679_v45 = vmax.f32 %v3625_v18, %v3627_v19 }
 0x19e   :  { %v2939_v62 = vpop.f32.mrf.mxu0  ;;  %v3043_v63 = vpop.f32.mrf.mxu1 }
 0x19f   :  { %v2161_v51 = vmax.f32 %v2112_v20, 0.0  ;;  %v2057_v44 = vmax.f32 %v1528_v8, %v1865_v22 }
 0x1a0   :  { %v1339_v0 = vpop.f32.mrf.mxu0  ;;  %v1868_v32 = vpop.f32.mrf.mxu1 }
 0x1a1   :  { %2211 = vst.msk [vmem:[%s4573_s3 + $0x8] sm:$0xff] %vm2209_vm4, %v2161_v51  ;;  %v2113_v37 = vadd.f32 %v4179_v3, %v2057_v44  ;;  %v1529_v59 = vmax.f32 %v4678_v33, %v1339_v0  ;;  %v4680_v44 = vmax.f32 %v3637_v23, %v3639_v24 }
 0x1a2   :  { %v2940_v34 = vpop.f32.mrf.mxu0  ;;  %v3044_v6 = vpop.f32.mrf.mxu1 }
 0x1a3   :  { %v2162_v7 = vmax.f32 %v2113_v37, 0.0  ;;  %v2058_v57 = vmax.f32 %v1529_v59, %v1868_v32  ;;  %v4681_v6 = vmax.f32 %v3649_v30, %v3651_v31 }
 0x1a4   :  { %v1344_v58 = vpop.f32.mrf.mxu0  ;;  %v1873_v27 = vpop.f32.mrf.mxu1 }
 0x1a5   :  { %2212 = vst.msk [vmem:[%s4573_s3 + $0x10] sm:$0xff] %vm2209_vm4, %v2162_v7  ;;  %v2114_v22 = vadd.f32 %v4179_v3, %v2058_v57  ;;  %v1530_v20 = vmax.f32 %v4679_v45, %v1344_v58 }
 0x1a6   :  { %v2943_v15 = vpop.f32.mrf.mxu0  ;;  %v3047_v11 = vpop.f32.mrf.mxu1 }
 0x1a7   :  { %v2163_v12 = vmax.f32 %v2114_v22, 0.0  ;;  %v2059_v8 = vmax.f32 %v1530_v20, %v1873_v27  ;;  %v4682_v20 = vmax.f32 %v3661_v35, %v3663_v36 }
 0x1a8   :  { %v1347_v62 = vpop.f32.mrf.mxu0  ;;  %v1876_v63 = vpop.f32.mrf.mxu1 }
 0x1a9   :  { %2213 = vst.msk [vmem:[%s4573_s3 + $0x18] sm:$0xff] %vm2209_vm4, %v2163_v12  ;;  %v2115_v51 = vadd.f32 %v4179_v3, %v2059_v8  ;;  %v1531_v0 = vmax.f32 %v4680_v44, %v1347_v62 }
 0x1aa   :  { %v2944_v32 = vpop.f32.mrf.mxu0  ;;  %v3048_v18 = vpop.f32.mrf.mxu1 }
 0x1ab   :  { %v2164_v19 = vmax.f32 %v2115_v51, 0.0  ;;  %v2060_v37 = vmax.f32 %v1531_v0, %v1876_v63  ;;  %v4683_v51 = vmax.f32 %v3673_v42, %v3675_v43 }
 0x1ac   :  { %v1352_v33 = vpop.f32.mrf.mxu0  ;;  %v1881_v59 = vpop.f32.mrf.mxu1 }
 0x1ad   :  { %2214 = vst.msk [vmem:[%s4573_s3 + $0x20] sm:$0xff] %vm2209_vm4, %v2164_v19  ;;  %v2116_v34 = vadd.f32 %v4179_v3, %v2060_v37  ;;  %v1532_v7 = vmax.f32 %v4681_v6, %v1352_v33  ;;  %v4684_v33 = vmax.f32 %v3685_v47, %v3687_v48 }
 0x1ae   :  { %v2947_v57 = vpop.f32.mrf.mxu0  ;;  %v3051_v23 = vpop.f32.mrf.mxu1 }
 0x1af   :  { %v2165_v24 = vmax.f32 %v2116_v34, 0.0  ;;  %v2061_v58 = vmax.f32 %v1532_v7, %v1881_v59 }
 0x1b0   :  { %v1355_v27 = vpop.f32.mrf.mxu0  ;;  %v1884_v22 = vpop.f32.mrf.mxu1 }
 0x1b1   :  { %2215 = vst.msk [vmem:[%s4573_s3 + $0x28] sm:$0xff] %vm2209_vm4, %v2165_v24  ;;  %v2117_v45 = vadd.f32 %v4179_v3, %v2061_v58  ;;  %v1533_v15 = vmax.f32 %v4682_v20, %v1355_v27  ;;  %v4685_v24 = vmax.f32 %v3697_v54, %v3699_v55 }
 0x1b2   :  { %v2948_v11 = vpop.f32.mrf.mxu0  ;;  %v3052_v30 = vpop.f32.mrf.mxu1 }
 0x1b3   :  { %v2166_v31 = vmax.f32 %v2117_v45, 0.0  ;;  %v2062_v12 = vmax.f32 %v1533_v15, %v1884_v22  ;;  %v4686_v11 = vmax.f32 %v3709_v1, %v3711_v2 }
 0x1b4   :  { %v1360_v8 = vpop.f32.mrf.mxu0  ;;  %v1889_v62 = vpop.f32.mrf.mxu1 }
 0x1b5   :  { %2216 = vst.msk [vmem:[%s4573_s3 + $0x30] sm:$0xff] %vm2209_vm4, %v2166_v31  ;;  %v2118_v63 = vadd.f32 %v4179_v3, %v2062_v12  ;;  %v1534_v44 = vmax.f32 %v4683_v51, %v1360_v8  ;;  %v4687_v51 = vmax.f32 %v3721_v14, %v3723_v16 }
 0x1b6   :  { %v2951_v0 = vpop.f32.mrf.mxu0  ;;  %v3055_v35 = vpop.f32.mrf.mxu1 }
 0x1b7   :  { %v2167_v36 = vmax.f32 %v2118_v63, 0.0  ;;  %v2063_v32 = vmax.f32 %v1534_v44, %v1889_v62 }
 0x1b8   :  { %v1363_v18 = vpop.f32.mrf.mxu0  ;;  %v1892_v19 = vpop.f32.mrf.mxu1 }
 0x1b9   :  { %2217 = vst.msk [vmem:[%s4573_s3 + $0x38] sm:$0xff] %vm2209_vm4, %v2167_v36  ;;  %v2119_v37 = vadd.f32 %v4179_v3, %v2063_v32  ;;  %v1535_v59 = vmax.f32 %v4684_v33, %v1363_v18 }
 0x1ba   :  { %v2952_v34 = vpop.f32.mrf.mxu0  ;;  %v3056_v42 = vpop.f32.mrf.mxu1 }
 0x1bb   :  { %v2168_v43 = vmax.f32 %v2119_v37, 0.0  ;;  %v2064_v6 = vmax.f32 %v1535_v59, %v1892_v19  ;;  %v4688_v19 = vmax.f32 %v3733_v25, %v3735_v26 }
 0x1bc   :  { %v1368_v7 = vpop.f32.mrf.mxu0  ;;  %v1897_v57 = vpop.f32.mrf.mxu1 }
 0x1bd   :  { %2218 = vst.msk [vmem:[%s4573_s3 + $0x40] sm:$0xff] %vm2209_vm4, %v2168_v43  ;;  %v2120_v23 = vadd.f32 %v4179_v3, %v2064_v6  ;;  %v1536_v58 = vmax.f32 %v4685_v24, %v1368_v7  ;;  %v4689_v6 = vmax.f32 %v3745_v38, %v3747_v40 }
 0x1be   :  { %v2955_v27 = vpop.f32.mrf.mxu0  ;;  %v3059_v47 = vpop.f32.mrf.mxu1 }
 0x1bf   :  { %v2169_v48 = vmax.f32 %v2120_v23, 0.0  ;;  %v2065_v22 = vmax.f32 %v1536_v58, %v1897_v57  ;;  %v4690_v47 = vmax.f32 %v3757_v49, %v3759_v50 }
 0x1c0   :  { %v1371_v45 = vpop.f32.mrf.mxu0  ;;  %v1900_v20 = vpop.f32.mrf.mxu1 }
 0x1c1   :  { %2219 = vst.msk [vmem:[%s4573_s3 + $0x48] sm:$0xff] %vm2209_vm4, %v2169_v48  ;;  %v2121_v15 = vadd.f32 %v4179_v3, %v2065_v22  ;;  %v1537_v30 = vmax.f32 %v4686_v11, %v1371_v45 }
 0x1c2   :  { %v2956_v31 = vpop.f32.mrf.mxu0  ;;  %v3060_v54 = vpop.f32.mrf.mxu1 }
 0x1c3   :  { %v2170_v55 = vmax.f32 %v2121_v15, 0.0  ;;  %v2066_v12 = vmax.f32 %v1537_v30, %v1900_v20  ;;  %v4691_v30 = vmax.f32 %v3769_v5, %v3771_v10 }
 0x1c4   :  { %v1376_v8 = vpop.f32.mrf.mxu0  ;;  %v1905_v62 = vpop.f32.mrf.mxu1 }
 0x1c5   :  { %2220 = vst.msk [vmem:[%s4573_s3 + $0x50] sm:$0xff] %vm2209_vm4, %v2170_v55  ;;  %v2122_v63 = vadd.f32 %v4179_v3, %v2066_v12  ;;  %v1538_v44 = vmax.f32 %v4687_v51, %v1376_v8 }
 0x1c6   :  { %v2959_v0 = vpop.f32.mrf.mxu0  ;;  %v3063_v1 = vpop.f32.mrf.mxu1 }
 0x1c7   :  { %v2171_v2 = vmax.f32 %v2122_v63, 0.0  ;;  %v2067_v35 = vmax.f32 %v1538_v44, %v1905_v62  ;;  %v4692_v63 = vmax.f32 %v3781_v28, %v3783_v29 }
 0x1c8   :  { %v1379_v36 = vpop.f32.mrf.mxu0  ;;  %v1908_v32 = vpop.f32.mrf.mxu1 }
 0x1c9   :  { %2221 = vst.msk [vmem:[%s4573_s3 + $0x58] sm:$0xff] %vm2209_vm4, %v2171_v2  ;;  %v2123_v18 = vadd.f32 %v4179_v3, %v2067_v35  ;;  %v1539_v37 = vmax.f32 %v4688_v19, %v1379_v36  ;;  %v4693_v36 = vmax.f32 %v3793_v53, %v3795_v61 }
 0x1ca   :  { %v2960_v33 = vpop.f32.mrf.mxu0  ;;  %v3064_v14 = vpop.f32.mrf.mxu1 }
 0x1cb   :  { %v2172_v16 = vmax.f32 %v2123_v18, 0.0  ;;  %v2068_v59 = vmax.f32 %v1539_v37, %v1908_v32 }
 0x1cc   :  { %v1384_v34 = vpop.f32.mrf.mxu0  ;;  %v1913_v42 = vpop.f32.mrf.mxu1 }
 0x1cd   :  { %2222 = vst.msk [vmem:[%s4573_s3 + $0x60] sm:$0xff] %vm2209_vm4, %v2172_v16  ;;  %v2124_v43 = vadd.f32 %v4179_v3, %v2068_v59  ;;  %v1540_v7 = vmax.f32 %v4689_v6, %v1384_v34  ;;  %v4694_v16 = vmax.f32 %v3805_v46, %v3807_v52 }
 0x1ce   :  { %v2963_v57 = vpop.f32.mrf.mxu0  ;;  %v3067_v25 = vpop.f32.mrf.mxu1 }
 0x1cf   :  { %v2173_v26 = vmax.f32 %v2124_v43, 0.0  ;;  %v2069_v23 = vmax.f32 %v1540_v7, %v1913_v42  ;;  %v4695_v57 = vmax.f32 %v3817_v60, %v3819_v21 }
 0x1d0   :  { %v1387_v24 = vpop.f32.mrf.mxu0  ;;  %v1916_v58 = vpop.f32.mrf.mxu1 }
 0x1d1   :  { %2223 = vst.msk [vmem:[%s4573_s3 + $0x68] sm:$0xff] %vm2209_vm4, %v2173_v26  ;;  %v2125_v27 = vadd.f32 %v4179_v3, %v2069_v23  ;;  %v1541_v48 = vmax.f32 %v4690_v47, %v1387_v24  ;;  %v4696_v47 = vmax.f32 %v3829_v13, %v3831_v41 }
 0x1d2   :  { %v2964_v22 = vpop.f32.mrf.mxu0  ;;  %v3068_v38 = vpop.f32.mrf.mxu1 }
 0x1d3   :  { %v2174_v40 = vmax.f32 %v2125_v27, 0.0  ;;  %v2070_v45 = vmax.f32 %v1541_v48, %v1916_v58 }
 0x1d4   :  { %v1392_v20 = vpop.f32.mrf.mxu0  ;;  %v1921_v15 = vpop.f32.mrf.mxu1 }
 0x1d5   :  { %2224 = vst.msk [vmem:[%s4573_s3 + $0x70] sm:$0xff] %vm2209_vm4, %v2174_v40  ;;  %v2126_v11 = vadd.f32 %v4179_v3, %v2070_v45  ;;  %v1542_v31 = vmax.f32 %v4691_v30, %v1392_v20 }
 0x1d6   :  { %v2967_v54 = vpop.f32.mrf.mxu0  ;;  %v3071_v49 = vpop.f32.mrf.mxu1 }
 0x1d7   :  { %v2175_v50 = vmax.f32 %v2126_v11, 0.0  ;;  %v2071_v55 = vmax.f32 %v1542_v31, %v1921_v15  ;;  %v4697_v15 = vmax.f32 %v3841_v9, %v3843_v4 }
 0x1d8   :  { %v1395_v12 = vpop.f32.mrf.mxu0  ;;  %v1924_v8 = vpop.f32.mrf.mxu1 }
 0x1d9   :  { %2225 = vst.msk [vmem:[%s4573_s3 + $0x78] sm:$0xff] %vm2209_vm4, %v2175_v50  ;;  %v2127_v62 = vadd.f32 %v4179_v3, %v2071_v55  ;;  %v1543_v51 = vmax.f32 %v4692_v63, %v1395_v12  ;;  %v4698_v55 = vmax.f32 %v3853_v17, %v3855_v56 }
 0x1da   :  { %v2968_v44 = vpop.f32.mrf.mxu0  ;;  %v3072_v5 = vpop.f32.mrf.mxu1 }
 0x1db   :  { %v2176_v10 = vmax.f32 %v2127_v62, 0.0  ;;  %v2072_v0 = vmax.f32 %v1543_v51, %v1924_v8  ;;  %v4699_v5 = vld [vmem:[#allocation2_spill] sm:$0xff] }
 0x1dc   :  { %v1400_v1 = vpop.f32.mrf.mxu0  ;;  %v1929_v2 = vpop.f32.mrf.mxu1 }
 0x1dd   :  { %2226 = vst.msk [vmem:[%s4573_s3 + $0x80] sm:$0xff] %vm2209_vm4, %v2176_v10  ;;  %v2128_v35 = vadd.f32 %v4179_v3, %v2072_v0  ;;  %v1544_v32 = vmax.f32 %v4693_v36, %v1400_v1  ;;  %v4700_v10 = vmax.f32 %v3865_v39, %v4699_v5 }
 0x1de   :  { %v2971_v18 = vpop.f32.mrf.mxu0  ;;  %v3075_v28 = vpop.f32.mrf.mxu1 }
 0x1df   :  { %v2177_v29 = vmax.f32 %v2128_v35, 0.0  ;;  %v2073_v19 = vmax.f32 %v1544_v32, %v1929_v2  ;;  %v4701_v18 = vld [vmem:[#allocation3_spill] sm:$0xff]  ;;  %v4702_v28 = vld [vmem:[#allocation4_spill] sm:$0xff] }
 0x1e0   :  { %v1403_v37 = vpop.f32.mrf.mxu0  ;;  %v1932_v33 = vpop.f32.mrf.mxu1 }
 0x1e1   :  { %2227 = vst.msk [vmem:[%s4573_s3 + $0x88] sm:$0xff] %vm2209_vm4, %v2177_v29  ;;  %v2129_v14 = vadd.f32 %v4179_v3, %v2073_v19  ;;  %v1545_v59 = vmax.f32 %v4694_v16, %v1403_v37  ;;  %v4703_v29 = vmax.f32 %v4701_v18, %v4702_v28 }
 0x1e2   :  { %v2972_v34 = vpop.f32.mrf.mxu0  ;;  %v3076_v53 = vpop.f32.mrf.mxu1 }
 0x1e3   :  { %v2178_v61 = vmax.f32 %v2129_v14, 0.0  ;;  %v2074_v42 = vmax.f32 %v1545_v59, %v1932_v33  ;;  %v4704_v53 = vld [vmem:[#allocation5_spill] sm:$0xff] }
 0x1e4   :  { %v1408_v43 = vpop.f32.mrf.mxu0  ;;  %v1937_v6 = vpop.f32.mrf.mxu1 }
 0x1e5   :  { %2228 = vst.msk [vmem:[%s4573_s3 + $0x90] sm:$0xff] %vm2209_vm4, %v2178_v61  ;;  %v2130_v7 = vadd.f32 %v4179_v3, %v2074_v42  ;;  %v1546_v25 = vmax.f32 %v4695_v57, %v1408_v43  ;;  %v4705_v61 = vld [vmem:[#allocation6_spill] sm:$0xff] }
 0x1e6   :  { %v2975_v26 = vpop.f32.mrf.mxu0  ;;  %v3079_v46 = vpop.f32.mrf.mxu1  ;;  %v4706_v42 = vmax.f32 %v4704_v53, %v4705_v61 }
 0x1e7   :  { %v2179_v52 = vmax.f32 %v2130_v7, 0.0  ;;  %v2075_v23 = vmax.f32 %v1546_v25, %v1937_v6 }
 0x1e8   :  { %v1411_v24 = vpop.f32.mrf.mxu0  ;;  %v1940_v58 = vpop.f32.mrf.mxu1 }
 0x1e9   :  { %2229 = vst.msk [vmem:[%s4573_s3 + $0x98] sm:$0xff] %vm2209_vm4, %v2179_v52  ;;  %v2131_v27 = vadd.f32 %v4179_v3, %v2075_v23  ;;  %v1547_v48 = vmax.f32 %v4696_v47, %v1411_v24  ;;  %v4707_v23 = vld [vmem:[#allocation7_spill] sm:$0xff]  ;;  %v4708_v24 = vld [vmem:[#allocation8_spill] sm:$0xff] }
 0x1ea   :  { %v2976_v22 = vpop.f32.mrf.mxu0  ;;  %v3080_v60 = vpop.f32.mrf.mxu1 }
 0x1eb   :  { %v2180_v21 = vmax.f32 %v2131_v27, 0.0  ;;  %v2076_v38 = vmax.f32 %v1547_v48, %v1940_v58  ;;  %v4709_v58 = vmax.f32 %v4707_v23, %v4708_v24 }
 0x1ec   :  { %v1416_v40 = vpop.f32.mrf.mxu0  ;;  %v1945_v45 = vpop.f32.mrf.mxu1 }
 0x1ed   :  { %2230 = vst.msk [vmem:[%s4573_s3 + $0xa0] sm:$0xff] %vm2209_vm4, %v2180_v21  ;;  %v2132_v20 = vadd.f32 %v4179_v3, %v2076_v38  ;;  %v1548_v11 = vmax.f32 %v4697_v15, %v1416_v40 }
 0x1ee   :  { %v2979_v30 = vpop.f32.mrf.mxu0  ;;  %v3083_v41 = vpop.f32.mrf.mxu1 }
 0x1ef   :  { %v2181_v13 = vmax.f32 %v2132_v20, 0.0  ;;  %v2077_v31 = vmax.f32 %v1548_v11, %v1945_v45  ;;  %v4710_v45 = vld [vmem:[#allocation9_spill] sm:$0xff]  ;;  %v4711_v20 = vld [vmem:[#allocation10_spill] sm:$0xff] }
 0x1f0   :  { %v1419_v54 = vpop.f32.mrf.mxu0  ;;  %v1948_v49 = vpop.f32.mrf.mxu1  ;;  %v4712_v15 = vmax.f32 %v4710_v45, %v4711_v20 }
 0x1f1   :  { %2231 = vst.msk [vmem:[%s4573_s3 + $0xa8] sm:$0xff] %vm2209_vm4, %v2181_v13  ;;  %v2133_v50 = vadd.f32 %v4179_v3, %v2077_v31  ;;  %v1549_v12 = vmax.f32 %v4698_v55, %v1419_v54  ;;  %v4713_v55 = vld [vmem:[#allocation11_spill] sm:$0xff] }
 0x1f2   :  { %v2980_v8 = vpop.f32.mrf.mxu0  ;;  %v3084_v9 = vpop.f32.mrf.mxu1 }
 0x1f3   :  { %v2182_v4 = vmax.f32 %v2133_v50, 0.0  ;;  %v2078_v62 = vmax.f32 %v1549_v12, %v1948_v49  ;;  %v4714_v12 = vld [vmem:[#allocation12_spill] sm:$0xff] }
 0x1f4   :  { %v1424_v63 = vpop.f32.mrf.mxu0  ;;  %v1953_v51 = vpop.f32.mrf.mxu1  ;;  %v4715_v8 = vmax.f32 %v4713_v55, %v4714_v12 }
 0x1f5   :  { %2232 = vst.msk [vmem:[%s4573_s3 + $0xb0] sm:$0xff] %vm2209_vm4, %v2182_v4  ;;  %v2134_v44 = vadd.f32 %v4179_v3, %v2078_v62  ;;  %v1550_v0 = vmax.f32 %v4700_v10, %v1424_v63 }
 0x1f6   :  { %v2983_v1 = vpop.f32.mrf.mxu0  ;;  %v3087_v56 = vpop.f32.mrf.mxu1 }
 0x1f7   :  { %v2183_v17 = vmax.f32 %v2134_v44, 0.0  ;;  %v2079_v2 = vmax.f32 %v1550_v0, %v1953_v51  ;;  %v4716_v0 = vld [vmem:[#allocation13_spill] sm:$0xff]  ;;  %v4717_v1 = vld [vmem:[#allocation14_spill] sm:$0xff] }
 0x1f8   :  { %v1427_v35 = vpop.f32.mrf.mxu0  ;;  %v1956_v36 = vpop.f32.mrf.mxu1  ;;  %v4718_v56 = vmax.f32 %v4716_v0, %v4717_v1 }
 0x1f9   :  { %2233 = vst.msk [vmem:[%s4573_s3 + $0xb8] sm:$0xff] %vm2209_vm4, %v2183_v17  ;;  %v2135_v32 = vadd.f32 %v4179_v3, %v2079_v2  ;;  %v1551_v19 = vmax.f32 %v4703_v29, %v1427_v35 }
 0x1fa   :  { %v2984_v37 = vpop.f32.mrf.mxu0  ;;  %v3088_v39 = vpop.f32.mrf.mxu1 }
 0x1fb   :  { %v2184_v33 = vmax.f32 %v2135_v32, 0.0  ;;  %v2080_v14 = vmax.f32 %v1551_v19, %v1956_v36  ;;  %v4719_v19 = vld [vmem:[#allocation15_spill] sm:$0xff]  ;;  %v4720_v37 = vld [vmem:[#allocation16_spill] sm:$0xff] }
 0x1fc   :  { %v1432_v16 = vpop.f32.mrf.mxu0  ;;  %v1961_v59 = vpop.f32.mrf.mxu1  ;;  %v4721_v39 = vmax.f32 %v4719_v19, %v4720_v37 }
 0x1fd   :  { %2234 = vst.msk [vmem:[%s4573_s3 + $0xc0] sm:$0xff] %vm2209_vm4, %v2184_v33  ;;  %v2136_v34 = vadd.f32 %v4179_v3, %v2080_v14  ;;  %v1552_v43 = vmax.f32 %v4706_v42, %v1432_v16 }
 0x1fe   :  { %v2987_v6 = vpop.f32.mrf.mxu0  ;;  %v3091_v7 = vpop.f32.mrf.mxu1 }
 0x1ff   :  { %v2185_v57 = vmax.f32 %v2136_v34, 0.0  ;;  %v2081_v25 = vmax.f32 %v1552_v43, %v1961_v59  ;;  %v4722_v43 = vld [vmem:[#allocation17_spill] sm:$0xff]  ;;  %v4723_v6 = vld [vmem:[#allocation18_spill] sm:$0xff] }
 0x200   :  { %v1435_v26 = vpop.f32.mrf.mxu0  ;;  %v1964_v46 = vpop.f32.mrf.mxu1  ;;  %v4724_v7 = vmax.f32 %v4722_v43, %v4723_v6 }
 0x201   :  { %2235 = vst.msk [vmem:[%s4573_s3 + $0xc8] sm:$0xff] %vm2209_vm4, %v2185_v57  ;;  %v2137_v52 = vadd.f32 %v4179_v3, %v2081_v25  ;;  %v1553_v27 = vmax.f32 %v4709_v58, %v1435_v26 }
 0x202   :  { %v2988_v47 = vpop.f32.mrf.mxu0  ;;  %v3092_v48 = vpop.f32.mrf.mxu1 }
 0x203   :  { %v2186_v22 = vmax.f32 %v2137_v52, 0.0  ;;  %v2082_v60 = vmax.f32 %v1553_v27, %v1964_v46  ;;  %v4725_v27 = vld [vmem:[#allocation19_spill] sm:$0xff]  ;;  %v4726_v47 = vld [vmem:[#allocation20_spill] sm:$0xff] }
 0x204   :  { %v1440_v21 = vpop.f32.mrf.mxu0  ;;  %v1969_v38 = vpop.f32.mrf.mxu1  ;;  %v4727_v48 = vmax.f32 %v4725_v27, %v4726_v47 }
 0x205   :  { %2236 = vst.msk [vmem:[%s4573_s3 + $0xd0] sm:$0xff] %vm2209_vm4, %v2186_v22  ;;  %v2138_v40 = vadd.f32 %v4179_v3, %v2082_v60  ;;  %v1554_v11 = vmax.f32 %v4712_v15, %v1440_v21 }
 0x206   :  { %v2991_v30 = vpop.f32.mrf.mxu0  ;;  %v3095_v41 = vpop.f32.mrf.mxu1 }
 0x207   :  { %v2187_v13 = vmax.f32 %v2138_v40, 0.0  ;;  %v2083_v31 = vmax.f32 %v1554_v11, %v1969_v38  ;;  %v4728_v11 = vld [vmem:[#allocation21_spill] sm:$0xff]  ;;  %v4729_v30 = vld [vmem:[#allocation22_spill] sm:$0xff] }
 0x208   :  { %v1443_v54 = vpop.f32.mrf.mxu0  ;;  %v1972_v49 = vpop.f32.mrf.mxu1  ;;  %v4730_v41 = vmax.f32 %v4728_v11, %v4729_v30 }
 0x209   :  { %2237 = vst.msk [vmem:[%s4573_s3 + $0xd8] sm:$0xff] %vm2209_vm4, %v2187_v13  ;;  %v2139_v50 = vadd.f32 %v4179_v3, %v2083_v31  ;;  %v1555_v9 = vmax.f32 %v4715_v8, %v1443_v54 }
 0x20a   :  { %v2992_v4 = vpop.f32.mrf.mxu0  ;;  %v3096_v62 = vpop.f32.mrf.mxu1 }
 0x20b   :  { %v2188_v63 = vmax.f32 %v2139_v50, 0.0  ;;  %v2084_v51 = vmax.f32 %v1555_v9, %v1972_v49  ;;  %v4731_v9 = vld [vmem:[#allocation23_spill] sm:$0xff]  ;;  %v4732_v4 = vld [vmem:[#allocation24_spill] sm:$0xff] }
 0x20c   :  { %v1448_v44 = vpop.f32.mrf.mxu0  ;;  %v1977_v5 = vpop.f32.mrf.mxu1  ;;  %v4733_v62 = vmax.f32 %v4731_v9, %v4732_v4 }
 0x20d   :  { %2238 = vst.msk [vmem:[%s4573_s3 + $0xe0] sm:$0xff] %vm2209_vm4, %v2188_v63  ;;  %v2140_v10 = vadd.f32 %v4179_v3, %v2084_v51  ;;  %v1556_v17 = vmax.f32 %v4718_v56, %v1448_v44 }
 0x20e   :  { %v2995_v2 = vpop.f32.mrf.mxu0  ;;  %v3099_v35 = vpop.f32.mrf.mxu1 }
 0x20f   :  { %v2189_v36 = vmax.f32 %v2140_v10, 0.0  ;;  %v2085_v32 = vmax.f32 %v1556_v17, %v1977_v5  ;;  %v4734_v17 = vld [vmem:[#allocation25_spill] sm:$0xff]  ;;  %v4735_v2 = vld [vmem:[#allocation26_spill] sm:$0xff] }
 0x210   :  { %v1451_v18 = vpop.f32.mrf.mxu0  ;;  %v1980_v28 = vpop.f32.mrf.mxu1  ;;  %v4736_v35 = vmax.f32 %v4734_v17, %v4735_v2 }
 0x211   :  { %2239 = vst.msk [vmem:[%s4573_s3 + $0xe8] sm:$0xff] %vm2209_vm4, %v2189_v36  ;;  %v2141_v29 = vadd.f32 %v4179_v3, %v2085_v32  ;;  %v1557_v33 = vmax.f32 %v4721_v39, %v1451_v18 }
 0x212   :  { %v2996_v14 = vpop.f32.mrf.mxu0  ;;  %v3100_v16 = vpop.f32.mrf.mxu1 }
 0x213   :  { %v2190_v59 = vmax.f32 %v2141_v29, 0.0  ;;  %v2086_v34 = vmax.f32 %v1557_v33, %v1980_v28  ;;  %v4737_v33 = vld [vmem:[#allocation27_spill] sm:$0xff]  ;;  %v4738_v14 = vld [vmem:[#allocation28_spill] sm:$0xff] }
 0x214   :  { %v1456_v53 = vpop.f32.mrf.mxu0  ;;  %v1985_v61 = vpop.f32.mrf.mxu1  ;;  %v4739_v16 = vmax.f32 %v4737_v33, %v4738_v14 }
 0x215   :  { %2240 = vst.msk [vmem:[%s4573_s3 + $0xf0] sm:$0xff] %vm2209_vm4, %v2190_v59  ;;  %v2142_v42 = vadd.f32 %v4179_v3, %v2086_v34  ;;  %v1558_v57 = vmax.f32 %v4724_v7, %v1456_v53 }
 0x216   :  { %v2999_v25 = vpop.f32.mrf.mxu0  ;;  %v3103_v26 = vpop.f32.mrf.mxu1 }
 0x217   :  { %v2191_v46 = vmax.f32 %v2142_v42, 0.0  ;;  %v2087_v52 = vmax.f32 %v1558_v57, %v1985_v61  ;;  %v4740_v57 = vld [vmem:[#allocation29_spill] sm:$0xff]  ;;  %v4741_v25 = vld [vmem:[#allocation30_spill] sm:$0xff] }
 0x218   :  { %v1459_v23 = vpop.f32.mrf.mxu0  ;;  %v1988_v24 = vpop.f32.mrf.mxu1  ;;  %v4742_v26 = vmax.f32 %v4740_v57, %v4741_v25 }
 0x219   :  { %2241 = vst.msk [vmem:[%s4573_s3 + $0xf8] sm:$0xff] %vm2209_vm4, %v2191_v46  ;;  %v2143_v58 = vadd.f32 %v4179_v3, %v2087_v52  ;;  %v1559_v22 = vmax.f32 %v4727_v48, %v1459_v23 }
 0x21a   :  { %v3000_v60 = vpop.f32.mrf.mxu0  ;;  %v3104_v21 = vpop.f32.mrf.mxu1 }
 0x21b   :  { %v2192_v38 = vmax.f32 %v2143_v58, 0.0  ;;  %v2088_v40 = vmax.f32 %v1559_v22, %v1988_v24  ;;  %v4743_v22 = vld [vmem:[#allocation31_spill] sm:$0xff]  ;;  %v4744_v60 = vld [vmem:[#allocation32_spill] sm:$0xff] }
 0x21c   :  { %v1464_v45 = vpop.f32.mrf.mxu0  ;;  %v1993_v20 = vpop.f32.mrf.mxu1  ;;  %v4745_v21 = vmax.f32 %v4743_v22, %v4744_v60 }
 0x21d   :  { %2242 = vst.msk [vmem:[%s4573_s3 + $0x100] sm:$0xff] %vm2209_vm4, %v2192_v38  ;;  %v2144_v15 = vadd.f32 %v4179_v3, %v2088_v40  ;;  %v1560_v13 = vmax.f32 %v4730_v41, %v1464_v45 }
 0x21e   :  { %v3003_v31 = vpop.f32.mrf.mxu0  ;;  %v3107_v54 = vpop.f32.mrf.mxu1 }
 0x21f   :  { %v2193_v49 = vmax.f32 %v2144_v15, 0.0  ;;  %v2089_v50 = vmax.f32 %v1560_v13, %v1993_v20  ;;  %v4746_v13 = vld [vmem:[#allocation33_spill] sm:$0xff]  ;;  %v4747_v31 = vld [vmem:[#allocation34_spill] sm:$0xff] }
 0x220   :  { %v1467_v55 = vpop.f32.mrf.mxu0  ;;  %v1996_v12 = vpop.f32.mrf.mxu1  ;;  %v4748_v54 = vmax.f32 %v4746_v13, %v4747_v31 }
 0x221   :  { %2243 = vst.msk [vmem:[%s4573_s3 + $0x108] sm:$0xff] %vm2209_vm4, %v2193_v49  ;;  %v2145_v8 = vadd.f32 %v4179_v3, %v2089_v50  ;;  %v1561_v63 = vmax.f32 %v4733_v62, %v1467_v55 }
 0x222   :  { %v3004_v51 = vpop.f32.mrf.mxu0  ;;  %v3108_v44 = vpop.f32.mrf.mxu1 }
 0x223   :  { %v2194_v5 = vmax.f32 %v2145_v8, 0.0  ;;  %v2090_v10 = vmax.f32 %v1561_v63, %v1996_v12  ;;  %v4749_v63 = vld [vmem:[#allocation35_spill] sm:$0xff]  ;;  %v4750_v51 = vld [vmem:[#allocation36_spill] sm:$0xff] }
 0x224   :  { %v1472_v0 = vpop.f32.mrf.mxu0  ;;  %v2001_v1 = vpop.f32.mrf.mxu1  ;;  %v4751_v44 = vmax.f32 %v4749_v63, %v4750_v51 }
 0x225   :  { %2244 = vst.msk [vmem:[%s4573_s3 + $0x110] sm:$0xff] %vm2209_vm4, %v2194_v5  ;;  %v2146_v56 = vadd.f32 %v4179_v3, %v2090_v10  ;;  %v1562_v36 = vmax.f32 %v4736_v35, %v1472_v0 }
 0x226   :  { %v3007_v32 = vpop.f32.mrf.mxu0  ;;  %v3111_v18 = vpop.f32.mrf.mxu1 }
 0x227   :  { %v2195_v28 = vmax.f32 %v2146_v56, 0.0  ;;  %v2091_v29 = vmax.f32 %v1562_v36, %v2001_v1  ;;  %v4752_v36 = vld [vmem:[#allocation37_spill] sm:$0xff]  ;;  %v4753_v32 = vld [vmem:[#allocation38_spill] sm:$0xff] }
 0x228   :  { %v1475_v19 = vpop.f32.mrf.mxu0  ;;  %v2004_v37 = vpop.f32.mrf.mxu1  ;;  %v4754_v18 = vmax.f32 %v4752_v36, %v4753_v32 }
 0x229   :  { %2245 = vst.msk [vmem:[%s4573_s3 + $0x118] sm:$0xff] %vm2209_vm4, %v2195_v28  ;;  %v2147_v39 = vadd.f32 %v4179_v3, %v2091_v29  ;;  %v1563_v59 = vmax.f32 %v4739_v16, %v1475_v19 }
 0x22a   :  { %v3008_v34 = vpop.f32.mrf.mxu0  ;;  %v3112_v53 = vpop.f32.mrf.mxu1 }
 0x22b   :  { %v2196_v61 = vmax.f32 %v2147_v39, 0.0  ;;  %v2092_v42 = vmax.f32 %v1563_v59, %v2004_v37  ;;  %v4755_v59 = vld [vmem:[#allocation39_spill] sm:$0xff]  ;;  %v4756_v34 = vld [vmem:[#allocation40_spill] sm:$0xff] }
 0x22c   :  { %v1480_v43 = vpop.f32.mrf.mxu0  ;;  %v2009_v6 = vpop.f32.mrf.mxu1  ;;  %v4757_v53 = vmax.f32 %v4755_v59, %v4756_v34 }
 0x22d   :  { %2246 = vst.msk [vmem:[%s4573_s3 + $0x120] sm:$0xff] %vm2209_vm4, %v2196_v61  ;;  %v2148_v7 = vadd.f32 %v4179_v3, %v2092_v42  ;;  %v1564_v46 = vmax.f32 %v4742_v26, %v1480_v43 }
 0x22e   :  { %v3011_v52 = vpop.f32.mrf.mxu0  ;;  %v3115_v23 = vpop.f32.mrf.mxu1 }
 0x22f   :  { %v2197_v24 = vmax.f32 %v2148_v7, 0.0  ;;  %v2093_v58 = vmax.f32 %v1564_v46, %v2009_v6  ;;  %v4758_v46 = vld [vmem:[#allocation41_spill] sm:$0xff]  ;;  %v4759_v52 = vld [vmem:[#allocation42_spill] sm:$0xff] }
 0x230   :  { %v1483_v27 = vpop.f32.mrf.mxu0  ;;  %v2012_v47 = vpop.f32.mrf.mxu1  ;;  %v4760_v23 = vmax.f32 %v4758_v46, %v4759_v52 }
 0x231   :  { %2247 = vst.msk [vmem:[%s4573_s3 + $0x128] sm:$0xff] %vm2209_vm4, %v2197_v24  ;;  %v2149_v48 = vadd.f32 %v4179_v3, %v2093_v58  ;;  %v1565_v38 = vmax.f32 %v4745_v21, %v1483_v27 }
 0x232   :  { %v3012_v40 = vpop.f32.mrf.mxu0  ;;  %v3116_v45 = vpop.f32.mrf.mxu1 }
 0x233   :  { %v2198_v20 = vmax.f32 %v2149_v48, 0.0  ;;  %v2094_v15 = vmax.f32 %v1565_v38, %v2012_v47  ;;  %v4761_v38 = vld [vmem:[#allocation43_spill] sm:$0xff]  ;;  %v4762_v40 = vld [vmem:[#allocation44_spill] sm:$0xff] }
 0x234   :  { %v1488_v11 = vpop.f32.mrf.mxu0  ;;  %v2017_v30 = vpop.f32.mrf.mxu1  ;;  %v4763_v45 = vmax.f32 %v4761_v38, %v4762_v40 }
 0x235   :  { %2248 = vst.msk [vmem:[%s4573_s3 + $0x130] sm:$0xff] %vm2209_vm4, %v2198_v20  ;;  %v2150_v41 = vadd.f32 %v4179_v3, %v2094_v15  ;;  %v1566_v49 = vmax.f32 %v4748_v54, %v1488_v11 }
 0x236   :  { %v3015_v50 = vpop.f32.mrf.mxu0  ;;  %v3119_v55 = vpop.f32.mrf.mxu1 }
 0x237   :  { %v2199_v12 = vmax.f32 %v2150_v41, 0.0  ;;  %v2095_v8 = vmax.f32 %v1566_v49, %v2017_v30  ;;  %v4764_v49 = vld [vmem:[#allocation45_spill] sm:$0xff]  ;;  %v4765_v50 = vld [vmem:[#allocation46_spill] sm:$0xff] }
 0x238   :  { %v1491_v9 = vpop.f32.mrf.mxu0  ;;  %v2020_v4 = vpop.f32.mrf.mxu1  ;;  %v4766_v55 = vmax.f32 %v4764_v49, %v4765_v50 }
 0x239   :  { %2249 = vst.msk [vmem:[%s4573_s3 + $0x138] sm:$0xff] %vm2209_vm4, %v2199_v12  ;;  %v2151_v62 = vadd.f32 %v4179_v3, %v2095_v8  ;;  %v1567_v5 = vmax.f32 %v4751_v44, %v1491_v9 }
 0x23a   :  { %v3016_v10 = vpop.f32.mrf.mxu0  ;;  %v3120_v0 = vpop.f32.mrf.mxu1 }
 0x23b   :  { %v2200_v1 = vmax.f32 %v2151_v62, 0.0  ;;  %v2096_v56 = vmax.f32 %v1567_v5, %v2020_v4  ;;  %v4767_v5 = vld [vmem:[#allocation47_spill] sm:$0xff]  ;;  %v4768_v10 = vld [vmem:[#allocation48_spill] sm:$0xff] }
 0x23c   :  { %v1496_v17 = vpop.f32.mrf.mxu0  ;;  %v2025_v2 = vpop.f32.mrf.mxu1  ;;  %v4769_v0 = vmax.f32 %v4767_v5, %v4768_v10 }
 0x23d   :  { %2250 = vst.msk [vmem:[%s4573_s3 + $0x140] sm:$0xff] %vm2209_vm4, %v2200_v1  ;;  %v2152_v35 = vadd.f32 %v4179_v3, %v2096_v56  ;;  %v1568_v28 = vmax.f32 %v4754_v18, %v1496_v17 }
 0x23e   :  { %v3019_v29 = vpop.f32.mrf.mxu0  ;;  %v3123_v19 = vpop.f32.mrf.mxu1 }
 0x23f   :  { %v2201_v37 = vmax.f32 %v2152_v35, 0.0  ;;  %v2097_v39 = vmax.f32 %v1568_v28, %v2025_v2  ;;  %v4770_v28 = vld [vmem:[#allocation49_spill] sm:$0xff]  ;;  %v4771_v29 = vld [vmem:[#allocation50_spill] sm:$0xff] }
 0x240   :  { %v1499_v33 = vpop.f32.mrf.mxu0  ;;  %v2028_v14 = vpop.f32.mrf.mxu1  ;;  %v4772_v19 = vmax.f32 %v4770_v28, %v4771_v29 }
 0x241   :  { %2251 = vst.msk [vmem:[%s4573_s3 + $0x148] sm:$0xff] %vm2209_vm4, %v2201_v37  ;;  %v2153_v16 = vadd.f32 %v4179_v3, %v2097_v39  ;;  %v1569_v61 = vmax.f32 %v4757_v53, %v1499_v33 }
 0x242   :  { %v3020_v42 = vpop.f32.mrf.mxu0  ;;  %v3124_v43 = vpop.f32.mrf.mxu1 }
 0x243   :  { %v2202_v6 = vmax.f32 %v2153_v16, 0.0  ;;  %v2098_v7 = vmax.f32 %v1569_v61, %v2028_v14 }
 0x244   :  { %v1504_v57 = vpop.f32.mrf.mxu0  ;;  %v2033_v25 = vpop.f32.mrf.mxu1 }
 0x245   :  { %2252 = vst.msk [vmem:[%s4573_s3 + $0x150] sm:$0xff] %vm2209_vm4, %v2202_v6  ;;  %v2154_v26 = vadd.f32 %v4179_v3, %v2098_v7  ;;  %v1570_v24 = vmax.f32 %v4760_v23, %v1504_v57 }
 0x246   :  { %v3023_v58 = vpop.f32.mrf.mxu0  ;;  %v3127_v27 = vpop.f32.mrf.mxu1 }
 0x247   :  { %v2203_v47 = vmax.f32 %v2154_v26, 0.0  ;;  %v2099_v48 = vmax.f32 %v1570_v24, %v2033_v25 }
 0x248   :  { %v1507_v22 = vpop.f32.mrf.mxu0  ;;  %v2036_v60 = vpop.f32.mrf.mxu1 }
 0x249   :  { %2253 = vst.msk [vmem:[%s4573_s3 + $0x158] sm:$0xff] %vm2209_vm4, %v2203_v47  ;;  %v2155_v21 = vadd.f32 %v4179_v3, %v2099_v48  ;;  %v1571_v20 = vmax.f32 %v4763_v45, %v1507_v22 }
 0x24a   :  { %v3024_v15 = vpop.f32.mrf.mxu0  ;;  %v3128_v11 = vpop.f32.mrf.mxu1 }
 0x24b   :  { %v2204_v30 = vmax.f32 %v2155_v21, 0.0  ;;  %v2100_v41 = vmax.f32 %v1571_v20, %v2036_v60 }
 0x24c   :  { %v1512_v13 = vpop.f32.mrf.mxu0  ;;  %v2041_v31 = vpop.f32.mrf.mxu1 }
 0x24d   :  { %2254 = vst.msk [vmem:[%s4573_s3 + $0x160] sm:$0xff] %vm2209_vm4, %v2204_v30  ;;  %v2156_v54 = vadd.f32 %v4179_v3, %v2100_v41  ;;  %v1572_v12 = vmax.f32 %v4766_v55, %v1512_v13 }
 0x24e   :  { %v3027_v8 = vpop.f32.mrf.mxu0  ;;  %v3131_v9 = vpop.f32.mrf.mxu1 }
 0x24f   :  { %v2205_v4 = vmax.f32 %v2156_v54, 0.0  ;;  %v2101_v62 = vmax.f32 %v1572_v12, %v2041_v31 }
 0x250   :  { %v1515_v63 = vpop.f32.mrf.mxu0  ;;  %v2044_v51 = vpop.f32.mrf.mxu1 }
 0x251   :  { %2255 = vst.msk [vmem:[%s4573_s3 + $0x168] sm:$0xff] %vm2209_vm4, %v2205_v4  ;;  %v2157_v44 = vadd.f32 %v4179_v3, %v2101_v62  ;;  %v1573_v1 = vmax.f32 %v4769_v0, %v1515_v63 }
 0x252   :  { %v3028_v56 = vpop.f32.mrf.mxu0  ;;  %v3132_v17 = vpop.f32.mrf.mxu1 }
 0x253   :  { %v2206_v2 = vmax.f32 %v2157_v44, 0.0  ;;  %v2102_v35 = vmax.f32 %v1573_v1, %v2044_v51 }
 0x254   :  { %v1520_v36 = vpop.f32.mrf.mxu0  ;;  %v2049_v32 = vpop.f32.mrf.mxu1 }
 0x255   :  { %2256 = vst.msk [vmem:[%s4573_s3 + $0x170] sm:$0xff] %vm2209_vm4, %v2206_v2  ;;  %v2158_v18 = vadd.f32 %v4179_v3, %v2102_v35  ;;  %v1574_v37 = vmax.f32 %v4772_v19, %v1520_v36 }
 0x256   :  { %v3031_v39 = vpop.f32.mrf.mxu0  ;;  %v3135_v33 = vpop.f32.mrf.mxu1 }
 0x257   :  { %v2207_v14 = vmax.f32 %v2158_v18, 0.0  ;;  %v2103_v16 = vmax.f32 %v1574_v37, %v2049_v32 }
 0x258   :  { %v1523_v59 = vpop.f32.mrf.mxu0  ;;  %v2052_v34 = vpop.f32.mrf.mxu1 }
 0x259   :  { %2257 = vst.msk [vmem:[%s4573_s3 + $0x178] sm:$0xff] %vm2209_vm4, %v2207_v14  ;;  %v2159_v53 = vadd.f32 %v4179_v3, %v2103_v16 }
 0x25a   :  { %v3032_v61 = vpop.f32.mrf.mxu0  ;;  %v3136_v42 = vpop.f32.mrf.mxu1 }
 0x25b   :  { %v2208_v43 = vmax.f32 %v2159_v53, 0.0 }
 0x25d   :  { %2258 = vst.msk [vmem:[%s4573_s3 + $0x180] sm:$0xff] %vm2209_vm4, %v2208_v43 }

// kernel: network_forward.4
= control target key start
LH: loop header
LB: loop body
LE: loop exit
PB: predicated region body
PF: predicated region fallthrough
CT: control target
= control target key end

     0   :  { %v2371_v0 = vmov 0   ;;  %vm368_vm0 = vcmask 130048   ;;  %vm1691_vm1 = vcmask 261120   ;;  %s3273_s1 = inlined_call_operand.vmem [shape: bf16[400,32], index: 1, kind: input, shape index: {}]   ;;  %s3274_s0 = inlined_call_operand.vmem [shape: bf16[4,104,400], index: 0, kind: input, shape index: {}]   ;;  %s3275_s2 = inlined_call_operand.vmem [shape: f32[1,32], index: 2, kind: input, shape index: {}]   ;;  %s3276_s3 = inlined_call_operand.vmem [shape: f32[104,32], index: 3, kind: output, shape index: {}]  }
   0x1   :  { %478 = vmatprep.subr.bf16.mxu1 %v2371_v0  ;;  %v2396_v1 = vld [vmem:[%s3273_s1 + $0x78] sm:$0xff]   ;;  %v2413_v4 = vld [vmem:[%s3273_s1 + $0x70] sm:$0xff]   ;;  %v2431_v7 = vld [vmem:[%s3273_s1 + $0x68] sm:$0xff]  }
   0x2   :  { %v2401_v2 = vld [vmem:[%s3273_s1 + $0xb8] sm:$0xff]   ;;  %1953 = vmatprep.subr.bf16.mxu0 %v2396_v1  ;;  %v2420_v5 = vld [vmem:[%s3273_s1 + $0xb0] sm:$0xff]   ;;  %v2437_v8 = vld [vmem:[%s3273_s1 + $0xa8] sm:$0xff]  }
   0x3   :  { %v2407_v3 = vld [vmem:[%s3273_s1 + $0x38] sm:$0xff]   ;;  %479 = vmatpush1.bf16.msra.mxu1 %v2401_v2  ;;  %v2426_v6 = vld [vmem:[%s3273_s1 + $0x30] sm:$0xff]   ;;  %v2444_v9 = vld [vmem:[%s3273_s1 + $0x28] sm:$0xff]  }
   0x4   :  { %1954 = vmatpush3.bf16.msra.mxu0 %v2407_v3  ;;  %480 = vmatprep.subr.bf16.mxu1 %v2371_v0  ;;  %v2450_v10 = vld [vmem:[%s3273_s1 + $0x60] sm:$0xff]   ;;  %v2469_v13 = vld [vmem:[%s3273_s1 + $0x58] sm:$0xff]   ;;  %v2488_v16 = vld [vmem:[%s3273_s1 + $0x50] sm:$0xff]  }
   0x5   :  { %1955 = vmatprep.subr.bf16.mxu0 %v2413_v4  ;;  %v2456_v11 = vld [vmem:[%s3273_s1 + $0xa0] sm:$0xff]   ;;  %v2475_v14 = vld [vmem:[%s3273_s1 + $0x98] sm:$0xff]   ;;  %v2494_v17 = vld [vmem:[%s3273_s1 + $0x90] sm:$0xff]  }
   0x6   :  { %v2463_v12 = vld [vmem:[%s3273_s1 + $0x20] sm:$0xff]   ;;  %v2482_v15 = vld [vmem:[%s3273_s1 + $0x18] sm:$0xff]   ;;  %v2501_v18 = vld [vmem:[%s3273_s1 + $0x10] sm:$0xff]  }
   0x7   :  { %481 = vmatpush1.bf16.msra.mxu1 %v2420_v5  ;;  %v2507_v19 = vld [vmem:[%s3273_s1 + $0x48] sm:$0xff]   ;;  %v2525_v22 = vld [vmem:[%s3273_s1 + $0x40] sm:$0xff]  }
   0x8   :  { %1956 = vmatpush3.bf16.msra.mxu0 %v2426_v6  ;;  %482 = vmatprep.subr.bf16.mxu1 %v2371_v0  ;;  %v2512_v20 = vld [vmem:[%s3273_s1 + $0x88] sm:$0xff]   ;;  %v2212_v23 = vld [vmem:[%s3274_s0 + $0x4] ss:$16 sps:$4 sm:$0xff]   ;;  %v2210_v27 = vld [vmem:[%s3274_s0] ss:$16 sps:$4 sm:$0xff]  }
   0x9   :  { %1957 = vmatprep.subr.bf16.mxu0 %v2431_v7  ;;  %v2518_v21 = vld [vmem:[%s3273_s1 + $0x8] sm:$0xff]   ;;  %v2535_v24 = vld [vmem:[%s3273_s1 + $0x80] sm:$0xff]   ;;  %422 = vmatprep.mubr.bf16.mxu0 %v2212_v23 }
   0xa   :  { %v2216_v25 = vld [vmem:[%s3274_s0 + $0xc] ss:$16 sps:$4 sm:$0xff]   ;;  %v2545_v26 = vld [vmem:[%s3273_s1] sm:$0xff]   ;;  %v2214_v30 = vld [vmem:[%s3274_s0 + $0x8] ss:$16 sps:$4 sm:$0xff]  }
   0xb   :  { %483 = vmatpush1.bf16.msra.mxu1 %v2437_v8  ;;  %1762 = vmatprep.mubr.msk.bf16.mxu1 %vm368_vm0, %v2216_v25  ;;  %v2556_v28 = vld [vmem:[%s3273_s1 + $0xc0] sm:$0xff]   ;;  %v2220_v31 = vld [vmem:[%s3274_s0 + $0x2c] ss:$16 sps:$4 sm:$0xff]   ;;  %v2222_v34 = vld [vmem:[%s3274_s0 + $0x28] ss:$16 sps:$4 sm:$0xff]  }
   0xc   :  { %1958 = vmatpush3.bf16.msra.mxu0 %v2444_v9  ;;  %484 = vmatprep.subr.bf16.mxu1 %v2371_v0  ;;  %v2217_v29 = vld [vmem:[%s3274_s0 + $0x24] ss:$16 sps:$4 sm:$0xff]   ;;  %v2219_v32 = vld [vmem:[%s3274_s0 + $0x20] ss:$16 sps:$4 sm:$0xff]   ;;  %v2226_v35 = vld [vmem:[%s3274_s0 + $0x4c] ss:$16 sps:$4 sm:$0xff]  }
   0xd   :  { %1959 = vmatprep.subr.bf16.mxu0 %v2450_v10  ;;  %v2223_v33 = vld [vmem:[%s3274_s0 + $0x44] ss:$16 sps:$4 sm:$0xff]   ;;  %v2225_v36 = vld [vmem:[%s3274_s0 + $0x40] ss:$16 sps:$4 sm:$0xff]   ;;  %v2228_v38 = vld [vmem:[%s3274_s0 + $0x48] ss:$16 sps:$4 sm:$0xff]  }
   0xe   :  { %v2229_v37 = vld [vmem:[%s3274_s0 + $0x64] ss:$16 sps:$4 sm:$0xff]   ;;  %v2232_v39 = vld [vmem:[%s3274_s0 + $0x6c] ss:$16 sps:$4 sm:$0xff]   ;;  %v2231_v40 = vld [vmem:[%s3274_s0 + $0x60] ss:$16 sps:$4 sm:$0xff]  }
   0xf   :  { %485 = vmatpush1.bf16.msra.mxu1 %v2456_v11  ;;  %v2235_v41 = vld [vmem:[%s3274_s0 + $0x84] ss:$16 sps:$4 sm:$0xff]   ;;  %v2234_v42 = vld [vmem:[%s3274_s0 + $0x68] ss:$16 sps:$4 sm:$0xff]   ;;  %v2238_v43 = vld [vmem:[%s3274_s0 + $0x8c] ss:$16 sps:$4 sm:$0xff]  }
  0x10   :  { %1960 = vmatpush3.bf16.msra.mxu0 %v2463_v12  ;;  %486 = vmatprep.subr.bf16.mxu1 %v2371_v0  ;;  %v2237_v44 = vld [vmem:[%s3274_s0 + $0x80] ss:$16 sps:$4 sm:$0xff]   ;;  %v2241_v45 = vld [vmem:[%s3274_s0 + $0xa4] ss:$16 sps:$4 sm:$0xff]   ;;  %v2240_v46 = vld [vmem:[%s3274_s0 + $0x88] ss:$16 sps:$4 sm:$0xff]  }
  0x11   :  { %1961 = vmatprep.subr.bf16.mxu0 %v2469_v13  ;;  %v2244_v47 = vld [vmem:[%s3274_s0 + $0xac] ss:$16 sps:$4 sm:$0xff]   ;;  %v89_v48 = vld [vmem:[%s3274_s0 + $0xc0] sm:$0xff]  ;;  %v2246_v52 = vld [vmem:[%s3274_s0 + $0xa8] ss:$16 sps:$4 sm:$0xff]  }
  0x12   :  { %v2243_v49 = vld [vmem:[%s3274_s0 + $0xa0] ss:$16 sps:$4 sm:$0xff]   ;;  %v1734_v50 = vcombine.high %v89_v48, %v89_v48  ;;  %v90_v51 = vld [vmem:[%s3274_s0 + $0xc8] sm:$0xff]  ;;  %v2253_v54 = vld [vmem:[%s3274_s0 + $0xd4] ss:$16 sps:$4 sm:$0xff]   ;;  %v1733_v55 = vcombine.low %v89_v48, %v89_v48 }
  0x13   :  { %487 = vmatpush1.bf16.msra.mxu1 %v2475_v14  ;;  %v1736_v53 = vcombine.high %v90_v51, %v90_v51  ;;  %v1735_v56 = vcombine.low %v90_v51, %v90_v51  ;;  %v2256_v57 = vld [vmem:[%s3274_s0 + $0xdc] ss:$16 sps:$4 sm:$0xff]   ;;  %v2251_v58 = vld [vmem:[%s3274_s0 + $0xd0] ss:$16 sps:$4 sm:$0xff]   ;;  %v2257_v59 = vld [vmem:[%s3274_s0 + $0xf4] ss:$16 sps:$4 sm:$0xff]  }
  0x14   :  { %1962 = vmatpush3.bf16.msra.mxu0 %v2482_v15  ;;  %488 = vmatprep.subr.bf16.mxu1 %v2371_v0  ;;  %v2254_v60 = vld [vmem:[%s3274_s0 + $0xd8] ss:$16 sps:$4 sm:$0xff]   ;;  %v2260_v61 = vld [vmem:[%s3274_s0 + $0xfc] ss:$16 sps:$4 sm:$0xff]   ;;  %v2259_v62 = vld [vmem:[%s3274_s0 + $0xf0] ss:$16 sps:$4 sm:$0xff]  }
  0x15   :  { %1963 = vmatprep.subr.bf16.mxu0 %v2488_v16  ;;  %v2263_v63 = vld [vmem:[%s3274_s0 + $0x114] ss:$16 sps:$4 sm:$0xff]   ;;  %v2262_v23 = vld [vmem:[%s3274_s0 + $0xf8] ss:$16 sps:$4 sm:$0xff]   ;;  %v2266_v25 = vld [vmem:[%s3274_s0 + $0x11c] ss:$16 sps:$4 sm:$0xff]  }
  0x16   :  { %v2296_v48 = vld [vmem:[%s3274_s0 + $0x1ac] ss:$16 sps:$4 sm:$0xff]   ;;  %v2294_v51 = vld [vmem:[%s3274_s0 + $0x1a8] ss:$16 sps:$4 sm:$0xff]  }
  0x17   :  { %489 = vmatpush1.bf16.msra.mxu1 %v2494_v17 }
  0x18   :  { %1964 = vmatpush3.bf16.msra.mxu0 %v2501_v18  ;;  %490 = vmatprep.subr.bf16.mxu1 %v2371_v0 }
  0x19   :  { %1965 = vmatprep.subr.bf16.mxu0 %v2507_v19 }
  0x1b   :  { %491 = vmatpush1.bf16.msra.mxu1 %v2512_v20 }
  0x1c   :  { %1966 = vmatpush3.bf16.msra.mxu0 %v2518_v21  ;;  %492 = vmatprep.subr.bf16.mxu1 %v2371_v0 }
  0x1d   :  { %1967 = vmatprep.subr.bf16.mxu0 %v2525_v22 }
  0x1f   :  { %493 = vmatpush1.bf16.msra.mxu1 %v2535_v24 }
  0x20   :  { %1968 = vmatpush3.bf16.msra.mxu0 %v2545_v26  ;;  %508 = vmatprep.subr.bf16.mxu1 %v2371_v0 }
  0x21   :  { %2011 = vmatprep.subr.bf16.mxu0 %v2396_v1 }
  0x23   :  { %423 = vmatmul.mubr.bf16.vlgmr.msra.gmra.mxu0 %v2210_v27  ;;  %509 = vmatpush2.bf16.msra.mxu1 %v2556_v28  ;;  %v2265_v27 = vld [vmem:[%s3274_s0 + $0x110] ss:$16 sps:$4 sm:$0xff]  }
  0x24   :  { %2012 = vmatpush3.bf16.msra.mxu0 %v2407_v3  ;;  %829 = vmatprep.subr.bf16.mxu1 %v2371_v0 }
  0x25   :  { %430 = vmatprep.mubr.bf16.mxu0 %v2217_v29  ;;  %2013 = vmatprep.subr.bf16.mxu0 %v2413_v4  ;;  %v2269_v29 = vld [vmem:[%s3274_s0 + $0x134] ss:$16 sps:$4 sm:$0xff]  }
  0x26   :  { %511 = vmatmul.mubr.bf16.vlgmr.msra.gmra.mxu1 %v2214_v30  ;;  %v2268_v30 = vld [vmem:[%s3274_s0 + $0x118] ss:$16 sps:$4 sm:$0xff]  }
  0x27   :  { %830 = vmatpush1.bf16.msra.mxu1 %v2401_v2  ;;  %1763 = vmatprep.mubr.msk.bf16.mxu1 %vm368_vm0, %v2220_v31  ;;  %v2272_v31 = vld [vmem:[%s3274_s0 + $0x13c] ss:$16 sps:$4 sm:$0xff]  }
  0x28   :  { %2014 = vmatpush3.bf16.msra.mxu0 %v2426_v6  ;;  %831 = vmatprep.subr.bf16.mxu1 %v2371_v0 }
  0x29   :  { %2015 = vmatprep.subr.bf16.mxu0 %v2431_v7 }
  0x2b   :  { %431 = vmatmul.mubr.bf16.gmra.mxu0 %v2219_v32  ;;  %832 = vmatpush1.bf16.msra.mxu1 %v2420_v5  ;;  %v2271_v32 = vld [vmem:[%s3274_s0 + $0x130] ss:$16 sps:$4 sm:$0xff]  }
  0x2c   :  { %438 = vmatprep.mubr.bf16.mxu0 %v2223_v33  ;;  %2016 = vmatpush3.bf16.msra.mxu0 %v2444_v9  ;;  %v2275_v33 = vld [vmem:[%s3274_s0 + $0x154] ss:$16 sps:$4 sm:$0xff]  }
  0x2d   :  { %833 = vmatprep.subr.bf16.mxu1 %v2371_v0  ;;  %2017 = vmatprep.subr.bf16.mxu0 %v2450_v10 }
  0x2e   :  { %519 = vmatmul.mubr.bf16.gmra.mxu1 %v2222_v34  ;;  %v2274_v34 = vld [vmem:[%s3274_s0 + $0x138] ss:$16 sps:$4 sm:$0xff]  }
  0x2f   :  { %1764 = vmatprep.mubr.msk.bf16.mxu1 %vm368_vm0, %v2226_v35  ;;  %834 = vmatpush1.bf16.msra.mxu1 %v2437_v8  ;;  %v2278_v35 = vld [vmem:[%s3274_s0 + $0x15c] ss:$16 sps:$4 sm:$0xff]  }
  0x30   :  { %2018 = vmatpush3.bf16.msra.mxu0 %v2463_v12  ;;  %835 = vmatprep.subr.bf16.mxu1 %v2371_v0 }
  0x31   :  { %2019 = vmatprep.subr.bf16.mxu0 %v2469_v13 }
  0x33   :  { %439 = vmatmul.mubr.bf16.gmra.mxu0 %v2225_v36  ;;  %836 = vmatpush1.bf16.msra.mxu1 %v2456_v11  ;;  %v2277_v36 = vld [vmem:[%s3274_s0 + $0x150] ss:$16 sps:$4 sm:$0xff]  }
  0x34   :  { %446 = vmatprep.mubr.bf16.mxu0 %v2229_v37  ;;  %2020 = vmatpush3.bf16.msra.mxu0 %v2482_v15  ;;  %v2281_v37 = vld [vmem:[%s3274_s0 + $0x174] ss:$16 sps:$4 sm:$0xff]  }
  0x35   :  { %837 = vmatprep.subr.bf16.mxu1 %v2371_v0  ;;  %2021 = vmatprep.subr.bf16.mxu0 %v2488_v16 }
  0x36   :  { %527 = vmatmul.mubr.bf16.gmra.mxu1 %v2228_v38  ;;  %v2280_v38 = vld [vmem:[%s3274_s0 + $0x158] ss:$16 sps:$4 sm:$0xff]  }
  0x37   :  { %1765 = vmatprep.mubr.msk.bf16.mxu1 %vm368_vm0, %v2232_v39  ;;  %838 = vmatpush1.bf16.msra.mxu1 %v2475_v14  ;;  %v2284_v39 = vld [vmem:[%s3274_s0 + $0x17c] ss:$16 sps:$4 sm:$0xff]  }
  0x38   :  { %2022 = vmatpush3.bf16.msra.mxu0 %v2501_v18  ;;  %839 = vmatprep.subr.bf16.mxu1 %v2371_v0 }
  0x39   :  { %2023 = vmatprep.subr.bf16.mxu0 %v2507_v19 }
  0x3b   :  { %447 = vmatmul.mubr.bf16.gmra.mxu0 %v2231_v40  ;;  %840 = vmatpush1.bf16.msra.mxu1 %v2494_v17  ;;  %v1793_v40 = vld [vmem:[%s3274_s0 + $0x190] sm:$0xff] }
  0x3c   :  { %454 = vmatprep.mubr.bf16.mxu0 %v2235_v41  ;;  %841 = vmatprep.subr.bf16.mxu1 %v2371_v0  ;;  %v2283_v41 = vld [vmem:[%s3274_s0 + $0x170] ss:$16 sps:$4 sm:$0xff]  }
  0x3d   :  { %2024 = vmatpush3.bf16.msra.mxu0 %v2518_v21 }
  0x3e   :  { %535 = vmatmul.mubr.bf16.gmra.mxu1 %v2234_v42  ;;  %2025 = vmatprep.subr.bf16.mxu0 %v2525_v22  ;;  %v1794_v42 = vld [vmem:[%s3274_s0 + $0x198] sm:$0xff] }
  0x3f   :  { %1766 = vmatprep.mubr.msk.bf16.mxu1 %vm368_vm0, %v2238_v43  ;;  %842 = vmatpush1.bf16.msra.mxu1 %v2512_v20  ;;  %v2286_v43 = vld [vmem:[%s3274_s0 + $0x178] ss:$16 sps:$4 sm:$0xff]  }
  0x40   :  { %843 = vmatprep.subr.bf16.mxu1 %v2371_v0 }
  0x41   :  { %2026 = vmatpush3.bf16.msra.mxu0 %v2545_v26 }
  0x42   :  { %2069 = vmatprep.subr.bf16.mxu0 %v2396_v1 }
  0x43   :  { %455 = vmatmul.mubr.bf16.gmra.mxu0 %v2237_v44  ;;  %844 = vmatpush1.bf16.msra.mxu1 %v2535_v24  ;;  %v1822_v44 = vcombine.high %v1794_v42, %v1794_v42 }
  0x44   :  { %462 = vmatprep.mubr.bf16.mxu0 %v2241_v45  ;;  %859 = vmatprep.subr.bf16.mxu1 %v2371_v0  ;;  %v1819_v45 = vcombine.low %v1793_v40, %v1793_v40 }
  0x46   :  { %543 = vmatmul.mubr.bf16.gmra.mxu1 %v2240_v46  ;;  %v2293_v46 = vld [vmem:[%s3274_s0 + $0x1a4] ss:$16 sps:$4 sm:$0xff]  }
  0x47   :  { %1767 = vmatprep.mubr.msk.bf16.mxu1 %vm368_vm0, %v2244_v47  ;;  %860 = vmatpush2.bf16.msra.mxu1 %v2556_v28  ;;  %v1821_v47 = vcombine.low %v1794_v42, %v1794_v42 }
  0x48   :  { %1193 = vmatprep.subr.bf16.mxu1 %v2371_v0 }
  0x4b   :  { %463 = vmatmul.mubr.bf16.gmra.mxu0 %v2243_v49  ;;  %v2291_v49 = vld [vmem:[%s3274_s0 + $0x1a0] ss:$16 sps:$4 sm:$0xff]  }
  0x4c   :  { %470 = vmatprep.mubr.bf16.mxu0 %v1734_v50  ;;  %v2297_v50 = vld [vmem:[%s3274_s0 + $0x1c4] ss:$16 sps:$4 sm:$0xff]  }
  0x4e   :  { %551 = vmatmul.mubr.bf16.gmra.mxu1 %v2246_v52  ;;  %v2300_v52 = vld [vmem:[%s3274_s0 + $0x1cc] ss:$16 sps:$4 sm:$0xff]  }
  0x4f   :  { %1768 = vmatprep.mubr.msk.bf16.mxu1 %vm368_vm0, %v1736_v53  ;;  %v2299_v53 = vld [vmem:[%s3274_s0 + $0x1c0] ss:$16 sps:$4 sm:$0xff]  }
  0x53   :  { %471 = vmatmul.mubr.bf16.gmra.mxu0 %v1733_v55  ;;  %v2337_v55 = vld [vmem:[%s3274_s0 + $0x294] ss:$16 sps:$4 sm:$0xff]  }
  0x54   :  { %773 = vmatprep.mubr.bf16.mxu0 %v2253_v54  ;;  %v2331_v54 = vld [vmem:[%s3274_s0 + $0x270] ss:$16 sps:$4 sm:$0xff]  }
  0x56   :  { %559 = vmatmul.mubr.bf16.gmra.mxu1 %v1735_v56  ;;  %v2334_v56 = vld [vmem:[%s3274_s0 + $0x278] ss:$16 sps:$4 sm:$0xff]  }
  0x57   :  { %1823 = vmatprep.mubr.msk.bf16.mxu1 %vm368_vm0, %v2256_v57  ;;  %v2340_v57 = vld [vmem:[%s3274_s0 + $0x29c] ss:$16 sps:$4 sm:$0xff]  }
  0x5b   :  { %774 = vmatmul.mubr.bf16.vlgmr.msra.gmra.mxu0 %v2251_v58  ;;  %v2339_v58 = vld [vmem:[%s3274_s0 + $0x290] ss:$16 sps:$4 sm:$0xff]  }
  0x5c   :  { %2070 = vmatpush3.bf16.msra.mxu0 %v2407_v3  ;;  %781 = vmatprep.mubr.bf16.mxu0 %v2257_v59  ;;  %v2343_v59 = vld [vmem:[%s3274_s0 + $0x2b4] ss:$16 sps:$4 sm:$0xff]  }
  0x5d   :  { %2071 = vmatprep.subr.bf16.mxu0 %v2413_v4 }
  0x5e   :  { %862 = vmatmul.mubr.bf16.vlgmr.msra.gmra.mxu1 %v2254_v60  ;;  %v2342_v60 = vld [vmem:[%s3274_s0 + $0x298] ss:$16 sps:$4 sm:$0xff]  }
  0x5f   :  { %1194 = vmatpush1.bf16.msra.mxu1 %v2401_v2  ;;  %1824 = vmatprep.mubr.msk.bf16.mxu1 %vm368_vm0, %v2260_v61  ;;  %v2346_v61 = vld [vmem:[%s3274_s0 + $0x2bc] ss:$16 sps:$4 sm:$0xff]  }
  0x60   :  { %2072 = vmatpush3.bf16.msra.mxu0 %v2426_v6  ;;  %1195 = vmatprep.subr.bf16.mxu1 %v2371_v0 }
  0x61   :  { %2073 = vmatprep.subr.bf16.mxu0 %v2431_v7 }
  0x63   :  { %782 = vmatmul.mubr.bf16.gmra.mxu0 %v2259_v62  ;;  %1196 = vmatpush1.bf16.msra.mxu1 %v2420_v5  ;;  %v2345_v62 = vld [vmem:[%s3274_s0 + $0x2b0] ss:$16 sps:$4 sm:$0xff]  }
  0x64   :  { %789 = vmatprep.mubr.bf16.mxu0 %v2263_v63  ;;  %2074 = vmatpush3.bf16.msra.mxu0 %v2444_v9  ;;  %v2349_v63 = vld [vmem:[%s3274_s0 + $0x2d4] ss:$16 sps:$4 sm:$0xff]  }
  0x65   :  { %1197 = vmatprep.subr.bf16.mxu1 %v2371_v0  ;;  %2075 = vmatprep.subr.bf16.mxu0 %v2450_v10 }
  0x66   :  { %870 = vmatmul.mubr.bf16.gmra.mxu1 %v2262_v23  ;;  %v2348_v23 = vld [vmem:[%s3274_s0 + $0x2b8] ss:$16 sps:$4 sm:$0xff]  }
  0x67   :  { %1825 = vmatprep.mubr.msk.bf16.mxu1 %vm368_vm0, %v2266_v25  ;;  %1198 = vmatpush1.bf16.msra.mxu1 %v2437_v8  ;;  %v2352_v25 = vld [vmem:[%s3274_s0 + $0x2dc] ss:$16 sps:$4 sm:$0xff]  }
  0x68   :  { %2076 = vmatpush3.bf16.msra.mxu0 %v2463_v12  ;;  %1199 = vmatprep.subr.bf16.mxu1 %v2371_v0 }
  0x69   :  { %2077 = vmatprep.subr.bf16.mxu0 %v2469_v13 }
  0x6b   :  { %790 = vmatmul.mubr.bf16.gmra.mxu0 %v2265_v27  ;;  %1200 = vmatpush1.bf16.msra.mxu1 %v2456_v11  ;;  %v2351_v27 = vld [vmem:[%s3274_s0 + $0x2d0] ss:$16 sps:$4 sm:$0xff]  }
  0x6c   :  { %797 = vmatprep.mubr.bf16.mxu0 %v2269_v29  ;;  %2078 = vmatpush3.bf16.msra.mxu0 %v2482_v15  ;;  %v2355_v29 = vld [vmem:[%s3274_s0 + $0x2f4] ss:$16 sps:$4 sm:$0xff]  }
  0x6d   :  { %1201 = vmatprep.subr.bf16.mxu1 %v2371_v0  ;;  %2079 = vmatprep.subr.bf16.mxu0 %v2488_v16 }
  0x6e   :  { %878 = vmatmul.mubr.bf16.gmra.mxu1 %v2268_v30  ;;  %v2354_v30 = vld [vmem:[%s3274_s0 + $0x2d8] ss:$16 sps:$4 sm:$0xff]  }
  0x6f   :  { %1826 = vmatprep.mubr.msk.bf16.mxu1 %vm368_vm0, %v2272_v31  ;;  %1202 = vmatpush1.bf16.msra.mxu1 %v2475_v14 }
  0x70   :  { %2080 = vmatpush3.bf16.msra.mxu0 %v2501_v18  ;;  %1203 = vmatprep.subr.bf16.mxu1 %v2371_v0 }
  0x71   :  { %2081 = vmatprep.subr.bf16.mxu0 %v2507_v19 }
  0x73   :  { %798 = vmatmul.mubr.bf16.gmra.mxu0 %v2271_v32  ;;  %1204 = vmatpush1.bf16.msra.mxu1 %v2494_v17  ;;  %v2358_v32 = vld [vmem:[%s3274_s0 + $0x2fc] ss:$16 sps:$4 sm:$0xff]  }
  0x74   :  { %805 = vmatprep.mubr.bf16.mxu0 %v2275_v33  ;;  %1205 = vmatprep.subr.bf16.mxu1 %v2371_v0 }
  0x75   :  { %2082 = vmatpush3.bf16.msra.mxu0 %v2518_v21 }
  0x76   :  { %886 = vmatmul.mubr.bf16.gmra.mxu1 %v2274_v34  ;;  %2083 = vmatprep.subr.bf16.mxu0 %v2525_v22 }
  0x77   :  { %1827 = vmatprep.mubr.msk.bf16.mxu1 %vm368_vm0, %v2278_v35  ;;  %1206 = vmatpush1.bf16.msra.mxu1 %v2512_v20 }
  0x78   :  { %1207 = vmatprep.subr.bf16.mxu1 %v2371_v0 }
  0x79   :  { %2084 = vmatpush3.bf16.msra.mxu0 %v2545_v26 }
  0x7a   :  { %2127 = vmatprep.subr.bf16.mxu0 %v2396_v1  ;;  %v1820_v1 = vcombine.high %v1793_v40, %v1793_v40  ;;  %v2361_v40 = vld [vmem:[%s3274_s0 + $0x314] ss:$16 sps:$4 sm:$0xff]  }
  0x7b   :  { %806 = vmatmul.mubr.bf16.gmra.mxu0 %v2277_v36  ;;  %1208 = vmatpush1.bf16.msra.mxu1 %v2535_v24 }
  0x7c   :  { %813 = vmatprep.mubr.bf16.mxu0 %v2281_v37  ;;  %1223 = vmatprep.subr.bf16.mxu1 %v2371_v0  ;;  %v2357_v37 = vld [vmem:[%s3274_s0 + $0x2f0] ss:$16 sps:$4 sm:$0xff]  }
  0x7e   :  { %894 = vmatmul.mubr.bf16.gmra.mxu1 %v2280_v38 }
  0x7f   :  { %1828 = vmatprep.mubr.msk.bf16.mxu1 %vm368_vm0, %v2284_v39  ;;  %1224 = vmatpush2.bf16.msra.mxu1 %v2556_v28 }
  0x80   :  { %1557 = vmatprep.subr.bf16.mxu1 %v2371_v0 }
  0x83   :  { %814 = vmatmul.mubr.bf16.gmra.mxu0 %v2283_v41 }
  0x84   :  { %821 = vmatprep.mubr.bf16.mxu0 %v1820_v1 }
  0x86   :  { %902 = vmatmul.mubr.bf16.gmra.mxu1 %v2286_v43  ;;  %v2360_v43 = vld [vmem:[%s3274_s0 + $0x2f8] ss:$16 sps:$4 sm:$0xff]  }
  0x87   :  { %1829 = vmatprep.mubr.msk.bf16.mxu1 %vm368_vm0, %v1822_v44 }
  0x8b   :  { %822 = vmatmul.mubr.bf16.gmra.mxu0 %v1819_v45  ;;  %v2364_v45 = vld [vmem:[%s3274_s0 + $0x31c] ss:$16 sps:$4 sm:$0xff]  }
  0x8c   :  { %1137 = vmatprep.mubr.bf16.mxu0 %v2293_v46 }
  0x8e   :  { %910 = vmatmul.mubr.bf16.gmra.mxu1 %v1821_v47 }
  0x8f   :  { %1884 = vmatprep.mubr.msk.bf16.mxu1 %vm368_vm0, %v2296_v48 }
  0x93   :  { %1138 = vmatmul.mubr.bf16.vlgmr.msra.gmra.mxu0 %v2291_v49  ;;  %v1915_v49 = vld [vmem:[%s3274_s0 + $0x330] sm:$0xff] }
  0x94   :  { %2128 = vmatpush3.bf16.msra.mxu0 %v2407_v3  ;;  %1145 = vmatprep.mubr.bf16.mxu0 %v2297_v50  ;;  %v2303_v3 = vld [vmem:[%s3274_s0 + $0x1e4] ss:$16 sps:$4 sm:$0xff]  }
  0x95   :  { %2129 = vmatprep.subr.bf16.mxu0 %v2413_v4  ;;  %v2306_v4 = vld [vmem:[%s3274_s0 + $0x1ec] ss:$16 sps:$4 sm:$0xff]  }
  0x96   :  { %1226 = vmatmul.mubr.bf16.vlgmr.msra.gmra.mxu1 %v2294_v51 }
  0x97   :  { %1558 = vmatpush1.bf16.msra.mxu1 %v2401_v2  ;;  %1885 = vmatprep.mubr.msk.bf16.mxu1 %vm368_vm0, %v2300_v52  ;;  %v2302_v2 = vld [vmem:[%s3274_s0 + $0x1c8] ss:$16 sps:$4 sm:$0xff]  }
  0x98   :  { %2130 = vmatpush3.bf16.msra.mxu0 %v2426_v6  ;;  %1559 = vmatprep.subr.bf16.mxu1 %v2371_v0  ;;  %v2305_v6 = vld [vmem:[%s3274_s0 + $0x1e0] ss:$16 sps:$4 sm:$0xff]  }
  0x99   :  { %2131 = vmatprep.subr.bf16.mxu0 %v2431_v7  ;;  %v2308_v7 = vld [vmem:[%s3274_s0 + $0x1e8] ss:$16 sps:$4 sm:$0xff]  }
  0x9b   :  { %1146 = vmatmul.mubr.bf16.gmra.mxu0 %v2299_v53  ;;  %1560 = vmatpush1.bf16.msra.mxu1 %v2420_v5  ;;  %v2309_v5 = vld [vmem:[%s3274_s0 + $0x204] ss:$16 sps:$4 sm:$0xff]   ;;  %v2363_v53 = vld [vmem:[%s3274_s0 + $0x310] ss:$16 sps:$4 sm:$0xff]  }
  0x9c   :  { %1153 = vmatprep.mubr.bf16.mxu0 %v2303_v3  ;;  %2132 = vmatpush3.bf16.msra.mxu0 %v2444_v9  ;;  %v2311_v9 = vld [vmem:[%s3274_s0 + $0x200] ss:$16 sps:$4 sm:$0xff]  }
  0x9d   :  { %1561 = vmatprep.subr.bf16.mxu1 %v2371_v0  ;;  %2133 = vmatprep.subr.bf16.mxu0 %v2450_v10  ;;  %v2315_v10 = vld [vmem:[%s3274_s0 + $0x224] ss:$16 sps:$4 sm:$0xff]  }
  0x9e   :  { %1234 = vmatmul.mubr.bf16.gmra.mxu1 %v2302_v2 }
  0x9f   :  { %1886 = vmatprep.mubr.msk.bf16.mxu1 %vm368_vm0, %v2306_v4  ;;  %1562 = vmatpush1.bf16.msra.mxu1 %v2437_v8  ;;  %v2312_v8 = vld [vmem:[%s3274_s0 + $0x20c] ss:$16 sps:$4 sm:$0xff]   ;;  %v1942_v4 = vcombine.high %v1915_v49, %v1915_v49 }
  0xa0   :  { %2134 = vmatpush3.bf16.msra.mxu0 %v2463_v12  ;;  %1563 = vmatprep.subr.bf16.mxu1 %v2371_v0  ;;  %v2318_v12 = vld [vmem:[%s3274_s0 + $0x22c] ss:$16 sps:$4 sm:$0xff]  }
  0xa1   :  { %2135 = vmatprep.subr.bf16.mxu0 %v2469_v13  ;;  %v2317_v13 = vld [vmem:[%s3274_s0 + $0x220] ss:$16 sps:$4 sm:$0xff]  }
  0xa3   :  { %1154 = vmatmul.mubr.bf16.gmra.mxu0 %v2305_v6  ;;  %1564 = vmatpush1.bf16.msra.mxu1 %v2456_v11  ;;  %v2314_v11 = vld [vmem:[%s3274_s0 + $0x208] ss:$16 sps:$4 sm:$0xff]  }
  0xa4   :  { %1161 = vmatprep.mubr.bf16.mxu0 %v2309_v5  ;;  %2136 = vmatpush3.bf16.msra.mxu0 %v2482_v15  ;;  %v2320_v15 = vld [vmem:[%s3274_s0 + $0x228] ss:$16 sps:$4 sm:$0xff]  }
  0xa5   :  { %1565 = vmatprep.subr.bf16.mxu1 %v2371_v0  ;;  %2137 = vmatprep.subr.bf16.mxu0 %v2488_v16  ;;  %v2324_v16 = vld [vmem:[%s3274_s0 + $0x24c] ss:$16 sps:$4 sm:$0xff]  }
  0xa6   :  { %1242 = vmatmul.mubr.bf16.gmra.mxu1 %v2308_v7  ;;  %v1916_v6 = vld [vmem:[%s3274_s0 + $0x338] sm:$0xff] }
  0xa7   :  { %1887 = vmatprep.mubr.msk.bf16.mxu1 %vm368_vm0, %v2312_v8  ;;  %1566 = vmatpush1.bf16.msra.mxu1 %v2475_v14  ;;  %v2321_v14 = vld [vmem:[%s3274_s0 + $0x244] ss:$16 sps:$4 sm:$0xff]  }
  0xa8   :  { %2138 = vmatpush3.bf16.msra.mxu0 %v2501_v18  ;;  %1567 = vmatprep.subr.bf16.mxu1 %v2371_v0  ;;  %v2323_v18 = vld [vmem:[%s3274_s0 + $0x240] ss:$16 sps:$4 sm:$0xff]  }
  0xa9   :  { %2139 = vmatprep.subr.bf16.mxu0 %v2507_v19 }
  0xab   :  { %1162 = vmatmul.mubr.bf16.gmra.mxu0 %v2311_v9  ;;  %1568 = vmatpush1.bf16.msra.mxu1 %v2494_v17  ;;  %v1854_v17 = vld [vmem:[%s3274_s0 + $0x260] sm:$0xff]  ;;  %v2366_v9 = vld [vmem:[%s3274_s0 + $0x318] ss:$16 sps:$4 sm:$0xff]  }
  0xac   :  { %1169 = vmatprep.mubr.bf16.mxu0 %v2315_v10  ;;  %1569 = vmatprep.subr.bf16.mxu1 %v2371_v0  ;;  %v1881_v19 = vcombine.high %v1854_v17, %v1854_v17 }
  0xad   :  { %2140 = vmatpush3.bf16.msra.mxu0 %v2518_v21 }
  0xae   :  { %1250 = vmatmul.mubr.bf16.gmra.mxu1 %v2314_v11  ;;  %2141 = vmatprep.subr.bf16.mxu0 %v2525_v22  ;;  %v1880_v22 = vcombine.low %v1854_v17, %v1854_v17  ;;  %v1944_v11 = vcombine.high %v1916_v6, %v1916_v6 }
  0xaf   :  { %1888 = vmatprep.mubr.msk.bf16.mxu1 %vm368_vm0, %v2318_v12  ;;  %1570 = vmatpush1.bf16.msra.mxu1 %v2512_v20  ;;  %v1855_v20 = vld [vmem:[%s3274_s0 + $0x268] sm:$0xff] }
  0xb0   :  { %1571 = vmatprep.subr.bf16.mxu1 %v2371_v0  ;;  %v1883_v21 = vcombine.high %v1855_v20, %v1855_v20 }
  0xb1   :  { %2142 = vmatpush3.bf16.msra.mxu0 %v2545_v26  ;;  %v1882_v26 = vcombine.low %v1855_v20, %v1855_v20 }
  0xb3   :  { %1170 = vmatmul.mubr.bf16.gmra.mxu0 %v2317_v13  ;;  %1572 = vmatpush1.bf16.msra.mxu1 %v2535_v24  ;;  %v2333_v24 = vld [vmem:[%s3274_s0 + $0x274] ss:$16 sps:$4 sm:$0xff]  }
  0xb4   :  { %1177 = vmatprep.mubr.bf16.mxu0 %v2321_v14  ;;  %1587 = vmatprep.subr.bf16.mxu1 %v2371_v0  ;;  %v2326_v0 = vld [vmem:[%s3274_s0 + $0x248] ss:$16 sps:$4 sm:$0xff]  }
  0xb6   :  { %1258 = vmatmul.mubr.bf16.gmra.mxu1 %v2320_v15 }
  0xb7   :  { %1889 = vmatprep.mubr.msk.bf16.mxu1 %vm368_vm0, %v2324_v16  ;;  %1588 = vmatpush2.bf16.msra.mxu1 %v2556_v28  ;;  %v2336_v28 = vld [vmem:[%s3274_s0 + $0x27c] ss:$16 sps:$4 sm:$0xff]  }
  0xbb   :  { %1178 = vmatmul.mubr.bf16.gmra.mxu0 %v2323_v18  ;;  %v1941_v18 = vcombine.low %v1915_v49, %v1915_v49 }
  0xbc   :  { %1185 = vmatprep.mubr.bf16.mxu0 %v1881_v19 }
  0xbe   :  { %1266 = vmatmul.mubr.bf16.gmra.mxu1 %v2326_v0 }
  0xbf   :  { %1890 = vmatprep.mubr.msk.bf16.mxu1 %vm368_vm0, %v1883_v21 }
  0xc3   :  { %1186 = vmatmul.mubr.bf16.gmra.mxu0 %v1880_v22 }
  0xc4   :  { %1501 = vmatprep.mubr.bf16.mxu0 %v2333_v24  ;;  %v1943_v24 = vcombine.low %v1916_v6, %v1916_v6 }
  0xc6   :  { %1274 = vmatmul.mubr.bf16.gmra.mxu1 %v1882_v26 }
  0xc7   :  { %1945 = vmatprep.mubr.msk.bf16.mxu1 %vm368_vm0, %v2336_v28 }
  0xcb   :  { %1502 = vmatmul.mubr.bf16.vlgmr.msra.gmra.mxu0 %v2331_v54 }
  0xcc   :  { %1509 = vmatprep.mubr.bf16.mxu0 %v2337_v55 }
  0xce   :  { %1590 = vmatmul.mubr.bf16.vlgmr.msra.gmra.mxu1 %v2334_v56 }
  0xcf   :  { %1946 = vmatprep.mubr.msk.bf16.mxu1 %vm368_vm0, %v2340_v57 }
  0xd3   :  { %1510 = vmatmul.mubr.bf16.gmra.mxu0 %v2339_v58 }
  0xd4   :  { %1517 = vmatprep.mubr.bf16.mxu0 %v2343_v59 }
  0xd6   :  { %1598 = vmatmul.mubr.bf16.gmra.mxu1 %v2342_v60 }
  0xd7   :  { %1947 = vmatprep.mubr.msk.bf16.mxu1 %vm368_vm0, %v2346_v61 }
  0xdb   :  { %1518 = vmatmul.mubr.bf16.gmra.mxu0 %v2345_v62 }
  0xdc   :  { %1525 = vmatprep.mubr.bf16.mxu0 %v2349_v63 }
  0xde   :  { %1606 = vmatmul.mubr.bf16.gmra.mxu1 %v2348_v23 }
  0xdf   :  { %1948 = vmatprep.mubr.msk.bf16.mxu1 %vm368_vm0, %v2352_v25 }
  0xe3   :  { %v1969_v31 = vpop.f32.mrf.mxu0  ;;  %1526 = vmatmul.mubr.bf16.gmra.mxu0 %v2351_v27 }
  0xe4   :  { %1533 = vmatprep.mubr.bf16.mxu0 %v2355_v29 }
  0xe5   :  { %v1970_v33 = vpop.f32.mrf.mxu0 }
  0xe6   :  { %v1971_v34 = vadd.f32 %v1970_v33, %v1969_v31  ;;  %v512_v35 = vpop.f32.mrf.mxu1  ;;  %1614 = vmatmul.mubr.bf16.gmra.mxu1 %v2354_v30 }
  0xe7   :  { %v1972_v36 = vpop.f32.mrf.mxu0  ;;  %1949 = vmatprep.mubr.msk.bf16.mxu1 %vm368_vm0, %v2358_v32 }
  0xe8   :  { %v2970_v38 = vadd.f32 %v1971_v34, %v512_v35  ;;  %v514_v39 = vpop.f32.mrf.mxu1 }
  0xe9   :  { %v1973_v41 = vpop.f32.mrf.mxu0 }
  0xea   :  { %v1974_v1 = vadd.f32 %v1973_v41, %v1972_v36  ;;  %v515_v42 = vpop.f32.mrf.mxu1 }
  0xeb   :  { %v1975_v44 = vpop.f32.mrf.mxu0  ;;  %1534 = vmatmul.mubr.bf16.gmra.mxu0 %v2357_v37 }
  0xec   :  { %v2981_v46 = vadd.f32 %v1974_v1, %v515_v42  ;;  %v517_v47 = vpop.f32.mrf.mxu1  ;;  %1541 = vmatprep.mubr.bf16.mxu0 %v2361_v40 }
  0xed   :  { %v1976_v48 = vpop.f32.mrf.mxu0 }
  0xee   :  { %v1977_v50 = vadd.f32 %v1976_v48, %v1975_v44  ;;  %v520_v51 = vpop.f32.mrf.mxu1  ;;  %1622 = vmatmul.mubr.bf16.gmra.mxu1 %v2360_v43 }
  0xef   :  { %v1978_v52 = vpop.f32.mrf.mxu0  ;;  %1950 = vmatprep.mubr.msk.bf16.mxu1 %vm368_vm0, %v2364_v45 }
  0xf0   :  { %v2990_v3 = vadd.f32 %v1977_v50, %v520_v51  ;;  %v522_v2 = vpop.f32.mrf.mxu1 }
  0xf1   :  { %v1979_v5 = vpop.f32.mrf.mxu0 }
  0xf2   :  { %v1980_v7 = vadd.f32 %v1979_v5, %v1978_v52  ;;  %v523_v8 = vpop.f32.mrf.mxu1 }
  0xf3   :  { %v1981_v10 = vpop.f32.mrf.mxu0  ;;  %1542 = vmatmul.mubr.bf16.gmra.mxu0 %v2363_v53 }
  0xf4   :  { %v2998_v12 = vadd.f32 %v1980_v7, %v523_v8  ;;  %v525_v13 = vpop.f32.mrf.mxu1  ;;  %1549 = vmatprep.mubr.bf16.mxu0 %v1942_v4 }
  0xf5   :  { %v1982_v14 = vpop.f32.mrf.mxu0 }
  0xf6   :  { %v1983_v15 = vadd.f32 %v1982_v14, %v1981_v10  ;;  %v528_v16 = vpop.f32.mrf.mxu1  ;;  %1630 = vmatmul.mubr.bf16.gmra.mxu1 %v2366_v9 }
  0xf7   :  { %v1984_v17 = vpop.f32.mrf.mxu0  ;;  %1951 = vmatprep.mubr.msk.bf16.mxu1 %vm368_vm0, %v1944_v11 }
  0xf8   :  { %v3001_v19 = vadd.f32 %v1983_v15, %v528_v16  ;;  %v530_v20 = vpop.f32.mrf.mxu1 }
  0xf9   :  { %v1985_v0 = vpop.f32.mrf.mxu0 }
  0xfa   :  { %v1986_v21 = vadd.f32 %v1985_v0, %v1984_v17  ;;  %v531_v22 = vpop.f32.mrf.mxu1 }
  0xfb   :  { %v1987_v26 = vpop.f32.mrf.mxu0  ;;  %1550 = vmatmul.mubr.bf16.gmra.mxu0 %v1941_v18 }
  0xfc   :  { %v3003_v28 = vadd.f32 %v1986_v21, %v531_v22  ;;  %v533_v54 = vpop.f32.mrf.mxu1 }
  0xfd   :  { %v1988_v55 = vpop.f32.mrf.mxu0 }
  0xfe   :  { %v1989_v56 = vadd.f32 %v1988_v55, %v1987_v26  ;;  %v536_v57 = vpop.f32.mrf.mxu1  ;;  %1638 = vmatmul.mubr.bf16.gmra.mxu1 %v1943_v24 }
  0xff   :  { %v1990_v58 = vpop.f32.mrf.mxu0 }
 0x100   :  { %v3005_v59 = vadd.f32 %v1989_v56, %v536_v57  ;;  %v538_v60 = vpop.f32.mrf.mxu1 }
 0x101   :  { %v1991_v61 = vpop.f32.mrf.mxu0 }
 0x102   :  { %v1992_v62 = vadd.f32 %v1991_v61, %v1990_v58  ;;  %v539_v63 = vpop.f32.mrf.mxu1 }
 0x103   :  { %v1993_v23 = vpop.f32.mrf.mxu0 }
 0x104   :  { %v3007_v25 = vadd.f32 %v1992_v62, %v539_v63  ;;  %v541_v27 = vpop.f32.mrf.mxu1 }
 0x105   :  { %v1994_v29 = vpop.f32.mrf.mxu0 }
 0x106   :  { %v1995_v30 = vadd.f32 %v1994_v29, %v1993_v23  ;;  %v544_v31 = vpop.f32.mrf.mxu1 }
 0x107   :  { %v1996_v32 = vpop.f32.mrf.mxu0 }
 0x108   :  { %v3009_v33 = vadd.f32 %v1995_v30, %v544_v31  ;;  %v546_v34 = vpop.f32.mrf.mxu1 }
 0x109   :  { %v1997_v35 = vpop.f32.mrf.mxu0 }
 0x10a   :  { %3287 = vst [vmem:[#allocation2_spill] sm:$0xff] %v3009_v33  ;;  %v1998_v36 = vadd.f32 %v1997_v35, %v1996_v32  ;;  %v547_v37 = vpop.f32.mrf.mxu1 }
 0x10b   :  { %v1999_v39 = vpop.f32.mrf.mxu0 }
 0x10c   :  { %v3011_v40 = vadd.f32 %v1998_v36, %v547_v37  ;;  %v549_v41 = vpop.f32.mrf.mxu1 }
 0x10d   :  { %v2000_v1 = vpop.f32.mrf.mxu0 }
 0x10e   :  { %3288 = vst [vmem:[#allocation3_spill] sm:$0xff] %v3011_v40  ;;  %v2001_v42 = vadd.f32 %v2000_v1, %v1999_v39  ;;  %v552_v43 = vpop.f32.mrf.mxu1 }
 0x10f   :  { %v2002_v44 = vpop.f32.mrf.mxu0 }
 0x110   :  { %v3013_v45 = vadd.f32 %v2001_v42, %v552_v43  ;;  %v554_v47 = vpop.f32.mrf.mxu1 }
 0x111   :  { %v2003_v48 = vpop.f32.mrf.mxu0 }
 0x112   :  { %3289 = vst [vmem:[#allocation4_spill] sm:$0xff] %v3013_v45  ;;  %v2004_v49 = vadd.f32 %v2003_v48, %v2002_v44  ;;  %v555_v50 = vpop.f32.mrf.mxu1 }
 0x113   :  { %v2005_v51 = vpop.f32.mrf.mxu0 }
 0x114   :  { %v3015_v52 = vadd.f32 %v2004_v49, %v555_v50  ;;  %v557_v53 = vpop.f32.mrf.mxu1 }
 0x115   :  { %v2006_v2 = vpop.f32.mrf.mxu0 }
 0x116   :  { %3290 = vst [vmem:[#allocation5_spill] sm:$0xff] %v3015_v52  ;;  %v2007_v4 = vadd.f32 %v2006_v2, %v2005_v51  ;;  %v560_v6 = vpop.f32.mrf.mxu1 }
 0x117   :  { %v2008_v5 = vpop.f32.mrf.mxu0 }
 0x118   :  { %v3017_v7 = vadd.f32 %v2007_v4, %v560_v6  ;;  %v562_v8 = vpop.f32.mrf.mxu1 }
 0x119   :  { %v2009_v9 = vpop.f32.mrf.mxu0 }
 0x11a   :  { %3291 = vst [vmem:[#allocation6_spill] sm:$0xff] %v3017_v7  ;;  %v563_v10 = vpop.f32.mrf.mxu1 }
 0x11b   :  { %v2027_v11 = vpop.f32.mrf.mxu0 }
 0x11c   :  { %v564_v13 = vpop.f32.mrf.mxu1 }
 0x11d   :  { %v2028_v14 = vpop.f32.mrf.mxu0 }
 0x11e   :  { %v2029_v15 = vadd.f32 %v2028_v14, %v2027_v11  ;;  %v863_v16 = vpop.f32.mrf.mxu1 }
 0x11f   :  { %v2030_v17 = vpop.f32.mrf.mxu0 }
 0x120   :  { %v3019_v18 = vadd.f32 %v2029_v15, %v863_v16  ;;  %v865_v20 = vpop.f32.mrf.mxu1 }
 0x121   :  { %v2031_v0 = vpop.f32.mrf.mxu0 }
 0x122   :  { %v2032_v22 = vadd.f32 %v2031_v0, %v2030_v17  ;;  %v866_v24 = vpop.f32.mrf.mxu1 }
 0x123   :  { %v2033_v26 = vpop.f32.mrf.mxu0 }
 0x124   :  { %v3023_v54 = vadd.f32 %v2032_v22, %v866_v24  ;;  %v868_v55 = vpop.f32.mrf.mxu1 }
 0x125   :  { %v2034_v56 = vpop.f32.mrf.mxu0 }
 0x126   :  { %v2035_v58 = vadd.f32 %v2034_v56, %v2033_v26  ;;  %v871_v60 = vpop.f32.mrf.mxu1 }
 0x127   :  { %v2036_v61 = vpop.f32.mrf.mxu0 }
 0x128   :  { %v3027_v62 = vadd.f32 %v2035_v58, %v871_v60  ;;  %v873_v63 = vpop.f32.mrf.mxu1 }
 0x129   :  { %v2037_v23 = vpop.f32.mrf.mxu0 }
 0x12a   :  { %v2038_v29 = vadd.f32 %v2037_v23, %v2036_v61  ;;  %v874_v30 = vpop.f32.mrf.mxu1 }
 0x12b   :  { %v2039_v31 = vpop.f32.mrf.mxu0 }
 0x12c   :  { %v3031_v32 = vadd.f32 %v2038_v29, %v874_v30  ;;  %v876_v34 = vpop.f32.mrf.mxu1 }
 0x12d   :  { %v2040_v35 = vpop.f32.mrf.mxu0 }
 0x12e   :  { %v2041_v37 = vadd.f32 %v2040_v35, %v2039_v31  ;;  %v879_v39 = vpop.f32.mrf.mxu1 }
 0x12f   :  { %v2042_v41 = vpop.f32.mrf.mxu0 }
 0x130   :  { %v3035_v1 = vadd.f32 %v2041_v37, %v879_v39  ;;  %v881_v42 = vpop.f32.mrf.mxu1 }
 0x131   :  { %v2043_v43 = vpop.f32.mrf.mxu0 }
 0x132   :  { %v2044_v47 = vadd.f32 %v2043_v43, %v2042_v41  ;;  %v882_v48 = vpop.f32.mrf.mxu1 }
 0x133   :  { %v2045_v49 = vpop.f32.mrf.mxu0 }
 0x134   :  { %v3039_v50 = vadd.f32 %v2044_v47, %v882_v48  ;;  %v884_v51 = vpop.f32.mrf.mxu1 }
 0x135   :  { %v2046_v53 = vpop.f32.mrf.mxu0 }
 0x136   :  { %v2047_v4 = vadd.f32 %v2046_v53, %v2045_v49  ;;  %v887_v6 = vpop.f32.mrf.mxu1 }
 0x137   :  { %v2048_v5 = vpop.f32.mrf.mxu0 }
 0x138   :  { %v3043_v8 = vadd.f32 %v2047_v4, %v887_v6  ;;  %v889_v9 = vpop.f32.mrf.mxu1 }
 0x139   :  { %v2049_v10 = vpop.f32.mrf.mxu0 }
 0x13a   :  { %v2050_v13 = vadd.f32 %v2049_v10, %v2048_v5  ;;  %v890_v14 = vpop.f32.mrf.mxu1 }
 0x13b   :  { %v2051_v15 = vpop.f32.mrf.mxu0 }
 0x13c   :  { %v3047_v16 = vadd.f32 %v2050_v13, %v890_v14  ;;  %v892_v17 = vpop.f32.mrf.mxu1 }
 0x13d   :  { %v2052_v20 = vpop.f32.mrf.mxu0 }
 0x13e   :  { %v2053_v22 = vadd.f32 %v2052_v20, %v2051_v15  ;;  %v895_v24 = vpop.f32.mrf.mxu1 }
 0x13f   :  { %v2054_v26 = vpop.f32.mrf.mxu0 }
 0x140   :  { %v3051_v55 = vadd.f32 %v2053_v22, %v895_v24  ;;  %v897_v56 = vpop.f32.mrf.mxu1 }
 0x141   :  { %v2055_v58 = vpop.f32.mrf.mxu0 }
 0x142   :  { %3292 = vst [vmem:[#allocation7_spill] sm:$0xff] %v3051_v55  ;;  %v2056_v61 = vadd.f32 %v2055_v58, %v2054_v26  ;;  %v898_v63 = vpop.f32.mrf.mxu1 }
 0x143   :  { %v2057_v23 = vpop.f32.mrf.mxu0 }
 0x144   :  { %v3055_v29 = vadd.f32 %v2056_v61, %v898_v63  ;;  %v900_v30 = vpop.f32.mrf.mxu1 }
 0x145   :  { %v2058_v31 = vpop.f32.mrf.mxu0 }
 0x146   :  { %3293 = vst [vmem:[#allocation8_spill] sm:$0xff] %v3055_v29  ;;  %v2059_v35 = vadd.f32 %v2058_v31, %v2057_v23  ;;  %v903_v37 = vpop.f32.mrf.mxu1 }
 0x147   :  { %v2060_v39 = vpop.f32.mrf.mxu0 }
 0x148   :  { %v3059_v41 = vadd.f32 %v2059_v35, %v903_v37  ;;  %v905_v42 = vpop.f32.mrf.mxu1 }
 0x149   :  { %v2061_v43 = vpop.f32.mrf.mxu0 }
 0x14a   :  { %3294 = vst [vmem:[#allocation9_spill] sm:$0xff] %v3059_v41  ;;  %v2062_v48 = vadd.f32 %v2061_v43, %v2060_v39  ;;  %v906_v49 = vpop.f32.mrf.mxu1 }
 0x14b   :  { %v2063_v51 = vpop.f32.mrf.mxu0 }
 0x14c   :  { %v3063_v53 = vadd.f32 %v2062_v48, %v906_v49  ;;  %v908_v4 = vpop.f32.mrf.mxu1 }
 0x14d   :  { %v2064_v6 = vpop.f32.mrf.mxu0 }
 0x14e   :  { %3295 = vst [vmem:[#allocation10_spill] sm:$0xff] %v3063_v53  ;;  %v2065_v9 = vadd.f32 %v2064_v6, %v2063_v51  ;;  %v911_v10 = vpop.f32.mrf.mxu1 }
 0x14f   :  { %v2066_v13 = vpop.f32.mrf.mxu0 }
 0x150   :  { %v3067_v14 = vadd.f32 %v2065_v9, %v911_v10  ;;  %v913_v15 = vpop.f32.mrf.mxu1 }
 0x151   :  { %v2067_v17 = vpop.f32.mrf.mxu0 }
 0x152   :  { %3296 = vst [vmem:[#allocation11_spill] sm:$0xff] %v3067_v14  ;;  %v914_v22 = vpop.f32.mrf.mxu1 }
 0x153   :  { %v2085_v24 = vpop.f32.mrf.mxu0 }
 0x154   :  { %v915_v26 = vpop.f32.mrf.mxu1 }
 0x155   :  { %v2086_v56 = vpop.f32.mrf.mxu0 }
 0x156   :  { %v1227_v58 = vpop.f32.mrf.mxu1 }
 0x157   :  { %v2088_v61 = vpop.f32.mrf.mxu0 }
 0x158   :  { %v1229_v63 = vpop.f32.mrf.mxu1 }
 0x159   :  { %v2089_v23 = vpop.f32.mrf.mxu0 }
 0x15a   :  { %v1230_v30 = vpop.f32.mrf.mxu1 }
 0x15b   :  { %v2091_v31 = vpop.f32.mrf.mxu0 }
 0x15c   :  { %v1232_v35 = vpop.f32.mrf.mxu1 }
 0x15d   :  { %v2092_v37 = vpop.f32.mrf.mxu0 }
 0x15e   :  { %v3071_v39 = vpop.f32.mrf.mxu1 }
 0x15f   :  { %v3073_v42 = vpop.f32.mrf.mxu0 }
 0x160   :  { %v1237_v43 = vpop.f32.mrf.mxu1 }
 0x161   :  { %v3075_v48 = vpop.f32.mrf.mxu0 }
 0x162   :  { %v3077_v49 = vpop.f32.mrf.mxu1 }
 0x163   :  { %v3079_v51 = vpop.f32.mrf.mxu0 }
 0x164   :  { %v1240_v4 = vpop.f32.mrf.mxu1 }
 0x165   :  { %v3081_v6 = vpop.f32.mrf.mxu0 }
 0x166   :  { %v3083_v9 = vpop.f32.mrf.mxu1 }
 0x167   :  { %v3085_v10 = vpop.f32.mrf.mxu0 }
 0x168   :  { %v1245_v13 = vpop.f32.mrf.mxu1 }
 0x169   :  { %v3087_v15 = vpop.f32.mrf.mxu0 }
 0x16a   :  { %v3089_v17 = vpop.f32.mrf.mxu1 }
 0x16b   :  { %v3091_v22 = vpop.f32.mrf.mxu0 }
 0x16c   :  { %v1248_v26 = vpop.f32.mrf.mxu1 }
 0x16d   :  { %v3093_v63 = vpop.f32.mrf.mxu0 }
 0x16e   :  { %v3095_v35 = vpop.f32.mrf.mxu1 }
 0x16f   :  { %v3097_v43 = vpop.f32.mrf.mxu0 }
 0x170   :  { %v1253_v4 = vpop.f32.mrf.mxu1 }
 0x171   :  { %v3099_v20 = vpop.f32.mrf.mxu0 }
 0x172   :  { %v3101_v5 = vpop.f32.mrf.mxu1 }
 0x173   :  { %v3103_v47 = vpop.f32.mrf.mxu0 }
 0x174   :  { %v1256_v13 = vpop.f32.mrf.mxu1 }
 0x175   :  { %v3105_v34 = vpop.f32.mrf.mxu0 }
 0x176   :  { %v3107_v60 = vpop.f32.mrf.mxu1 }
 0x177   :  { %v3109_v0 = vpop.f32.mrf.mxu0 }
 0x178   :  { %v1261_v26 = vpop.f32.mrf.mxu1 }
 0x179   :  { %v3111_v11 = vpop.f32.mrf.mxu0 }
 0x17a   :  { %v3113_v2 = vpop.f32.mrf.mxu1 }
 0x17b   :  { %3297 = vst [vmem:[#allocation12_spill] sm:$0xff] %v3113_v2  ;;  %v3115_v44 = vpop.f32.mrf.mxu0 }
 0x17c   :  { %v1264_v4 = vpop.f32.mrf.mxu1 }
 0x17d   :  { %v3117_v36 = vpop.f32.mrf.mxu0  ;;  %v2087_v4 = vadd.f32 %v2086_v56, %v2085_v24 }
 0x17e   :  { %3298 = vst [vmem:[#allocation13_spill] sm:$0xff] %v3117_v36  ;;  %v3119_v27 = vpop.f32.mrf.mxu1 }
 0x17f   :  { %3299 = vst [vmem:[#allocation14_spill] sm:$0xff] %v3119_v27  ;;  %v3121_v57 = vpop.f32.mrf.mxu0  ;;  %v2090_v27 = vadd.f32 %v2089_v23, %v2088_v61 }
 0x180   :  { %3300 = vst [vmem:[#allocation15_spill] sm:$0xff] %v3121_v57  ;;  %v1269_v13 = vpop.f32.mrf.mxu1  ;;  %v1228_v57 = vadd.f32 %v2087_v4, %v1227_v58 }
 0x181   :  { %v3123_v21 = vpop.f32.mrf.mxu0 }
 0x182   :  { %3301 = vst [vmem:[#allocation16_spill] sm:$0xff] %v3123_v21  ;;  %v3125_v14 = vpop.f32.mrf.mxu1 }
 0x183   :  { %3302 = vst [vmem:[#allocation17_spill] sm:$0xff] %v3125_v14  ;;  %v3127_v7 = vpop.f32.mrf.mxu0  ;;  %v1231_v14 = vadd.f32 %v2090_v27, %v1230_v30  ;;  %v3307_v27 = vmax.f32 %v2981_v46, %v3023_v54  ;;  %v2099_v46 = vadd.f32 %v3081_v6, %v3079_v51 }
 0x184   :  { %3303 = vst [vmem:[#allocation18_spill] sm:$0xff] %v3127_v7  ;;  %v1272_v26 = vpop.f32.mrf.mxu1  ;;  %v2093_v7 = vadd.f32 %v2092_v37, %v2091_v31 }
 0x185   :  { %v3129_v53 = vpop.f32.mrf.mxu0  ;;  %v3306_v26 = vmax.f32 %v2970_v38, %v3019_v18  ;;  %v1244_v4 = vadd.f32 %v2099_v46, %v3083_v9 }
 0x186   :  { %3304 = vst [vmem:[#allocation19_spill] sm:$0xff] %v3129_v53  ;;  %v3131_v52 = vpop.f32.mrf.mxu1  ;;  %v1236_v38 = vadd.f32 %v2093_v7, %v3071_v39  ;;  %v3308_v7 = vmax.f32 %v2990_v3, %v3027_v62  ;;  %v3309_v62 = vmax.f32 %v2998_v12, %v3031_v32  ;;  %v3310_v12 = vmax.f32 %v3001_v19, %v3035_v1 }
 0x187   :  { %3305 = vst [vmem:[#allocation20_spill] sm:$0xff] %v3131_v52  ;;  %v2124_v41 = vpop.f32.mrf.mxu0  ;;  %v1281_v53 = vmax.f32 %v3306_v26, %v1228_v57 }
 0x188   :  { %v1277_v45 = vpop.f32.mrf.mxu1  ;;  %v1285_v32 = vmax.f32 %v3310_v12, %v1244_v4 }
 0x189   :  { %v2125_v29 = vpop.f32.mrf.mxu0 }
 0x18a   :  { %v1278_v40 = vpop.f32.mrf.mxu1 }
 0x18b   :  { %v2143_v2 = vpop.f32.mrf.mxu0  ;;  %v3139_v40 = vld [vmem:[%s3275_s2] ss:$0 sm:$0xff] }
 0x18c   :  { %v1279_v13 = vpop.f32.mrf.mxu1 }
 0x18d   :  { %v2144_v55 = vpop.f32.mrf.mxu0  ;;  %v2102_v13 = vadd.f32 %v3087_v15, %v3085_v10  ;;  %v2105_v15 = vadd.f32 %v3093_v63, %v3091_v22  ;;  %v3311_v22 = vmax.f32 %v3003_v28, %v3039_v50  ;;  %v3312_v50 = vmax.f32 %v3005_v59, %v3043_v8 }
 0x18e   :  { %v2145_v21 = vadd.f32 %v2144_v55, %v2143_v2  ;;  %v1591_v33 = vpop.f32.mrf.mxu1  ;;  %v1282_v2 = vmax.f32 %v3307_v27, %v1231_v14  ;;  %v1283_v14 = vmax.f32 %v3308_v7, %v1236_v38  ;;  %v3313_v59 = vmax.f32 %v3007_v25, %v3047_v16 }
 0x18f   :  { %v2146_v36 = vpop.f32.mrf.mxu0  ;;  %v1247_v10 = vadd.f32 %v2102_v13, %v3089_v17  ;;  %v2108_v17 = vadd.f32 %v3099_v20, %v3097_v43 }
 0x190   :  { %v1592_v52 = vadd.f32 %v2145_v21, %v1591_v33  ;;  %v1593_v41 = vpop.f32.mrf.mxu1  ;;  %v2096_v33 = vadd.f32 %v3075_v48, %v3073_v42 }
 0x191   :  { %v2147_v45 = vpop.f32.mrf.mxu0  ;;  %v1286_v63 = vmax.f32 %v3311_v22, %v1247_v10 }
 0x192   :  { %v1645_v29 = vmax.f32 %v1281_v53, %v1592_v52  ;;  %v2148_v24 = vadd.f32 %v2147_v45, %v2146_v36  ;;  %v1594_v56 = vpop.f32.mrf.mxu1  ;;  %v1239_v23 = vadd.f32 %v2096_v33, %v3077_v49 }
 0x193   :  { %v2149_v55 = vpop.f32.mrf.mxu0 }
 0x194   :  { %v1665_v18 = vadd.f32 %v3139_v40, %v1645_v29  ;;  %v1595_v21 = vadd.f32 %v2148_v24, %v1594_v56  ;;  %v1596_v57 = vpop.f32.mrf.mxu1  ;;  %v1284_v49 = vmax.f32 %v3309_v62, %v1239_v23  ;;  %v2111_v23 = vadd.f32 %v3105_v34, %v3103_v47 }
 0x195   :  { %v2150_v58 = vpop.f32.mrf.mxu0  ;;  %v2114_v47 = vadd.f32 %v3111_v11, %v3109_v0  ;;  %v3316_v11 = vld [vmem:[#allocation7_spill] sm:$0xff] }
 0x196   :  { %v1678_v61 = vmax.f32 %v1665_v18, 0.0  ;;  %v1646_v52 = vmax.f32 %v1282_v2, %v1595_v21  ;;  %v2151_v36 = vadd.f32 %v2150_v58, %v2149_v55  ;;  %v1599_v53 = vpop.f32.mrf.mxu1  ;;  %v1260_v34 = vadd.f32 %v2111_v23, %v3107_v60 }
 0x197   :  { %v2152_v54 = vpop.f32.mrf.mxu0 }
 0x198   :  { %1692 = vst.msk [vmem:[%s3276_s3] sm:$0xff] %vm1691_vm1, %v1678_v61  ;;  %v1666_v30 = vadd.f32 %v3139_v40, %v1646_v52  ;;  %v1600_v31 = vadd.f32 %v2151_v36, %v1599_v53  ;;  %v1601_v37 = vpop.f32.mrf.mxu1  ;;  %v1252_v61 = vadd.f32 %v2105_v15, %v3095_v35 }
 0x199   :  { %v2153_v39 = vpop.f32.mrf.mxu0 }
 0x19a   :  { %v1679_v42 = vmax.f32 %v1666_v30, 0.0  ;;  %v1647_v48 = vmax.f32 %v1283_v14, %v1600_v31  ;;  %v2154_v51 = vadd.f32 %v2153_v39, %v2152_v54  ;;  %v1602_v6 = vpop.f32.mrf.mxu1  ;;  %v1255_v14 = vadd.f32 %v2108_v17, %v3101_v5  ;;  %v3323_v17 = vld [vmem:[#allocation15_spill] sm:$0xff] }
 0x19b   :  { %v2155_v3 = vpop.f32.mrf.mxu0  ;;  %v1287_v35 = vmax.f32 %v3312_v50, %v1252_v61 }
 0x19c   :  { %1693 = vst.msk [vmem:[%s3276_s3 + $0x8] sm:$0xff] %vm1691_vm1, %v1679_v42  ;;  %v1667_v26 = vadd.f32 %v3139_v40, %v1647_v48  ;;  %v1603_v41 = vadd.f32 %v2154_v51, %v1602_v6  ;;  %v1604_v45 = vpop.f32.mrf.mxu1  ;;  %v1288_v8 = vmax.f32 %v3313_v59, %v1255_v14 }
 0x19d   :  { %v2156_v29 = vpop.f32.mrf.mxu0 }
 0x19e   :  { %v1680_v24 = vmax.f32 %v1667_v26, 0.0  ;;  %v1648_v9 = vmax.f32 %v1284_v49, %v1603_v41  ;;  %v2157_v56 = vadd.f32 %v2156_v29, %v2155_v3  ;;  %v1607_v27 = vpop.f32.mrf.mxu1  ;;  %v3314_v41 = vld [vmem:[#allocation13_spill] sm:$0xff]  ;;  %v3315_v29 = vld [vmem:[#allocation2_spill] sm:$0xff] }
 0x19f   :  { %v2158_v2 = vpop.f32.mrf.mxu0  ;;  %v2117_v60 = vadd.f32 %v3314_v41, %v3115_v44  ;;  %v3317_v0 = vmax.f32 %v3315_v29, %v3316_v11 }
 0x1a0   :  { %1694 = vst.msk [vmem:[%s3276_s3 + $0x10] sm:$0xff] %vm1691_vm1, %v1680_v24  ;;  %v1668_v55 = vadd.f32 %v3139_v40, %v1648_v9  ;;  %v1608_v38 = vadd.f32 %v2157_v56, %v1607_v27  ;;  %v1609_v33 = vpop.f32.mrf.mxu1  ;;  %v3318_v9 = vld [vmem:[#allocation12_spill] sm:$0xff] }
 0x1a1   :  { %v2159_v18 = vpop.f32.mrf.mxu0  ;;  %v1289_v24 = vmax.f32 %v3317_v0, %v1260_v34  ;;  %v1263_v56 = vadd.f32 %v2114_v47, %v3318_v9  ;;  %v3331_v47 = vld [vmem:[#allocation5_spill] sm:$0xff]  ;;  %v3336_v9 = vld [vmem:[#allocation11_spill] sm:$0xff] }
 0x1a2   :  { %v1681_v21 = vmax.f32 %v1668_v55, 0.0  ;;  %v1649_v57 = vmax.f32 %v1285_v32, %v1608_v38  ;;  %v2160_v19 = vadd.f32 %v2159_v18, %v2158_v2  ;;  %v1610_v1 = vpop.f32.mrf.mxu1  ;;  %v3319_v38 = vld [vmem:[#allocation14_spill] sm:$0xff] }
 0x1a3   :  { %v2161_v58 = vpop.f32.mrf.mxu0  ;;  %v1268_v33 = vadd.f32 %v2117_v60, %v3319_v38 }
 0x1a4   :  { %1695 = vst.msk [vmem:[%s3276_s3 + $0x18] sm:$0xff] %vm1691_vm1, %v1681_v21  ;;  %v1669_v52 = vadd.f32 %v3139_v40, %v1649_v57  ;;  %v1611_v36 = vadd.f32 %v2160_v19, %v1610_v1  ;;  %v1612_v53 = vpop.f32.mrf.mxu1  ;;  %v3320_v21 = vld [vmem:[#allocation3_spill] sm:$0xff]  ;;  %v3321_v57 = vld [vmem:[#allocation8_spill] sm:$0xff] }
 0x1a5   :  { %v2162_v46 = vpop.f32.mrf.mxu0  ;;  %v3322_v19 = vmax.f32 %v3320_v21, %v3321_v57 }
 0x1a6   :  { %v1682_v54 = vmax.f32 %v1669_v52, 0.0  ;;  %v1650_v7 = vmax.f32 %v1286_v63, %v1611_v36  ;;  %v2163_v20 = vadd.f32 %v2162_v46, %v2161_v58  ;;  %v1615_v43 = vpop.f32.mrf.mxu1  ;;  %v3324_v58 = vld [vmem:[#allocation16_spill] sm:$0xff] }
 0x1a7   :  { %v2164_v28 = vpop.f32.mrf.mxu0  ;;  %v1290_v1 = vmax.f32 %v3322_v19, %v1263_v56  ;;  %v2120_v22 = vadd.f32 %v3324_v58, %v3323_v17 }
 0x1a8   :  { %1696 = vst.msk [vmem:[%s3276_s3 + $0x20] sm:$0xff] %vm1691_vm1, %v1682_v54  ;;  %v1670_v30 = vadd.f32 %v3139_v40, %v1650_v7  ;;  %v1616_v31 = vadd.f32 %v2163_v20, %v1615_v43  ;;  %v1617_v37 = vpop.f32.mrf.mxu1  ;;  %v3325_v20 = vld [vmem:[#allocation4_spill] sm:$0xff]  ;;  %v3326_v43 = vld [vmem:[#allocation9_spill] sm:$0xff] }
 0x1a9   :  { %v2165_v39 = vpop.f32.mrf.mxu0  ;;  %v3327_v14 = vmax.f32 %v3325_v20, %v3326_v43 }
 0x1aa   :  { %v1683_v42 = vmax.f32 %v1670_v30, 0.0  ;;  %v1651_v5 = vmax.f32 %v1287_v35, %v1616_v31  ;;  %v2166_v48 = vadd.f32 %v2165_v39, %v2164_v28  ;;  %v1618_v51 = vpop.f32.mrf.mxu1  ;;  %v3328_v35 = vld [vmem:[#allocation17_spill] sm:$0xff]  ;;  %v3329_v30 = vld [vmem:[#allocation18_spill] sm:$0xff]  ;;  %v3330_v31 = vld [vmem:[#allocation19_spill] sm:$0xff] }
 0x1ab   :  { %v2167_v6 = vpop.f32.mrf.mxu0  ;;  %v1291_v28 = vmax.f32 %v3327_v14, %v1268_v33  ;;  %v1271_v23 = vadd.f32 %v2120_v22, %v3328_v35  ;;  %v2123_v37 = vadd.f32 %v3330_v31, %v3329_v30 }
 0x1ac   :  { %1697 = vst.msk [vmem:[%s3276_s3 + $0x28] sm:$0xff] %vm1691_vm1, %v1683_v42  ;;  %v1671_v4 = vadd.f32 %v3139_v40, %v1651_v5  ;;  %v1619_v3 = vadd.f32 %v2166_v48, %v1618_v51  ;;  %v1620_v62 = vpop.f32.mrf.mxu1 }
 0x1ad   :  { %v2168_v49 = vpop.f32.mrf.mxu0 }
 0x1ae   :  { %v1684_v13 = vmax.f32 %v1671_v4, 0.0  ;;  %v1652_v26 = vmax.f32 %v1288_v8, %v1619_v3  ;;  %v2169_v25 = vadd.f32 %v2168_v49, %v2167_v6  ;;  %v1623_v16 = vpop.f32.mrf.mxu1  ;;  %v3332_v4 = vld [vmem:[#allocation10_spill] sm:$0xff]  ;;  %v3334_v49 = vld [vmem:[#allocation20_spill] sm:$0xff] }
 0x1af   :  { %v2170_v45 = vpop.f32.mrf.mxu0  ;;  %v3333_v3 = vmax.f32 %v3331_v47, %v3332_v4 }
 0x1b0   :  { %1698 = vst.msk [vmem:[%s3276_s3 + $0x30] sm:$0xff] %vm1691_vm1, %v1684_v13  ;;  %v1672_v27 = vadd.f32 %v3139_v40, %v1652_v26  ;;  %v1624_v12 = vadd.f32 %v2169_v25, %v1623_v16  ;;  %v1625_v32 = vpop.f32.mrf.mxu1  ;;  %v1276_v13 = vadd.f32 %v2123_v37, %v3334_v49 }
 0x1b1   :  { %v2171_v2 = vpop.f32.mrf.mxu0  ;;  %v1292_v62 = vmax.f32 %v3333_v3, %v1271_v23 }
 0x1b2   :  { %v1685_v10 = vmax.f32 %v1672_v27, 0.0  ;;  %v1653_v15 = vmax.f32 %v1289_v24, %v1624_v12  ;;  %v2172_v44 = vadd.f32 %v2171_v2, %v2170_v45  ;;  %v1626_v55 = vpop.f32.mrf.mxu1  ;;  %v3335_v24 = vld [vmem:[#allocation6_spill] sm:$0xff] }
 0x1b3   :  { %v2173_v18 = vpop.f32.mrf.mxu0  ;;  %v3337_v56 = vmax.f32 %v3335_v24, %v3336_v9 }
 0x1b4   :  { %1699 = vst.msk [vmem:[%s3276_s3 + $0x38] sm:$0xff] %vm1691_vm1, %v1685_v10  ;;  %v1673_v63 = vadd.f32 %v3139_v40, %v1653_v15  ;;  %v1627_v61 = vadd.f32 %v2172_v44, %v1626_v55  ;;  %v1628_v52 = vpop.f32.mrf.mxu1 }
 0x1b5   :  { %v2174_v36 = vpop.f32.mrf.mxu0  ;;  %v1293_v27 = vmax.f32 %v3337_v56, %v1276_v13 }
 0x1b6   :  { %v1686_v53 = vmax.f32 %v1673_v63, 0.0  ;;  %v1654_v46 = vmax.f32 %v1290_v1, %v1627_v61  ;;  %v2175_v54 = vadd.f32 %v2174_v36, %v2173_v18  ;;  %v1631_v7 = vpop.f32.mrf.mxu1 }
 0x1b7   :  { %v2176_v50 = vpop.f32.mrf.mxu0 }
 0x1b8   :  { %1700 = vst.msk [vmem:[%s3276_s3 + $0x40] sm:$0xff] %vm1691_vm1, %v1686_v53  ;;  %v1674_v39 = vadd.f32 %v3139_v40, %v1654_v46  ;;  %v1632_v42 = vadd.f32 %v2175_v54, %v1631_v7  ;;  %v1633_v5 = vpop.f32.mrf.mxu1 }
 0x1b9   :  { %v2177_v48 = vpop.f32.mrf.mxu0 }
 0x1ba   :  { %v1687_v51 = vmax.f32 %v1674_v39, 0.0  ;;  %v1655_v59 = vmax.f32 %v1291_v28, %v1632_v42  ;;  %v2178_v8 = vadd.f32 %v2177_v48, %v2176_v50  ;;  %v1634_v6 = vpop.f32.mrf.mxu1 }
 0x1bb   :  { %v2179_v34 = vpop.f32.mrf.mxu0 }
 0x1bc   :  { %1701 = vst.msk [vmem:[%s3276_s3 + $0x48] sm:$0xff] %vm1691_vm1, %v1687_v51  ;;  %v1675_v26 = vadd.f32 %v3139_v40, %v1655_v59  ;;  %v1635_v25 = vadd.f32 %v2178_v8, %v1634_v6  ;;  %v1636_v16 = vpop.f32.mrf.mxu1 }
 0x1bd   :  { %v2180_v41 = vpop.f32.mrf.mxu0 }
 0x1be   :  { %v1688_v60 = vmax.f32 %v1675_v26, 0.0  ;;  %v1656_v45 = vmax.f32 %v1292_v62, %v1635_v25  ;;  %v2181_v29 = vadd.f32 %v2180_v41, %v2179_v34  ;;  %v1639_v11 = vpop.f32.mrf.mxu1 }
 0x1bf   :  { %v2182_v0 = vpop.f32.mrf.mxu0 }
 0x1c0   :  { %1702 = vst.msk [vmem:[%s3276_s3 + $0x50] sm:$0xff] %vm1691_vm1, %v1688_v60  ;;  %v1676_v12 = vadd.f32 %v3139_v40, %v1656_v45  ;;  %v1640_v32 = vadd.f32 %v2181_v29, %v1639_v11  ;;  %v1641_v2 = vpop.f32.mrf.mxu1 }
 0x1c1   :  { %v2183_v10 = vpop.f32.mrf.mxu0 }
 0x1c2   :  { %v1689_v15 = vmax.f32 %v1676_v12, 0.0  ;;  %v1657_v44 = vmax.f32 %v1293_v27, %v1640_v32  ;;  %v1642_v55 = vpop.f32.mrf.mxu1 }
 0x1c4   :  { %1703 = vst.msk [vmem:[%s3276_s3 + $0x58] sm:$0xff] %vm1691_vm1, %v1689_v15  ;;  %v1677_v38 = vadd.f32 %v3139_v40, %v1657_v44  ;;  %v1643_v33 = vpop.f32.mrf.mxu1 }
 0x1c6   :  { %v1690_v18 = vmax.f32 %v1677_v38, 0.0 }
 0x1c8   :  { %1704 = vst.msk [vmem:[%s3276_s3 + $0x60] sm:$0xff] %vm1691_vm1, %v1690_v18 }

// kernel: network_forward.5
= control target key start
LH: loop header
LB: loop body
LE: loop exit
PB: predicated region body
PF: predicated region fallthrough
CT: control target
= control target key end

     0   :  { %v1062_v30 = vmov 1983009808   ;;  %v230_v32 = vlaneseq  ;;  %s1700_s0 = inlined_call_operand.vmem [shape: f32[2,1568], index: 0, kind: input, shape index: {}]   ;;  %s1701_s1 = inlined_call_operand.vmem [shape: f32[1568,128], index: 1, kind: input, shape index: {}]   ;;  %s1702_s2 = inlined_call_operand.vmem [shape: f32[1,128], index: 2, kind: input, shape index: {}]   ;;  %s1703_s3 = inlined_call_operand.hbm [shape: f32[2,128], index: 3, kind: output, shape index: {}]  }
   0x1   :  { %v50_v0 = vld [vmem:[%s1701_s1 + $0xf8] sm:$0xff]  ;;  %v49_v4 = vld [vmem:[%s1701_s1 + $0xf0] sm:$0xff]  ;;  %v48_v8 = vld [vmem:[%s1701_s1 + $0xe8] sm:$0xff]  ;;  %v228_v31 = vunpack.c.l.s4 %v1062_v30 }
   0x2   :  { %v82_v1 = vld [vmem:[%s1701_s1 + $0x1f8] sm:$0xff]  ;;  %807 = vmatprep.subr.mxu0 %v50_v0  ;;  %v81_v5 = vld [vmem:[%s1701_s1 + $0x1f0] sm:$0xff]  ;;  %v80_v9 = vld [vmem:[%s1701_s1 + $0x1e8] sm:$0xff]  ;;  %v231_v42 = vshrl.u32 %v230_v32, 7 }
   0x3   :  { %v34_v2 = vld [vmem:[%s1701_s1 + $0x78] sm:$0xff]  ;;  %842 = vmatprep.subr.mxu1 %v82_v1  ;;  %v33_v6 = vld [vmem:[%s1701_s1 + $0x70] sm:$0xff]  ;;  %v32_v10 = vld [vmem:[%s1701_s1 + $0x68] sm:$0xff]  ;;  %v229_v41 = vunpack.c.0.s8 %v228_v31 }
   0x4   :  { %v66_v3 = vld [vmem:[%s1701_s1 + $0x178] sm:$0xff]  ;;  %808 = vmatpush3.msra.mxu0 %v34_v2  ;;  %v65_v7 = vld [vmem:[%s1701_s1 + $0x170] sm:$0xff]  ;;  %v64_v11 = vld [vmem:[%s1701_s1 + $0x168] sm:$0xff] }
   0x5   :  { %843 = vmatpush3.msra.mxu1 %v66_v3  ;;  %809 = vmatprep.subr.mxu0 %v49_v4  ;;  %v47_v12 = vld [vmem:[%s1701_s1 + $0xe0] sm:$0xff]  ;;  %v46_v16 = vld [vmem:[%s1701_s1 + $0xd8] sm:$0xff]  ;;  %v45_v20 = vld [vmem:[%s1701_s1 + $0xd0] sm:$0xff]  ;;  %v1224_v51 = vsub.s32 %v229_v41, %v231_v42 }
   0x6   :  { %844 = vmatprep.subr.mxu1 %v81_v5  ;;  %810 = vmatpush3.msra.mxu0 %v33_v6  ;;  %v79_v13 = vld [vmem:[%s1701_s1 + $0x1e0] sm:$0xff]  ;;  %v78_v17 = vld [vmem:[%s1701_s1 + $0x1d8] sm:$0xff]  ;;  %v77_v21 = vld [vmem:[%s1701_s1 + $0x1d0] sm:$0xff] }
   0x7   :  { %845 = vmatpush3.msra.mxu1 %v65_v7  ;;  %811 = vmatprep.subr.mxu0 %v48_v8  ;;  %v31_v14 = vld [vmem:[%s1701_s1 + $0x60] sm:$0xff]  ;;  %v30_v18 = vld [vmem:[%s1701_s1 + $0x58] sm:$0xff]  ;;  %v29_v22 = vld [vmem:[%s1701_s1 + $0x50] sm:$0xff] }
   0x8   :  { %846 = vmatprep.subr.mxu1 %v80_v9  ;;  %v63_v15 = vld [vmem:[%s1701_s1 + $0x160] sm:$0xff]  ;;  %812 = vmatpush3.msra.mxu0 %v32_v10  ;;  %v62_v19 = vld [vmem:[%s1701_s1 + $0x158] sm:$0xff]  ;;  %v61_v23 = vld [vmem:[%s1701_s1 + $0x150] sm:$0xff] }
   0x9   :  { %847 = vmatpush3.msra.mxu1 %v64_v11  ;;  %813 = vmatprep.subr.mxu0 %v47_v12  ;;  %v44_v24 = vld [vmem:[%s1701_s1 + $0xc8] sm:$0xff]  ;;  %v43_v28 = vld [vmem:[%s1701_s1 + $0xc0] sm:$0xff]  ;;  %v42_v35 = vld [vmem:[%s1701_s1 + $0xb8] sm:$0xff] }
   0xa   :  { %848 = vmatprep.subr.mxu1 %v79_v13  ;;  %814 = vmatpush3.msra.mxu0 %v31_v14  ;;  %v76_v25 = vld [vmem:[%s1701_s1 + $0x1c8] sm:$0xff]  ;;  %v75_v29 = vld [vmem:[%s1701_s1 + $0x1c0] sm:$0xff]  ;;  %v74_v36 = vld [vmem:[%s1701_s1 + $0x1b8] sm:$0xff] }
   0xb   :  { %849 = vmatpush3.msra.mxu1 %v63_v15  ;;  %815 = vmatprep.subr.mxu0 %v46_v16  ;;  %v28_v26 = vld [vmem:[%s1701_s1 + $0x48] sm:$0xff]  ;;  %v27_v33 = vld [vmem:[%s1701_s1 + $0x40] sm:$0xff]  ;;  %v26_v37 = vld [vmem:[%s1701_s1 + $0x38] sm:$0xff] }
   0xc   :  { %850 = vmatprep.subr.mxu1 %v78_v17  ;;  %816 = vmatpush3.msra.mxu0 %v30_v18  ;;  %v60_v27 = vld [vmem:[%s1701_s1 + $0x148] sm:$0xff]  ;;  %v59_v34 = vld [vmem:[%s1701_s1 + $0x140] sm:$0xff]  ;;  %v58_v38 = vld [vmem:[%s1701_s1 + $0x138] sm:$0xff] }
   0xd   :  { %851 = vmatpush3.msra.mxu1 %v62_v19  ;;  %817 = vmatprep.subr.mxu0 %v45_v20  ;;  %v41_v39 = vld [vmem:[%s1701_s1 + $0xb0] sm:$0xff]  ;;  %v40_v45 = vld [vmem:[%s1701_s1 + $0xa8] sm:$0xff]  ;;  %v39_v49 = vld [vmem:[%s1701_s1 + $0xa0] sm:$0xff] }
   0xe   :  { %852 = vmatprep.subr.mxu1 %v77_v21  ;;  %818 = vmatpush3.msra.mxu0 %v29_v22  ;;  %v73_v40 = vld [vmem:[%s1701_s1 + $0x1b0] sm:$0xff]  ;;  %v72_v46 = vld [vmem:[%s1701_s1 + $0x1a8] sm:$0xff]  ;;  %v71_v50 = vld [vmem:[%s1701_s1 + $0x1a0] sm:$0xff] }
   0xf   :  { %853 = vmatpush3.msra.mxu1 %v61_v23  ;;  %819 = vmatprep.subr.mxu0 %v44_v24  ;;  %v25_v43 = vld [vmem:[%s1701_s1 + $0x30] sm:$0xff]  ;;  %v24_v47 = vld [vmem:[%s1701_s1 + $0x28] sm:$0xff]  ;;  %v23_v52 = vld [vmem:[%s1701_s1 + $0x20] sm:$0xff] }
  0x10   :  { %854 = vmatprep.subr.mxu1 %v76_v25  ;;  %820 = vmatpush3.msra.mxu0 %v28_v26  ;;  %v57_v44 = vld [vmem:[%s1701_s1 + $0x130] sm:$0xff]  ;;  %v56_v48 = vld [vmem:[%s1701_s1 + $0x128] sm:$0xff]  ;;  %v55_v53 = vld [vmem:[%s1701_s1 + $0x120] sm:$0xff] }
  0x11   :  { %855 = vmatpush3.msra.mxu1 %v60_v27  ;;  %821 = vmatprep.subr.mxu0 %v43_v28  ;;  %v15_v54 = vld [vmem:[%s1700_s0] sm:$0xff]  ;;  %v38_v55 = vld [vmem:[%s1701_s1 + $0x98] sm:$0xff]  ;;  %v37_v60 = vld [vmem:[%s1701_s1 + $0x90] sm:$0xff] }
  0x12   :  { %856 = vmatprep.subr.mxu1 %v75_v29  ;;  %822 = vmatpush3.msra.mxu0 %v27_v33  ;;  %v70_v56 = vld [vmem:[%s1701_s1 + $0x198] sm:$0xff]  ;;  %v226_v57 = vcombine.high %v15_v54, %v15_v54  ;;  %v69_v61 = vld [vmem:[%s1701_s1 + $0x190] sm:$0xff]  ;;  %v233_v62 = vrot.slane %v15_v54, %v1224_v51  ;;  %v36_v1 = vld [vmem:[%s1701_s1 + $0x88] sm:$0xff] }
  0x13   :  { %857 = vmatpush3.msra.mxu1 %v59_v34  ;;  %823 = vmatprep.subr.mxu0 %v42_v35  ;;  %v22_v58 = vld [vmem:[%s1701_s1 + $0x18] sm:$0xff]  ;;  %v21_v63 = vld [vmem:[%s1701_s1 + $0x10] sm:$0xff]  ;;  %v68_v2 = vld [vmem:[%s1701_s1 + $0x188] sm:$0xff] }
  0x14   :  { %858 = vmatprep.subr.mxu1 %v74_v36  ;;  %824 = vmatpush3.msra.mxu0 %v26_v37  ;;  %v54_v59 = vld [vmem:[%s1701_s1 + $0x118] sm:$0xff]  ;;  %v53_v0 = vld [vmem:[%s1701_s1 + $0x110] sm:$0xff]  ;;  %v240_v3 = vrot.slane %v226_v57, %v1224_v51  ;;  %v20_v4 = vld [vmem:[%s1701_s1 + $0x8] sm:$0xff]  ;;  %v241_v8 = vcombine.high %v233_v62, %v233_v62 }
  0x15   :  { %859 = vmatpush3.msra.mxu1 %v58_v38  ;;  %825 = vmatprep.subr.mxu0 %v41_v39  ;;  %v52_v5 = vld [vmem:[%s1701_s1 + $0x108] sm:$0xff]  ;;  %v35_v6 = vld [vmem:[%s1701_s1 + $0x80] sm:$0xff]  ;;  %v114_v12 = vld [vmem:[%s1701_s1 + $0x2f8] sm:$0xff] }
  0x16   :  { %860 = vmatprep.subr.mxu1 %v73_v40  ;;  %826 = vmatpush3.msra.mxu0 %v25_v43  ;;  %v67_v7 = vld [vmem:[%s1701_s1 + $0x180] sm:$0xff]  ;;  %v242_v11 = vcombine.high %v240_v3, %v240_v3  ;;  %v146_v13 = vld [vmem:[%s1701_s1 + $0x3f8] sm:$0xff]  ;;  %v113_v16 = vld [vmem:[%s1701_s1 + $0x2f0] sm:$0xff] }
  0x17   :  { %861 = vmatpush3.msra.mxu1 %v57_v44  ;;  %827 = vmatprep.subr.mxu0 %v40_v45  ;;  %v19_v9 = vld [vmem:[%s1701_s1] sm:$0xff]  ;;  %v98_v14 = vld [vmem:[%s1701_s1 + $0x278] sm:$0xff]  ;;  %v145_v17 = vld [vmem:[%s1701_s1 + $0x3f0] sm:$0xff] }
  0x18   :  { %862 = vmatprep.subr.mxu1 %v72_v46  ;;  %828 = vmatpush3.msra.mxu0 %v24_v47  ;;  %v51_v10 = vld [vmem:[%s1701_s1 + $0x100] sm:$0xff]  ;;  %v130_v15 = vld [vmem:[%s1701_s1 + $0x378] sm:$0xff]  ;;  %v97_v18 = vld [vmem:[%s1701_s1 + $0x270] sm:$0xff] }
  0x19   :  { %863 = vmatpush3.msra.mxu1 %v56_v48  ;;  %829 = vmatprep.subr.mxu0 %v39_v49  ;;  %v129_v19 = vld [vmem:[%s1701_s1 + $0x370] sm:$0xff]  ;;  %v112_v20 = vld [vmem:[%s1701_s1 + $0x2e8] sm:$0xff]  ;;  %v111_v24 = vld [vmem:[%s1701_s1 + $0x2e0] sm:$0xff] }
  0x1a   :  { %864 = vmatprep.subr.mxu1 %v71_v50  ;;  %830 = vmatpush3.msra.mxu0 %v23_v52  ;;  %v144_v21 = vld [vmem:[%s1701_s1 + $0x3e8] sm:$0xff]  ;;  %v143_v25 = vld [vmem:[%s1701_s1 + $0x3e0] sm:$0xff]  ;;  %v110_v28 = vld [vmem:[%s1701_s1 + $0x2d8] sm:$0xff] }
  0x1b   :  { %865 = vmatpush3.msra.mxu1 %v55_v53  ;;  %831 = vmatprep.subr.mxu0 %v38_v55  ;;  %v96_v22 = vld [vmem:[%s1701_s1 + $0x268] sm:$0xff]  ;;  %v95_v26 = vld [vmem:[%s1701_s1 + $0x260] sm:$0xff]  ;;  %v142_v29 = vld [vmem:[%s1701_s1 + $0x3d8] sm:$0xff] }
  0x1c   :  { %866 = vmatprep.subr.mxu1 %v70_v56  ;;  %832 = vmatpush3.msra.mxu0 %v22_v58  ;;  %v128_v23 = vld [vmem:[%s1701_s1 + $0x368] sm:$0xff]  ;;  %v127_v27 = vld [vmem:[%s1701_s1 + $0x360] sm:$0xff]  ;;  %v94_v30 = vld [vmem:[%s1701_s1 + $0x258] sm:$0xff] }
  0x1d   :  { %867 = vmatpush3.msra.mxu1 %v54_v59  ;;  %833 = vmatprep.subr.mxu0 %v37_v60  ;;  %v126_v31 = vld [vmem:[%s1701_s1 + $0x358] sm:$0xff]  ;;  %v109_v32 = vld [vmem:[%s1701_s1 + $0x2d0] sm:$0xff]  ;;  %v108_v36 = vld [vmem:[%s1701_s1 + $0x2c8] sm:$0xff] }
  0x1e   :  { %868 = vmatprep.subr.mxu1 %v69_v61  ;;  %834 = vmatpush3.msra.mxu0 %v21_v63  ;;  %v141_v33 = vld [vmem:[%s1701_s1 + $0x3d0] sm:$0xff]  ;;  %v140_v37 = vld [vmem:[%s1701_s1 + $0x3c8] sm:$0xff]  ;;  %v107_v40 = vld [vmem:[%s1701_s1 + $0x2c0] sm:$0xff] }
  0x1f   :  { %869 = vmatpush3.msra.mxu1 %v53_v0  ;;  %835 = vmatprep.subr.mxu0 %v36_v1  ;;  %v93_v34 = vld [vmem:[%s1701_s1 + $0x250] sm:$0xff]  ;;  %v92_v38 = vld [vmem:[%s1701_s1 + $0x248] sm:$0xff]  ;;  %v139_v41 = vld [vmem:[%s1701_s1 + $0x3c0] sm:$0xff] }
  0x20   :  { %870 = vmatprep.subr.mxu1 %v68_v2  ;;  %836 = vmatpush3.msra.mxu0 %v20_v4  ;;  %v125_v35 = vld [vmem:[%s1701_s1 + $0x350] sm:$0xff]  ;;  %v124_v39 = vld [vmem:[%s1701_s1 + $0x348] sm:$0xff]  ;;  %v91_v42 = vld [vmem:[%s1701_s1 + $0x240] sm:$0xff] }
  0x21   :  { %871 = vmatpush3.msra.mxu1 %v52_v5  ;;  %837 = vmatprep.subr.mxu0 %v35_v6  ;;  %v123_v43 = vld [vmem:[%s1701_s1 + $0x340] sm:$0xff]  ;;  %v106_v44 = vld [vmem:[%s1701_s1 + $0x2b8] sm:$0xff]  ;;  %v105_v48 = vld [vmem:[%s1701_s1 + $0x2b0] sm:$0xff] }
  0x22   :  { %872 = vmatprep.subr.mxu1 %v67_v7  ;;  %838 = vmatpush3.msra.mxu0 %v19_v9  ;;  %v138_v45 = vld [vmem:[%s1701_s1 + $0x3b8] sm:$0xff]  ;;  %v137_v49 = vld [vmem:[%s1701_s1 + $0x3b0] sm:$0xff]  ;;  %v104_v53 = vld [vmem:[%s1701_s1 + $0x2a8] sm:$0xff] }
  0x23   :  { %363 = vmatprep.mubr.f32.mxu0 %v241_v8  ;;  %873 = vmatpush3.msra.mxu1 %v51_v10  ;;  %v90_v46 = vld [vmem:[%s1701_s1 + $0x238] sm:$0xff]  ;;  %v89_v50 = vld [vmem:[%s1701_s1 + $0x230] sm:$0xff]  ;;  %v136_v54 = vld [vmem:[%s1701_s1 + $0x3a8] sm:$0xff] }
  0x24   :  { %364 = vmatmul.mubr.f32.vlgmr.msra.gmra.mxu0 %v233_v62  ;;  %433 = vmatprep.mubr.f32.mxu1 %v242_v11  ;;  %v122_v47 = vld [vmem:[%s1701_s1 + $0x338] sm:$0xff]  ;;  %v121_v52 = vld [vmem:[%s1701_s1 + $0x330] sm:$0xff]  ;;  %v88_v55 = vld [vmem:[%s1701_s1 + $0x228] sm:$0xff] }
  0x25   :  { %877 = vmatprep.subr.mxu0 %v114_v12  ;;  %912 = vmatprep.subr.mxu1 %v146_v13  ;;  %v120_v56 = vld [vmem:[%s1701_s1 + $0x328] sm:$0xff]  ;;  %v103_v58 = vld [vmem:[%s1701_s1 + $0x2a0] sm:$0xff]  ;;  %v102_v62 = vld [vmem:[%s1701_s1 + $0x298] sm:$0xff] }
  0x26   :  { %434 = vmatmul.mubr.f32.vlgmr.msra.gmra.mxu1 %v240_v3  ;;  %878 = vmatpush3.msra.mxu0 %v98_v14  ;;  %v16_v57 = vld [vmem:[%s1700_s0 + $0x8] sm:$0xff]  ;;  %v135_v59 = vld [vmem:[%s1701_s1 + $0x3a0] sm:$0xff]  ;;  %v134_v63 = vld [vmem:[%s1701_s1 + $0x398] sm:$0xff] }
  0x27   :  { %913 = vmatpush3.msra.mxu1 %v130_v15  ;;  %879 = vmatprep.subr.mxu0 %v113_v16  ;;  %v87_v60 = vld [vmem:[%s1701_s1 + $0x220] sm:$0xff]  ;;  %v243_v0 = vcombine.high %v16_v57, %v16_v57  ;;  %v86_v1 = vld [vmem:[%s1701_s1 + $0x218] sm:$0xff]  ;;  %v101_v3 = vld [vmem:[%s1701_s1 + $0x290] sm:$0xff]  ;;  %v250_v5 = vrot.slane %v16_v57, %v1224_v51 }
  0x28   :  { %914 = vmatprep.subr.mxu1 %v145_v17  ;;  %880 = vmatpush3.msra.mxu0 %v97_v18  ;;  %v119_v61 = vld [vmem:[%s1701_s1 + $0x320] sm:$0xff]  ;;  %v118_v2 = vld [vmem:[%s1701_s1 + $0x318] sm:$0xff]  ;;  %v133_v4 = vld [vmem:[%s1701_s1 + $0x390] sm:$0xff] }
  0x29   :  { %915 = vmatpush3.msra.mxu1 %v129_v19  ;;  %881 = vmatprep.subr.mxu0 %v112_v20  ;;  %v85_v6 = vld [vmem:[%s1701_s1 + $0x210] sm:$0xff]  ;;  %v100_v8 = vld [vmem:[%s1701_s1 + $0x288] sm:$0xff]  ;;  %v257_v10 = vrot.slane %v243_v0, %v1224_v51  ;;  %v99_v13 = vld [vmem:[%s1701_s1 + $0x280] sm:$0xff]  ;;  %v258_v15 = vcombine.high %v250_v5, %v250_v5 }
  0x2a   :  { %916 = vmatprep.subr.mxu1 %v144_v21  ;;  %882 = vmatpush3.msra.mxu0 %v96_v22  ;;  %v117_v7 = vld [vmem:[%s1701_s1 + $0x310] sm:$0xff]  ;;  %v132_v9 = vld [vmem:[%s1701_s1 + $0x388] sm:$0xff]  ;;  %v131_v14 = vld [vmem:[%s1701_s1 + $0x380] sm:$0xff] }
  0x2b   :  { %917 = vmatpush3.msra.mxu1 %v128_v23  ;;  %883 = vmatprep.subr.mxu0 %v111_v24  ;;  %v84_v11 = vld [vmem:[%s1701_s1 + $0x208] sm:$0xff]  ;;  %v83_v16 = vld [vmem:[%s1701_s1 + $0x200] sm:$0xff]  ;;  %v259_v18 = vcombine.high %v257_v10, %v257_v10  ;;  %v178_v19 = vld [vmem:[%s1701_s1 + $0x4f8] sm:$0xff] }
  0x2c   :  { %918 = vmatprep.subr.mxu1 %v143_v25  ;;  %884 = vmatpush3.msra.mxu0 %v95_v26  ;;  %v116_v12 = vld [vmem:[%s1701_s1 + $0x308] sm:$0xff]  ;;  %v115_v17 = vld [vmem:[%s1701_s1 + $0x300] sm:$0xff]  ;;  %v210_v20 = vld [vmem:[%s1701_s1 + $0x5f8] sm:$0xff] }
  0x2d   :  { %919 = vmatpush3.msra.mxu1 %v127_v27  ;;  %885 = vmatprep.subr.mxu0 %v110_v28  ;;  %v162_v21 = vld [vmem:[%s1701_s1 + $0x478] sm:$0xff] }
  0x2e   :  { %920 = vmatprep.subr.mxu1 %v142_v29  ;;  %886 = vmatpush3.msra.mxu0 %v94_v30  ;;  %v194_v22 = vld [vmem:[%s1701_s1 + $0x578] sm:$0xff] }
  0x2f   :  { %921 = vmatpush3.msra.mxu1 %v126_v31  ;;  %887 = vmatprep.subr.mxu0 %v109_v32 }
  0x30   :  { %922 = vmatprep.subr.mxu1 %v141_v33  ;;  %888 = vmatpush3.msra.mxu0 %v93_v34 }
  0x31   :  { %923 = vmatpush3.msra.mxu1 %v125_v35  ;;  %889 = vmatprep.subr.mxu0 %v108_v36 }
  0x32   :  { %924 = vmatprep.subr.mxu1 %v140_v37  ;;  %890 = vmatpush3.msra.mxu0 %v92_v38 }
  0x33   :  { %925 = vmatpush3.msra.mxu1 %v124_v39  ;;  %891 = vmatprep.subr.mxu0 %v107_v40 }
  0x34   :  { %926 = vmatprep.subr.mxu1 %v139_v41  ;;  %892 = vmatpush3.msra.mxu0 %v91_v42 }
  0x35   :  { %927 = vmatpush3.msra.mxu1 %v123_v43  ;;  %893 = vmatprep.subr.mxu0 %v106_v44 }
  0x36   :  { %928 = vmatprep.subr.mxu1 %v138_v45  ;;  %894 = vmatpush3.msra.mxu0 %v90_v46 }
  0x37   :  { %929 = vmatpush3.msra.mxu1 %v122_v47  ;;  %895 = vmatprep.subr.mxu0 %v105_v48 }
  0x38   :  { %930 = vmatprep.subr.mxu1 %v137_v49  ;;  %896 = vmatpush3.msra.mxu0 %v89_v50 }
  0x39   :  { %931 = vmatpush3.msra.mxu1 %v121_v52  ;;  %897 = vmatprep.subr.mxu0 %v104_v53 }
  0x3a   :  { %932 = vmatprep.subr.mxu1 %v136_v54  ;;  %898 = vmatpush3.msra.mxu0 %v88_v55 }
  0x3b   :  { %933 = vmatpush3.msra.mxu1 %v120_v56  ;;  %899 = vmatprep.subr.mxu0 %v103_v58 }
  0x3c   :  { %934 = vmatprep.subr.mxu1 %v135_v59  ;;  %900 = vmatpush3.msra.mxu0 %v87_v60 }
  0x3d   :  { %935 = vmatpush3.msra.mxu1 %v119_v61  ;;  %901 = vmatprep.subr.mxu0 %v102_v62 }
  0x3e   :  { %936 = vmatprep.subr.mxu1 %v134_v63  ;;  %902 = vmatpush3.msra.mxu0 %v86_v1 }
  0x3f   :  { %937 = vmatpush3.msra.mxu1 %v118_v2  ;;  %903 = vmatprep.subr.mxu0 %v101_v3 }
  0x40   :  { %938 = vmatprep.subr.mxu1 %v133_v4  ;;  %904 = vmatpush3.msra.mxu0 %v85_v6 }
  0x41   :  { %939 = vmatpush3.msra.mxu1 %v117_v7  ;;  %905 = vmatprep.subr.mxu0 %v100_v8 }
  0x42   :  { %940 = vmatprep.subr.mxu1 %v132_v9  ;;  %906 = vmatpush3.msra.mxu0 %v84_v11 }
  0x43   :  { %941 = vmatpush3.msra.mxu1 %v116_v12  ;;  %907 = vmatprep.subr.mxu0 %v99_v13 }
  0x44   :  { %942 = vmatprep.subr.mxu1 %v131_v14  ;;  %908 = vmatpush3.msra.mxu0 %v83_v16 }
  0x45   :  { %503 = vmatprep.mubr.f32.mxu0 %v258_v15  ;;  %943 = vmatpush3.msra.mxu1 %v115_v17 }
  0x46   :  { %504 = vmatmul.mubr.f32.vlgmr.msra.gmra.mxu0 %v250_v5 }
  0x47   :  { %8 = vsyncpa [#allocation3], 0  ;;  %573 = vmatprep.mubr.f32.mxu1 %v259_v18  ;;  %947 = vmatprep.subr.mxu0 %v178_v19  ;;  %v177_v23 = vld [vmem:[%s1701_s1 + $0x4f0] sm:$0xff]  ;;  %v176_v27 = vld [vmem:[%s1701_s1 + $0x4e8] sm:$0xff]  ;;  %vm1064_vm0 = vmmov 0   ;;  %vm296_vm1 = vcmask 261120  }
  0x48   :  { %v209_v24 = vld [vmem:[%s1701_s1 + $0x5f0] sm:$0xff]  ;;  %982 = vmatprep.subr.mxu1 %v210_v20  ;;  %574 = vmatmul.mubr.f32.vlgmr.msra.gmra.mxu1 %v257_v10  ;;  %v208_v28 = vld [vmem:[%s1701_s1 + $0x5e8] sm:$0xff]  ;;  %v175_v31 = vld [vmem:[%s1701_s1 + $0x4e0] sm:$0xff] }
  0x49   :  { %v161_v25 = vld [vmem:[%s1701_s1 + $0x470] sm:$0xff]  ;;  %948 = vmatpush3.msra.mxu0 %v162_v21  ;;  %983 = vmatpush3.msra.mxu1 %v194_v22  ;;  %v160_v29 = vld [vmem:[%s1701_s1 + $0x468] sm:$0xff]  ;;  %v207_v32 = vld [vmem:[%s1701_s1 + $0x5e0] sm:$0xff] }
  0x4a   :  { %v193_v26 = vld [vmem:[%s1701_s1 + $0x570] sm:$0xff]  ;;  %949 = vmatprep.subr.mxu0 %v177_v23  ;;  %984 = vmatprep.subr.mxu1 %v209_v24  ;;  %v192_v30 = vld [vmem:[%s1701_s1 + $0x568] sm:$0xff]  ;;  %v159_v33 = vld [vmem:[%s1701_s1 + $0x460] sm:$0xff] }
  0x4b   :  { %950 = vmatpush3.msra.mxu0 %v161_v25  ;;  %985 = vmatpush3.msra.mxu1 %v193_v26  ;;  %v191_v34 = vld [vmem:[%s1701_s1 + $0x560] sm:$0xff]  ;;  %v174_v35 = vld [vmem:[%s1701_s1 + $0x4d8] sm:$0xff]  ;;  %v173_v39 = vld [vmem:[%s1701_s1 + $0x4d0] sm:$0xff]  ;;  %v1063_v26 = vmov 0.0  }
  0x4c   :  { %951 = vmatprep.subr.mxu0 %v176_v27  ;;  %986 = vmatprep.subr.mxu1 %v208_v28  ;;  %v206_v36 = vld [vmem:[%s1701_s1 + $0x5d8] sm:$0xff]  ;;  %v205_v40 = vld [vmem:[%s1701_s1 + $0x5d0] sm:$0xff]  ;;  %v172_v43 = vld [vmem:[%s1701_s1 + $0x4c8] sm:$0xff] }
  0x4d   :  { %952 = vmatpush3.msra.mxu0 %v160_v29  ;;  %987 = vmatpush3.msra.mxu1 %v192_v30  ;;  %v158_v37 = vld [vmem:[%s1701_s1 + $0x458] sm:$0xff]  ;;  %v157_v41 = vld [vmem:[%s1701_s1 + $0x450] sm:$0xff]  ;;  %v204_v44 = vld [vmem:[%s1701_s1 + $0x5c8] sm:$0xff] }
  0x4e   :  { %953 = vmatprep.subr.mxu0 %v175_v31  ;;  %988 = vmatprep.subr.mxu1 %v207_v32  ;;  %v190_v38 = vld [vmem:[%s1701_s1 + $0x558] sm:$0xff]  ;;  %v189_v42 = vld [vmem:[%s1701_s1 + $0x550] sm:$0xff]  ;;  %v156_v45 = vld [vmem:[%s1701_s1 + $0x448] sm:$0xff] }
  0x4f   :  { %954 = vmatpush3.msra.mxu0 %v159_v33  ;;  %989 = vmatpush3.msra.mxu1 %v191_v34  ;;  %v188_v46 = vld [vmem:[%s1701_s1 + $0x548] sm:$0xff]  ;;  %v171_v47 = vld [vmem:[%s1701_s1 + $0x4c0] sm:$0xff]  ;;  %v170_v52 = vld [vmem:[%s1701_s1 + $0x4b8] sm:$0xff] }
  0x50   :  { %955 = vmatprep.subr.mxu0 %v174_v35  ;;  %990 = vmatprep.subr.mxu1 %v206_v36  ;;  %v203_v48 = vld [vmem:[%s1701_s1 + $0x5c0] sm:$0xff]  ;;  %v202_v53 = vld [vmem:[%s1701_s1 + $0x5b8] sm:$0xff]  ;;  %v169_v56 = vld [vmem:[%s1701_s1 + $0x4b0] sm:$0xff] }
  0x51   :  { %956 = vmatpush3.msra.mxu0 %v158_v37  ;;  %991 = vmatpush3.msra.mxu1 %v190_v38  ;;  %v155_v49 = vld [vmem:[%s1701_s1 + $0x440] sm:$0xff]  ;;  %v154_v54 = vld [vmem:[%s1701_s1 + $0x438] sm:$0xff]  ;;  %v201_v57 = vld [vmem:[%s1701_s1 + $0x5b0] sm:$0xff] }
  0x52   :  { %957 = vmatprep.subr.mxu0 %v173_v39  ;;  %992 = vmatprep.subr.mxu1 %v205_v40  ;;  %v187_v50 = vld [vmem:[%s1701_s1 + $0x540] sm:$0xff]  ;;  %v186_v55 = vld [vmem:[%s1701_s1 + $0x538] sm:$0xff]  ;;  %v153_v58 = vld [vmem:[%s1701_s1 + $0x430] sm:$0xff] }
  0x53   :  { %958 = vmatpush3.msra.mxu0 %v157_v41  ;;  %993 = vmatpush3.msra.mxu1 %v189_v42  ;;  %v185_v59 = vld [vmem:[%s1701_s1 + $0x530] sm:$0xff]  ;;  %v168_v60 = vld [vmem:[%s1701_s1 + $0x4a8] sm:$0xff]  ;;  %v167_v1 = vld [vmem:[%s1701_s1 + $0x4a0] sm:$0xff] }
  0x54   :  { %959 = vmatprep.subr.mxu0 %v172_v43  ;;  %994 = vmatprep.subr.mxu1 %v204_v44  ;;  %v200_v61 = vld [vmem:[%s1701_s1 + $0x5a8] sm:$0xff]  ;;  %v17_v62 = vld [vmem:[%s1700_s0 + $0x10] sm:$0xff]  ;;  %v199_v2 = vld [vmem:[%s1701_s1 + $0x5a0] sm:$0xff] }
  0x55   :  { %960 = vmatpush3.msra.mxu0 %v156_v45  ;;  %995 = vmatpush3.msra.mxu1 %v188_v46  ;;  %v152_v63 = vld [vmem:[%s1701_s1 + $0x428] sm:$0xff]  ;;  %v151_v3 = vld [vmem:[%s1701_s1 + $0x420] sm:$0xff]  ;;  %v260_v5 = vcombine.high %v17_v62, %v17_v62  ;;  %v166_v6 = vld [vmem:[%s1701_s1 + $0x498] sm:$0xff]  ;;  %v267_v12 = vrot.slane %v17_v62, %v1224_v51 }
  0x56   :  { %961 = vmatprep.subr.mxu0 %v171_v47  ;;  %996 = vmatprep.subr.mxu1 %v203_v48  ;;  %v184_v0 = vld [vmem:[%s1701_s1 + $0x528] sm:$0xff]  ;;  %v183_v4 = vld [vmem:[%s1701_s1 + $0x520] sm:$0xff]  ;;  %v198_v7 = vld [vmem:[%s1701_s1 + $0x598] sm:$0xff] }
  0x57   :  { %962 = vmatpush3.msra.mxu0 %v155_v49  ;;  %997 = vmatpush3.msra.mxu1 %v187_v50  ;;  %v150_v8 = vld [vmem:[%s1701_s1 + $0x418] sm:$0xff]  ;;  %v165_v10 = vld [vmem:[%s1701_s1 + $0x490] sm:$0xff]  ;;  %v274_v15 = vrot.slane %v260_v5, %v1224_v51  ;;  %v164_v16 = vld [vmem:[%s1701_s1 + $0x488] sm:$0xff]  ;;  %v275_v21 = vcombine.high %v267_v12, %v267_v12 }
  0x58   :  { %963 = vmatprep.subr.mxu0 %v170_v52  ;;  %998 = vmatprep.subr.mxu1 %v202_v53  ;;  %v182_v9 = vld [vmem:[%s1701_s1 + $0x518] sm:$0xff]  ;;  %v197_v11 = vld [vmem:[%s1701_s1 + $0x590] sm:$0xff]  ;;  %v196_v17 = vld [vmem:[%s1701_s1 + $0x588] sm:$0xff] }
  0x59   :  { %964 = vmatpush3.msra.mxu0 %v154_v54  ;;  %999 = vmatpush3.msra.mxu1 %v186_v55  ;;  %v149_v13 = vld [vmem:[%s1701_s1 + $0x410] sm:$0xff]  ;;  %v148_v18 = vld [vmem:[%s1701_s1 + $0x408] sm:$0xff]  ;;  %v163_v19 = vld [vmem:[%s1701_s1 + $0x480] sm:$0xff]  ;;  %v276_v23 = vcombine.high %v274_v15, %v274_v15 }
  0x5a   :  { %965 = vmatprep.subr.mxu0 %v169_v56  ;;  %1000 = vmatprep.subr.mxu1 %v201_v57  ;;  %v181_v14 = vld [vmem:[%s1701_s1 + $0x510] sm:$0xff]  ;;  %v180_v51 = vld [vmem:[%s1701_s1 + $0x508] sm:$0xff]  ;;  %v195_v20 = vld [vmem:[%s1701_s1 + $0x580] sm:$0xff] }
  0x5b   :  { %966 = vmatpush3.msra.mxu0 %v153_v58  ;;  %1001 = vmatpush3.msra.mxu1 %v185_v59  ;;  %v147_v22 = vld [vmem:[%s1701_s1 + $0x400] sm:$0xff]  ;;  %v214_v25 = vld [vmem:[%s1701_s1 + $0x618] sm:$0xff]  ;;  %v213_v27 = vld [vmem:[%s1701_s1 + $0x610] sm:$0xff] }
  0x5c   :  { %967 = vmatprep.subr.mxu0 %v168_v60  ;;  %1002 = vmatprep.subr.mxu1 %v200_v61  ;;  %v179_v24 = vld [vmem:[%s1701_s1 + $0x500] sm:$0xff]  ;;  %v212_v28 = vld [vmem:[%s1701_s1 + $0x608] sm:$0xff]  ;;  %v805_v30 = vld.sshfl [vmem:[%s1700_s0 + $0x18] sm:$0x3 pattern:$0x76325410] }
  0x5d   :  { %968 = vmatpush3.msra.mxu0 %v152_v63  ;;  %1003 = vmatpush3.msra.mxu1 %v184_v0  ;;  %v211_v29 = vld [vmem:[%s1701_s1 + $0x600] sm:$0xff]  ;;  %s1065_s0 = smov [#allocation2]  }
  0x5e   :  { %969 = vmatprep.subr.mxu0 %v167_v1  ;;  %1004 = vmatprep.subr.mxu1 %v199_v2  ;;  %v804_v36 = vld [vmem:[%s1702_s2] ss:$0 sm:$0xff]  ;;  %s796_s1 = sshll.u32 %s1065_s0, 4  ;;  %s797_s1 = int_to_ptr.vmem [resolvable:$true] %s796_s1 }
  0x5f   :  { %970 = vmatpush3.msra.mxu0 %v151_v3  ;;  %1005 = vmatpush3.msra.mxu1 %v183_v4  ;;  %s1040_s2 = scalar_lea.vmem %s797_s1, 32  ;;  %p1045_p1 = scmp.lt.s32.totalorder %s797_s1, %s797_s1 }
  0x60   :  { %971 = vmatprep.subr.mxu0 %v166_v6  ;;  %1006 = vmatprep.subr.mxu1 %v198_v7  ;;  %p1041_p0 = scmp.ne.s32.totalorder %s797_s1, %s1040_s2  ;;  %p1046_p2 = scmp.lt.s32.totalorder %s1040_s2, %s1040_s2 }
  0x61   :  { %972 = vmatpush3.msra.mxu0 %v150_v8  ;;  %1007 = vmatpush3.msra.mxu1 %v182_v9 }
  0x62   :  { %973 = vmatprep.subr.mxu0 %v165_v10  ;;  %1008 = vmatprep.subr.mxu1 %v197_v11  ;;  %p1047_p3 = por %p1046_p2, %p1045_p1 }
  0x63   :  { %974 = vmatpush3.msra.mxu0 %v149_v13  ;;  %1009 = vmatpush3.msra.mxu1 %v181_v14 }
  0x64   :  { %975 = vmatprep.subr.mxu0 %v164_v16  ;;  %1010 = vmatprep.subr.mxu1 %v196_v17  ;;  %p1048_p4 = pnand %p1047_p3, %p1041_p0 }
  0x65   :  { %976 = vmatpush3.msra.mxu0 %v148_v18  ;;  %1011 = vmatpush3.msra.mxu1 %v180_v51 }
  0x66   :  { %977 = vmatprep.subr.mxu0 %v163_v19  ;;  %1012 = vmatprep.subr.mxu1 %v195_v20 }
  0x67   :  { %978 = vmatpush3.msra.mxu0 %v147_v22  ;;  %643 = vmatprep.mubr.f32.mxu0 %v275_v21 }
  0x68   :  { %1013 = vmatpush3.msra.mxu1 %v179_v24  ;;  %713 = vmatprep.mubr.f32.mxu1 %v276_v23 }
  0x69   :  { %644 = vmatmul.mubr.f32.vlgmr.msra.gmra.mxu0 %v267_v12  ;;  %714 = vmatmul.mubr.f32.vlgmr.msra.gmra.mxu1 %v274_v15 }
  0x6a   :  { %1022 = vmatprep.subr.mxu0 %v1063_v26  ;;  %1030 = vmatprep.mubr.msk.f32.mxu0 %vm1064_vm0, %v1063_v26 }
  0x6b   :  { %1023 = vmatpush3.msra.mxu0 %v214_v25 }
  0x6c   :  { %1024 = vmatprep.subr.mxu0 %v1063_v26 }
  0x6d   :  { %1025 = vmatpush3.msra.mxu0 %v213_v27 }
  0x6e   :  { %1026 = vmatprep.subr.mxu0 %v1063_v26 }
  0x6f   :  { %1027 = vmatpush3.msra.mxu0 %v212_v28 }
  0x70   :  { %1028 = vmatprep.subr.mxu0 %v1063_v26 }
  0x71   :  { %1029 = vmatpush3.msra.mxu0 %v211_v29 }
  0x72   :  { %1031 = vmatmul.mubr.msk.f32.vlgmr.msra.gmra.mxu0 %vm296_vm1, %v805_v30 }
  0xe4   :  { %v839_v31 = vpop.f32.mrf.mxu0 }
  0xe6   :  { %v874_v32 = vpop.f32.mrf.mxu1  ;;  %v840_v33 = vpop.f32.mrf.mxu0 }
  0xe7   :  { %v841_v35 = vadd.f32 %v840_v33, %v839_v31 }
  0xe8   :  { %v875_v37 = vpop.f32.mrf.mxu1 }
  0xe9   :  { %v366_v40 = vadd.f32 %v841_v35, %v804_v36  ;;  %v876_v41 = vadd.f32 %v875_v37, %v874_v32 }
  0xeb   :  { %v436_v44 = vadd.f32 %v876_v41, %v366_v40 }
 0x106   :  { %v909_v34 = vpop.f32.mrf.mxu0 }
 0x108   :  { %v944_v38 = vpop.f32.mrf.mxu1  ;;  %v910_v39 = vpop.f32.mrf.mxu0 }
 0x109   :  { %v911_v42 = vadd.f32 %v910_v39, %v909_v34 }
 0x10a   :  { %v945_v43 = vpop.f32.mrf.mxu1 }
 0x10b   :  { %v506_v45 = vadd.f32 %v911_v42, %v436_v44  ;;  %v946_v46 = vadd.f32 %v945_v43, %v944_v38 }
 0x10d   :  { %v576_v52 = vadd.f32 %v946_v46, %v506_v45 }
 0x129   :  { %v979_v47 = vpop.f32.mrf.mxu0  ;;  %v1014_v48 = vpop.f32.mrf.mxu1 }
 0x12b   :  { %v980_v49 = vpop.f32.mrf.mxu0  ;;  %v1015_v50 = vpop.f32.mrf.mxu1 }
 0x12c   :  { %v981_v53 = vadd.f32 %v980_v49, %v979_v47  ;;  %v1016_v55 = vadd.f32 %v1015_v50, %v1014_v48 }
 0x12e   :  { %v646_v54 = vadd.f32 %v981_v53, %v576_v52 }
 0x130   :  { %v716_v56 = vadd.f32 %v1016_v55, %v646_v54 }
 0x132   :  { %v785_v57 = vpop.f32.mrf.mxu0 }
 0x133   :  { %v786_v58 = vadd.f32 %v785_v57, %v716_v56 }
 0x134   :  { %v1032_v59 = vpop.f32.mrf.mxu0 }
 0x135   :  { %789 = vst [vmem:[#allocation2] sm:$0x3] %v786_v58 }
 0x136   :  { %1051 = shalt.err (!%p1048_p4)
}
 0x137   :  { %799 = dma.vmem_to_hbm [thread:$0]  %s797_s1, 32, %s1703_s3, [#allocation3]  }
 0x138   :  { %1060 = dma.done.wait [#allocation3], 32  }
 0x139   :  { %1061 = vsyncadd [#allocation3], 4294967264 }
 0x13a   :  { %803 = vsyncpa [#allocation3], 1 }

</bundles_post_ra>
